<compile_context>
chip_gen: v7x
topology: tpu7x:2x2x1
jax: 0.10.0
libtpu: 0.0.40
codegen_flags: <defaults>
</compile_context>

<pallas_src>
import jax
import jax.numpy as jnp
from jax import lax
from jax.experimental import pallas as pl
from jax.experimental.pallas import tpu as pltpu

BN_EPS = 1e-5


def _softmax_rows(x):
    m = jnp.max(x, axis=1, keepdims=True)
    e = jnp.exp(x - m)
    return e * pl.reciprocal(jnp.sum(e, axis=1, keepdims=True), approx=True)


def _bn_relu(z, gamma, beta):
    # BatchNorm1d, training mode: batch mean, biased batch variance (per column).
    mean = jnp.mean(z, axis=0, keepdims=True)
    var = jnp.mean((z - mean) * (z - mean), axis=0, keepdims=True)
    zh = (z - mean) * lax.rsqrt(var + BN_EPS)
    return jnp.maximum(zh * gamma + beta, 0.0)


def _sigmoid(z):
    return pl.reciprocal(1.0 + jnp.exp(-z), approx=True)


def _tile_selector(C, F, dtype):
    # (F, C*F) 0/1 matrix S with S[f, c*F + f] = 1, so  f @ S  lane-tiles f, C times.
    r = lax.broadcasted_iota(jnp.int32, (F, C * F), 0)
    k = lax.broadcasted_iota(jnp.int32, (F, C * F), 1)
    m = (k - r) == 0
    for c in range(1, C):
        m = m | ((k - r) == c * F)
    return m.astype(dtype)


def _block_selector(C, F, dtype):
    # (C, C*F) 0/1 matrix P with P[c, c*F + f] = 1, so  p @ P  lane-expands each
    # class probability across an F-wide block (loop-free iota construction).
    r = lax.broadcasted_iota(jnp.int32, (C, C * F), 0)
    k = lax.broadcasted_iota(jnp.int32, (C, C * F), 1)
    m = (k >= r * F) & (k < (r + 1) * F)
    return m.astype(dtype)


def _combination_korn_kernel(
    f1_ref, l1_ref, f2_ref, l2_ref,
    w1_ref, b1_ref, g1_ref, be1_ref,
    w2_ref, b2_ref, g2_ref, be2_ref,
    w3a_ref, b3a_ref, w3b_ref, b3b_ref,
    out_ref,
    a1_ref, za_ref, zb_ref,
):
    j = pl.program_id(0)
    last = pl.num_programs(0) - 1

    @pl.when(j == 0)
    def _layer1():
        B, F = f1_ref.shape
        C = l1_ref.shape[1]
        CF = C * F

        p1 = _softmax_rows(l1_ref[...])
        p2 = _softmax_rows(l2_ref[...])

        # Multilinear map as a lane-dense (B, C*F) operand so the first Linear
        # is a single K = C*F matmul per branch.  Both expansions use the MXU.
        sel_f = _tile_selector(C, F, jnp.bfloat16)     # (F, C*F)
        sel_p = _block_selector(C, F, jnp.float32)     # (C, C*F)

        f1_tiled = jnp.dot(f1_ref[...].astype(jnp.bfloat16), sel_f,
                           preferred_element_type=jnp.float32)
        f2_tiled = jnp.dot(f2_ref[...].astype(jnp.bfloat16), sel_f,
                           preferred_element_type=jnp.float32)
        p1_exp = jnp.dot(p1, sel_p, preferred_element_type=jnp.float32)
        p2_exp = jnp.dot(p2, sel_p, preferred_element_type=jnp.float32)

        x1 = (f1_tiled * p1_exp).astype(jnp.bfloat16)  # (B, C*F)
        x2 = (f2_tiled * p2_exp).astype(jnp.bfloat16)  # (B, C*F)

        z1 = (jnp.dot(x1, w1_ref[:CF, :], preferred_element_type=jnp.float32)
              + jnp.dot(x2, w1_ref[CF:, :], preferred_element_type=jnp.float32)
              + b1_ref[...])
        a1_ref[...] = _bn_relu(z1, g1_ref[...], be1_ref[...]).astype(a1_ref.dtype)

        # Layer-3 accumulators start at their biases (saves the final adds).
        za_ref[...] = jnp.broadcast_to(b3a_ref[...], za_ref.shape)
        zb_ref[...] = jnp.broadcast_to(b3b_ref[...], zb_ref.shape)

    # Layer 2 on this column tile of W2.  BN2 statistics are per-column, so the
    # hidden-dim tiling is numerically exact.
    a1 = a1_ref[...]                                    # already bf16
    z2 = jnp.dot(a1, w2_ref[...], preferred_element_type=jnp.float32) + b2_ref[...]
    a2 = _bn_relu(z2, g2_ref[...], be2_ref[...]).astype(jnp.bfloat16)

    # Layer-3 partial sums: the hidden-dim contraction is spread over the grid.
    za_ref[...] += jnp.dot(a2, w3a_ref[...], preferred_element_type=jnp.float32)
    zb_ref[...] += jnp.dot(a2, w3b_ref[...], preferred_element_type=jnp.float32)

    @pl.when(j == last)
    def _finalize():
        w = _sigmoid(za_ref[...]) + _sigmoid(zb_ref[...])
        out_ref[...] = (f1_ref[...] * w).astype(out_ref.dtype)


def combination_korn_1(f1, l1, f2, l2, params, *, tile_h=256):
    B, F = f1.shape
    C = l1.shape[1]

    # Stream all matmul weights as bf16 (f32 accumulation in-kernel).
    w1 = params["w1"].astype(jnp.bfloat16)
    w2 = params["w2"].astype(jnp.bfloat16)
    w3a = params["w3a"].astype(jnp.bfloat16)
    w3b = params["w3b"].astype(jnp.bfloat16)
    in_dim, H = w1.shape
    assert in_dim == 2 * C * F
    assert H % tile_h == 0 and tile_h % 128 == 0
    n_tiles = H // tile_h

    grid_spec = pltpu.PrefetchScalarGridSpec(
        num_scalar_prefetch=0,
        grid=(n_tiles,),
        in_specs=[
            pl.BlockSpec((B, F), lambda j: (0, 0)),        # feature1
            pl.BlockSpec((B, C), lambda j: (0, 0)),        # label1
            pl.BlockSpec((B, F), lambda j: (0, 0)),        # feature2
            pl.BlockSpec((B, C), lambda j: (0, 0)),        # label2
            pl.BlockSpec((in_dim, H), lambda j: (0, 0)),   # W1 (resident, DMA'd once)
            pl.BlockSpec((1, H), lambda j: (0, 0)),        # b1
            pl.BlockSpec((1, H), lambda j: (0, 0)),        # gamma1
            pl.BlockSpec((1, H), lambda j: (0, 0)),        # beta1
            pl.BlockSpec((H, tile_h), lambda j: (0, j)),   # W2 column tile
            pl.BlockSpec((1, tile_h), lambda j: (0, j)),   # b2 tile
            pl.BlockSpec((1, tile_h), lambda j: (0, j)),   # gamma2 tile
            pl.BlockSpec((1, tile_h), lambda j: (0, j)),   # beta2 tile
            pl.BlockSpec((tile_h, F), lambda j: (j, 0)),   # W3a row tile
            pl.BlockSpec((1, F), lambda j: (0, 0)),        # b3a
            pl.BlockSpec((tile_h, F), lambda j: (j, 0)),   # W3b row tile
            pl.BlockSpec((1, F), lambda j: (0, 0)),        # b3b
        ],
        out_specs=pl.BlockSpec((B, F), lambda j: (0, 0)),
        scratch_shapes=[
            pltpu.VMEM((B, H), jnp.bfloat16),  # a1 = ReLU(BN1(L1(x))) stored bf16
            pltpu.VMEM((B, F), jnp.float32),   # layer-3 partial sum (half a)
            pltpu.VMEM((B, F), jnp.float32),   # layer-3 partial sum (half b)
        ],
    )

    return pl.pallas_call(
        _combination_korn_kernel,
        out_shape=jax.ShapeDtypeStruct((B, F), jnp.float32),
        grid_spec=grid_spec,
        compiler_params=pltpu.CompilerParams(
            dimension_semantics=("arbitrary",),   # layer-3 accumulation across tiles
            vmem_limit_bytes=32 << 20,
        ),
    )(f1, l1, f2, l2,
      w1, params["b1"], params["g1"], params["be1"],
      w2, params["b2"], params["g2"], params["be2"],
      w3a, params["b3a"], w3b, params["b3b"])


def _reference(f1, l1, f2, l2, params):
    # Pure-JAX f32 reference mirroring the PyTorch graph (correctness check).
    B, F = f1.shape
    p1 = jax.nn.softmax(l1, axis=1)
    p2 = jax.nn.softmax(l2, axis=1)
    h1 = (p1[:, :, None] * f1[:, None, :]).reshape(B, -1)
    h2 = (p2[:, :, None] * f2[:, None, :]).reshape(B, -1)
    x = jnp.concatenate([h1, h2], axis=1)

    def bn_relu(z, g, be):
        mean = jnp.mean(z, axis=0, keepdims=True)
        var = jnp.mean((z - mean) ** 2, axis=0, keepdims=True)
        return jnp.maximum((z - mean) * lax.rsqrt(var + BN_EPS) * g + be, 0.0)

    z1 = x @ params["w1"] + params["b1"]
    a1 = bn_relu(z1, params["g1"], params["be1"])
    z2 = a1 @ params["w2"] + params["b2"]
    a2 = bn_relu(z2, params["g2"], params["be2"])
    wa = jax.nn.sigmoid(a2 @ params["w3a"] + params["b3a"])
    wb = jax.nn.sigmoid(a2 @ params["w3b"] + params["b3b"])
    return f1 * wa + f1 * wb


def init_params(key, features_dim, num_classes, hidden=1024):
    in_dim = 2 * features_dim * num_classes
    ks = jax.random.split(key, 3)

    def lin(k, fan_in, fan_out):
        bound = 1.0 / jnp.sqrt(fan_in)
        kw, kb = jax.random.split(k)
        w = jax.random.uniform(kw, (fan_in, fan_out), jnp.float32, -bound, bound)
        b = jax.random.uniform(kb, (1, fan_out), jnp.float32, -bound, bound)
        return w, b

    w1, b1 = lin(ks[0], in_dim, hidden)
    w2, b2 = lin(ks[1], hidden, hidden)
    w3, b3 = lin(ks[2], hidden, 2 * features_dim)
    return {
        "w1": w1, "b1": b1,
        "g1": jnp.ones((1, hidden), jnp.float32), "be1": jnp.zeros((1, hidden), jnp.float32),
        "w2": w2, "b2": b2,
        "g2": jnp.ones((1, hidden), jnp.float32), "be2": jnp.zeros((1, hidden), jnp.float32),
        "w3a": w3[:, :features_dim], "b3a": b3[:, :features_dim],
        "w3b": w3[:, features_dim:], "b3b": b3[:, features_dim:],
    }


if __name__ == "__main__":
    B, F, C = 8, 32, 8  # F * C = 256 <= 4096 -> MultiLinearMap branch
    key = jax.random.PRNGKey(0)
    k1, k2, k3, k4, kp = jax.random.split(key, 5)
    feature1 = jax.random.normal(k1, (B, F), jnp.float32)
    label1 = jax.random.normal(k2, (B, C), jnp.float32)
    feature2 = jax.random.normal(k3, (B, F), jnp.float32)
    label2 = jax.random.normal(k4, (B, C), jnp.float32)
    params = init_params(kp, F, C)

    out = combination_korn_1(feature1, label1, feature2, label2, params)
    out = jax.block_until_ready(out)

    ref = _reference(feature1, label1, feature2, label2, params)
    assert out.shape == (B, F)
    # bf16 weight/operand streaming + approx reciprocal => few-percent tolerance.
    assert jnp.allclose(out, ref, rtol=5e-2, atol=5e-2), "mismatch vs reference"
    print("KERNEL_OK")
</pallas_src>

<mosaic_0001>
module attributes {stable_mosaic.version = 11 : i64} {
  func.func @_combination_korn_kernel(%arg0: i32, %arg1: memref<8x32xf32, #tpu.memory_space<vmem>>, %arg2: memref<8x8xf32, #tpu.memory_space<vmem>>, %arg3: memref<8x32xf32, #tpu.memory_space<vmem>>, %arg4: memref<8x8xf32, #tpu.memory_space<vmem>>, %arg5: memref<512x1024xbf16, #tpu.memory_space<vmem>>, %arg6: memref<1x1024xf32, #tpu.memory_space<vmem>>, %arg7: memref<1x1024xf32, #tpu.memory_space<vmem>>, %arg8: memref<1x1024xf32, #tpu.memory_space<vmem>>, %arg9: memref<1024x256xbf16, #tpu.memory_space<vmem>>, %arg10: memref<1x256xf32, #tpu.memory_space<vmem>>, %arg11: memref<1x256xf32, #tpu.memory_space<vmem>>, %arg12: memref<1x256xf32, #tpu.memory_space<vmem>>, %arg13: memref<256x32xbf16, #tpu.memory_space<vmem>>, %arg14: memref<1x32xf32, #tpu.memory_space<vmem>>, %arg15: memref<256x32xbf16, #tpu.memory_space<vmem>>, %arg16: memref<1x32xf32, #tpu.memory_space<vmem>>, %arg17: memref<8x32xf32, #tpu.memory_space<vmem>>, %arg18: memref<8x1024xbf16, #tpu.memory_space<vmem>>, %arg19: memref<8x32xf32, #tpu.memory_space<vmem>>, %arg20: memref<8x32xf32, #tpu.memory_space<vmem>>) attributes {dimension_semantics = [#tpu.dimension_semantics<arbitrary>], iteration_bounds = array<i64: 4>, scalar_prefetch = 0 : i64, scratch_operands = 3 : i64, tpu.core_type = #tpu.core_type<tc>, window_params = [{pipeline_mode = #tpu.pipeline_mode<synchronous>, transform_indices = @transform_0, window_bounds = array<i64: 8, 32>}, {pipeline_mode = #tpu.pipeline_mode<synchronous>, transform_indices = @transform_1, window_bounds = array<i64: 8, 8>}, {pipeline_mode = #tpu.pipeline_mode<synchronous>, transform_indices = @transform_2, window_bounds = array<i64: 8, 32>}, {pipeline_mode = #tpu.pipeline_mode<synchronous>, transform_indices = @transform_3, window_bounds = array<i64: 8, 8>}, {pipeline_mode = #tpu.pipeline_mode<synchronous>, transform_indices = @transform_4, window_bounds = array<i64: 512, 1024>}, {pipeline_mode = #tpu.pipeline_mode<synchronous>, transform_indices = @transform_5, window_bounds = array<i64: 1, 1024>}, {pipeline_mode = #tpu.pipeline_mode<synchronous>, transform_indices = @transform_6, window_bounds = array<i64: 1, 1024>}, {pipeline_mode = #tpu.pipeline_mode<synchronous>, transform_indices = @transform_7, window_bounds = array<i64: 1, 1024>}, {transform_indices = @transform_8, window_bounds = array<i64: 1024, 256>}, {transform_indices = @transform_9, window_bounds = array<i64: 1, 256>}, {transform_indices = @transform_10, window_bounds = array<i64: 1, 256>}, {transform_indices = @transform_11, window_bounds = array<i64: 1, 256>}, {transform_indices = @transform_12, window_bounds = array<i64: 256, 32>}, {pipeline_mode = #tpu.pipeline_mode<synchronous>, transform_indices = @transform_13, window_bounds = array<i64: 1, 32>}, {transform_indices = @transform_14, window_bounds = array<i64: 256, 32>}, {pipeline_mode = #tpu.pipeline_mode<synchronous>, transform_indices = @transform_15, window_bounds = array<i64: 1, 32>}, {pipeline_mode = #tpu.pipeline_mode<synchronous>, transform_indices = @transform_16, window_bounds = array<i64: 8, 32>}]} {
    %c0_i32 = arith.constant 0 : i32
    %0 = arith.cmpi eq, %arg0, %c0_i32 : i32
    %1 = arith.extui %0 : i1 to i32
    %c0_i32_0 = arith.constant 0 : i32
    %2 = arith.cmpi ne, %1, %c0_i32_0 : i32
    scf.if %2 {
      %c0_31 = arith.constant 0 : index
      %c0_32 = arith.constant 0 : index
      %51 = vector.load %arg2[%c0_31, %c0_32] : memref<8x8xf32, #tpu.memory_space<vmem>>, vector<8x8xf32>
      %cst_33 = arith.constant dense<0xFF800000> : vector<8xf32>
      %52 = vector.multi_reduction <maximumf>, %51, %cst_33 [1] : vector<8x8xf32> to vector<8xf32>
      %53 = vector.shape_cast %52 : vector<8xf32> to vector<8x1xf32>
      %54 = vector.broadcast %53 : vector<8x1xf32> to vector<8x8xf32>
      %55 = arith.subf %51, %54 : vector<8x8xf32>
      %56 = math.exp %55 : vector<8x8xf32>
      %cst_34 = arith.constant dense<0.000000e+00> : vector<8xf32>
      %57 = vector.multi_reduction <add>, %56, %cst_34 [1] : vector<8x8xf32> to vector<8xf32>
      %58 = vector.shape_cast %57 : vector<8xf32> to vector<8x1xf32>
      %59 = tpu.reciprocal %58 {approx = true} : vector<8x1xf32> -> vector<8x1xf32>
      %60 = vector.broadcast %59 : vector<8x1xf32> to vector<8x8xf32>
      %61 = arith.mulf %56, %60 : vector<8x8xf32>
      %c0_35 = arith.constant 0 : index
      %c0_36 = arith.constant 0 : index
      %62 = vector.load %arg4[%c0_35, %c0_36] : memref<8x8xf32, #tpu.memory_space<vmem>>, vector<8x8xf32>
      %cst_37 = arith.constant dense<0xFF800000> : vector<8xf32>
      %63 = vector.multi_reduction <maximumf>, %62, %cst_37 [1] : vector<8x8xf32> to vector<8xf32>
      %64 = vector.shape_cast %63 : vector<8xf32> to vector<8x1xf32>
      %65 = vector.broadcast %64 : vector<8x1xf32> to vector<8x8xf32>
      %66 = arith.subf %62, %65 : vector<8x8xf32>
      %67 = math.exp %66 : vector<8x8xf32>
      %cst_38 = arith.constant dense<0.000000e+00> : vector<8xf32>
      %68 = vector.multi_reduction <add>, %67, %cst_38 [1] : vector<8x8xf32> to vector<8xf32>
      %69 = vector.shape_cast %68 : vector<8xf32> to vector<8x1xf32>
      %70 = tpu.reciprocal %69 {approx = true} : vector<8x1xf32> -> vector<8x1xf32>
      %71 = vector.broadcast %70 : vector<8x1xf32> to vector<8x8xf32>
      %72 = arith.mulf %67, %71 : vector<8x8xf32>
      %73 = tpu.iota {dimensions = array<i32: 0>} : vector<32x256xi32>
      %74 = tpu.iota {dimensions = array<i32: 1>} : vector<32x256xi32>
      %75 = arith.subi %74, %73 : vector<32x256xi32>
      %c0_i32_39 = arith.constant 0 : i32
      %76 = vector.broadcast %c0_i32_39 : i32 to vector<32x256xi32>
      %77 = arith.cmpi eq, %75, %76 : vector<32x256xi32>
      %78 = arith.subi %74, %73 : vector<32x256xi32>
      %c32_i32 = arith.constant 32 : i32
      %79 = vector.broadcast %c32_i32 : i32 to vector<32x256xi32>
      %80 = arith.cmpi eq, %78, %79 : vector<32x256xi32>
      %81 = arith.ori %77, %80 : vector<32x256xi1>
      %82 = arith.subi %74, %73 : vector<32x256xi32>
      %c64_i32 = arith.constant 64 : i32
      %83 = vector.broadcast %c64_i32 : i32 to vector<32x256xi32>
      %84 = arith.cmpi eq, %82, %83 : vector<32x256xi32>
      %85 = arith.ori %81, %84 : vector<32x256xi1>
      %86 = arith.subi %74, %73 : vector<32x256xi32>
      %c96_i32 = arith.constant 96 : i32
      %87 = vector.broadcast %c96_i32 : i32 to vector<32x256xi32>
      %88 = arith.cmpi eq, %86, %87 : vector<32x256xi32>
      %89 = arith.ori %85, %88 : vector<32x256xi1>
      %90 = arith.subi %74, %73 : vector<32x256xi32>
      %c128_i32 = arith.constant 128 : i32
      %91 = vector.broadcast %c128_i32 : i32 to vector<32x256xi32>
      %92 = arith.cmpi eq, %90, %91 : vector<32x256xi32>
      %93 = arith.ori %89, %92 : vector<32x256xi1>
      %94 = arith.subi %74, %73 : vector<32x256xi32>
      %c160_i32 = arith.constant 160 : i32
      %95 = vector.broadcast %c160_i32 : i32 to vector<32x256xi32>
      %96 = arith.cmpi eq, %94, %95 : vector<32x256xi32>
      %97 = arith.ori %93, %96 : vector<32x256xi1>
      %98 = arith.subi %74, %73 : vector<32x256xi32>
      %c192_i32 = arith.constant 192 : i32
      %99 = vector.broadcast %c192_i32 : i32 to vector<32x256xi32>
      %100 = arith.cmpi eq, %98, %99 : vector<32x256xi32>
      %101 = arith.ori %97, %100 : vector<32x256xi1>
      %102 = arith.subi %74, %73 : vector<32x256xi32>
      %c224_i32 = arith.constant 224 : i32
      %103 = vector.broadcast %c224_i32 : i32 to vector<32x256xi32>
      %104 = arith.cmpi eq, %102, %103 : vector<32x256xi32>
      %105 = arith.ori %101, %104 : vector<32x256xi1>
      %106 = arith.extui %105 : vector<32x256xi1> to vector<32x256xi32>
      %107 = arith.sitofp %106 : vector<32x256xi32> to vector<32x256xf32>
      %108 = arith.truncf %107 : vector<32x256xf32> to vector<32x256xbf16>
      %109 = tpu.iota {dimensions = array<i32: 0>} : vector<8x256xi32>
      %110 = tpu.iota {dimensions = array<i32: 1>} : vector<8x256xi32>
      %c32_i32_40 = arith.constant 32 : i32
      %111 = vector.broadcast %c32_i32_40 : i32 to vector<8x256xi32>
      %112 = arith.muli %109, %111 : vector<8x256xi32>
      %113 = arith.cmpi sge, %110, %112 : vector<8x256xi32>
      %c1_i32 = arith.constant 1 : i32
      %114 = vector.broadcast %c1_i32 : i32 to vector<8x256xi32>
      %115 = arith.addi %109, %114 : vector<8x256xi32>
      %c32_i32_41 = arith.constant 32 : i32
      %116 = vector.broadcast %c32_i32_41 : i32 to vector<8x256xi32>
      %117 = arith.muli %115, %116 : vector<8x256xi32>
      %118 = arith.cmpi slt, %110, %117 : vector<8x256xi32>
      %119 = arith.andi %113, %118 : vector<8x256xi1>
      %120 = arith.extui %119 : vector<8x256xi1> to vector<8x256xi32>
      %121 = arith.sitofp %120 : vector<8x256xi32> to vector<8x256xf32>
      %c0_42 = arith.constant 0 : index
      %c0_43 = arith.constant 0 : index
      %122 = vector.load %arg1[%c0_42, %c0_43] : memref<8x32xf32, #tpu.memory_space<vmem>>, vector<8x32xf32>
      %123 = arith.truncf %122 : vector<8x32xf32> to vector<8x32xbf16>
      %cst_44 = arith.constant dense<0.000000e+00> : vector<8x256xf32>
      %124 = tpu.matmul %123, %108, %cst_44 {dimension_numbers = #tpu.dot_dimension_numbers<[1], [0], [0], [1], [0, 0, 1, 1], [], []>} : vector<8x32xbf16>, vector<32x256xbf16>, vector<8x256xf32> -> vector<8x256xf32>
      %c0_45 = arith.constant 0 : index
      %c0_46 = arith.constant 0 : index
      %125 = vector.load %arg3[%c0_45, %c0_46] : memref<8x32xf32, #tpu.memory_space<vmem>>, vector<8x32xf32>
      %126 = arith.truncf %125 : vector<8x32xf32> to vector<8x32xbf16>
      %cst_47 = arith.constant dense<0.000000e+00> : vector<8x256xf32>
      %127 = tpu.matmul %126, %108, %cst_47 {dimension_numbers = #tpu.dot_dimension_numbers<[1], [0], [0], [1], [0, 0, 1, 1], [], []>} : vector<8x32xbf16>, vector<32x256xbf16>, vector<8x256xf32> -> vector<8x256xf32>
      %cst_48 = arith.constant dense<0.000000e+00> : vector<8x256xf32>
      %128 = tpu.matmul %61, %121, %cst_48 {dimension_numbers = #tpu.dot_dimension_numbers<[1], [0], [0], [1], [0, 0, 1, 1], [], []>} : vector<8x8xf32>, vector<8x256xf32>, vector<8x256xf32> -> vector<8x256xf32>
      %cst_49 = arith.constant dense<0.000000e+00> : vector<8x256xf32>
      %129 = tpu.matmul %72, %121, %cst_49 {dimension_numbers = #tpu.dot_dimension_numbers<[1], [0], [0], [1], [0, 0, 1, 1], [], []>} : vector<8x8xf32>, vector<8x256xf32>, vector<8x256xf32> -> vector<8x256xf32>
      %130 = arith.mulf %124, %128 : vector<8x256xf32>
      %131 = arith.truncf %130 : vector<8x256xf32> to vector<8x256xbf16>
      %132 = arith.mulf %127, %129 : vector<8x256xf32>
      %133 = arith.truncf %132 : vector<8x256xf32> to vector<8x256xbf16>
      %c0_50 = arith.constant 0 : index
      %c0_51 = arith.constant 0 : index
      %134 = vector.load %arg5[%c0_50, %c0_51] : memref<512x1024xbf16, #tpu.memory_space<vmem>>, vector<256x1024xbf16>
      %cst_52 = arith.constant dense<0.000000e+00> : vector<8x1024xf32>
      %135 = tpu.matmul %131, %134, %cst_52 {dimension_numbers = #tpu.dot_dimension_numbers<[1], [0], [0], [1], [0, 0, 1, 1], [], []>} : vector<8x256xbf16>, vector<256x1024xbf16>, vector<8x1024xf32> -> vector<8x1024xf32>
      %c256 = arith.constant 256 : index
      %c0_53 = arith.constant 0 : index
      %136 = vector.load %arg5[%c256, %c0_53] : memref<512x1024xbf16, #tpu.memory_space<vmem>>, vector<256x1024xbf16>
      %cst_54 = arith.constant dense<0.000000e+00> : vector<8x1024xf32>
      %137 = tpu.matmul %133, %136, %cst_54 {dimension_numbers = #tpu.dot_dimension_numbers<[1], [0], [0], [1], [0, 0, 1, 1], [], []>} : vector<8x256xbf16>, vector<256x1024xbf16>, vector<8x1024xf32> -> vector<8x1024xf32>
      %138 = arith.addf %135, %137 : vector<8x1024xf32>
      %c0_55 = arith.constant 0 : index
      %c0_56 = arith.constant 0 : index
      %139 = vector.load %arg6[%c0_55, %c0_56] : memref<1x1024xf32, #tpu.memory_space<vmem>>, vector<1x1024xf32>
      %140 = vector.broadcast %139 : vector<1x1024xf32> to vector<8x1024xf32>
      %141 = arith.addf %138, %140 : vector<8x1024xf32>
      %c0_57 = arith.constant 0 : index
      %c0_58 = arith.constant 0 : index
      %142 = vector.load %arg7[%c0_57, %c0_58] : memref<1x1024xf32, #tpu.memory_space<vmem>>, vector<1x1024xf32>
      %c0_59 = arith.constant 0 : index
      %c0_60 = arith.constant 0 : index
      %143 = vector.load %arg8[%c0_59, %c0_60] : memref<1x1024xf32, #tpu.memory_space<vmem>>, vector<1x1024xf32>
      %cst_61 = arith.constant dense<0.000000e+00> : vector<1024xf32>
      %144 = vector.multi_reduction <add>, %141, %cst_61 [0] : vector<8x1024xf32> to vector<1024xf32>
      %145 = vector.shape_cast %144 : vector<1024xf32> to vector<1x1024xf32>
      %cst_62 = arith.constant 8.000000e+00 : f32
      %146 = vector.broadcast %cst_62 : f32 to vector<1x1024xf32>
      %147 = arith.divf %145, %146 : vector<1x1024xf32>
      %148 = vector.broadcast %147 : vector<1x1024xf32> to vector<8x1024xf32>
      %149 = arith.subf %141, %148 : vector<8x1024xf32>
      %150 = vector.broadcast %147 : vector<1x1024xf32> to vector<8x1024xf32>
      %151 = arith.subf %141, %150 : vector<8x1024xf32>
      %152 = arith.mulf %149, %151 : vector<8x1024xf32>
      %cst_63 = arith.constant dense<0.000000e+00> : vector<1024xf32>
      %153 = vector.multi_reduction <add>, %152, %cst_63 [0] : vector<8x1024xf32> to vector<1024xf32>
      %154 = vector.shape_cast %153 : vector<1024xf32> to vector<1x1024xf32>
      %cst_64 = arith.constant 8.000000e+00 : f32
      %155 = vector.broadcast %cst_64 : f32 to vector<1x1024xf32>
      %156 = arith.divf %154, %155 : vector<1x1024xf32>
      %157 = vector.broadcast %147 : vector<1x1024xf32> to vector<8x1024xf32>
      %158 = arith.subf %141, %157 : vector<8x1024xf32>
      %cst_65 = arith.constant 9.99999974E-6 : f32
      %159 = vector.broadcast %cst_65 : f32 to vector<1x1024xf32>
      %160 = arith.addf %156, %159 : vector<1x1024xf32>
      %161 = math.rsqrt %160 : vector<1x1024xf32>
      %162 = vector.broadcast %161 : vector<1x1024xf32> to vector<8x1024xf32>
      %163 = arith.mulf %158, %162 : vector<8x1024xf32>
      %164 = vector.broadcast %142 : vector<1x1024xf32> to vector<8x1024xf32>
      %165 = arith.mulf %163, %164 : vector<8x1024xf32>
      %166 = vector.broadcast %143 : vector<1x1024xf32> to vector<8x1024xf32>
      %167 = arith.addf %165, %166 : vector<8x1024xf32>
      %cst_66 = arith.constant 0.000000e+00 : f32
      %168 = vector.broadcast %cst_66 : f32 to vector<8x1024xf32>
      %169 = arith.maximumf %167, %168 : vector<8x1024xf32>
      %170 = arith.truncf %169 : vector<8x1024xf32> to vector<8x1024xbf16>
      %c0_67 = arith.constant 0 : index
      %c0_68 = arith.constant 0 : index
      %171 = vector.load %arg18[%c0_67, %c0_68] : memref<8x1024xbf16, #tpu.memory_space<vmem>>, vector<8x1024xbf16>
      tpu.vector_store %arg18[%c0_67, %c0_68], %170 {strides = array<i32>} : memref<8x1024xbf16, #tpu.memory_space<vmem>>, vector<8x1024xbf16>,
      %c0_69 = arith.constant 0 : index
      %c0_70 = arith.constant 0 : index
      %172 = vector.load %arg14[%c0_69, %c0_70] : memref<1x32xf32, #tpu.memory_space<vmem>>, vector<1x32xf32>
      %173 = vector.shape_cast %172 : vector<1x32xf32> to vector<1x32xf32>
      %174 = vector.broadcast %173 : vector<1x32xf32> to vector<8x32xf32>
      %c0_71 = arith.constant 0 : index
      %c0_72 = arith.constant 0 : index
      %175 = vector.load %arg19[%c0_71, %c0_72] : memref<8x32xf32, #tpu.memory_space<vmem>>, vector<8x32xf32>
      tpu.vector_store %arg19[%c0_71, %c0_72], %174 {strides = array<i32>} : memref<8x32xf32, #tpu.memory_space<vmem>>, vector<8x32xf32>,
      %c0_73 = arith.constant 0 : index
      %c0_74 = arith.constant 0 : index
      %176 = vector.load %arg16[%c0_73, %c0_74] : memref<1x32xf32, #tpu.memory_space<vmem>>, vector<1x32xf32>
      %177 = vector.shape_cast %176 : vector<1x32xf32> to vector<1x32xf32>
      %178 = vector.broadcast %177 : vector<1x32xf32> to vector<8x32xf32>
      %c0_75 = arith.constant 0 : index
      %c0_76 = arith.constant 0 : index
      %179 = vector.load %arg20[%c0_75, %c0_76] : memref<8x32xf32, #tpu.memory_space<vmem>>, vector<8x32xf32>
      tpu.vector_store %arg20[%c0_75, %c0_76], %178 {strides = array<i32>} : memref<8x32xf32, #tpu.memory_space<vmem>>, vector<8x32xf32>,
    } else {
    }
    %c0 = arith.constant 0 : index
    %c0_1 = arith.constant 0 : index
    %3 = vector.load %arg18[%c0, %c0_1] : memref<8x1024xbf16, #tpu.memory_space<vmem>>, vector<8x1024xbf16>
    %c0_2 = arith.constant 0 : index
    %c0_3 = arith.constant 0 : index
    %4 = vector.load %arg9[%c0_2, %c0_3] : memref<1024x256xbf16, #tpu.memory_space<vmem>>, vector<1024x256xbf16>
    %cst = arith.constant dense<0.000000e+00> : vector<8x256xf32>
    %5 = tpu.matmul %3, %4, %cst {dimension_numbers = #tpu.dot_dimension_numbers<[1], [0], [0], [1], [0, 0, 1, 1], [], []>} : vector<8x1024xbf16>, vector<1024x256xbf16>, vector<8x256xf32> -> vector<8x256xf32>
    %c0_4 = arith.constant 0 : index
    %c0_5 = arith.constant 0 : index
    %6 = vector.load %arg10[%c0_4, %c0_5] : memref<1x256xf32, #tpu.memory_space<vmem>>, vector<1x256xf32>
    %7 = vector.broadcast %6 : vector<1x256xf32> to vector<8x256xf32>
    %8 = arith.addf %5, %7 : vector<8x256xf32>
    %c0_6 = arith.constant 0 : index
    %c0_7 = arith.constant 0 : index
    %9 = vector.load %arg11[%c0_6, %c0_7] : memref<1x256xf32, #tpu.memory_space<vmem>>, vector<1x256xf32>
    %c0_8 = arith.constant 0 : index
    %c0_9 = arith.constant 0 : index
    %10 = vector.load %arg12[%c0_8, %c0_9] : memref<1x256xf32, #tpu.memory_space<vmem>>, vector<1x256xf32>
    %cst_10 = arith.constant dense<0.000000e+00> : vector<256xf32>
    %11 = vector.multi_reduction <add>, %8, %cst_10 [0] : vector<8x256xf32> to vector<256xf32>
    %12 = vector.shape_cast %11 : vector<256xf32> to vector<1x256xf32>
    %cst_11 = arith.constant 8.000000e+00 : f32
    %13 = vector.broadcast %cst_11 : f32 to vector<1x256xf32>
    %14 = arith.divf %12, %13 : vector<1x256xf32>
    %15 = vector.broadcast %14 : vector<1x256xf32> to vector<8x256xf32>
    %16 = arith.subf %8, %15 : vector<8x256xf32>
    %17 = vector.broadcast %14 : vector<1x256xf32> to vector<8x256xf32>
    %18 = arith.subf %8, %17 : vector<8x256xf32>
    %19 = arith.mulf %16, %18 : vector<8x256xf32>
    %cst_12 = arith.constant dense<0.000000e+00> : vector<256xf32>
    %20 = vector.multi_reduction <add>, %19, %cst_12 [0] : vector<8x256xf32> to vector<256xf32>
    %21 = vector.shape_cast %20 : vector<256xf32> to vector<1x256xf32>
    %cst_13 = arith.constant 8.000000e+00 : f32
    %22 = vector.broadcast %cst_13 : f32 to vector<1x256xf32>
    %23 = arith.divf %21, %22 : vector<1x256xf32>
    %24 = vector.broadcast %14 : vector<1x256xf32> to vector<8x256xf32>
    %25 = arith.subf %8, %24 : vector<8x256xf32>
    %cst_14 = arith.constant 9.99999974E-6 : f32
    %26 = vector.broadcast %cst_14 : f32 to vector<1x256xf32>
    %27 = arith.addf %23, %26 : vector<1x256xf32>
    %28 = math.rsqrt %27 : vector<1x256xf32>
    %29 = vector.broadcast %28 : vector<1x256xf32> to vector<8x256xf32>
    %30 = arith.mulf %25, %29 : vector<8x256xf32>
    %31 = vector.broadcast %9 : vector<1x256xf32> to vector<8x256xf32>
    %32 = arith.mulf %30, %31 : vector<8x256xf32>
    %33 = vector.broadcast %10 : vector<1x256xf32> to vector<8x256xf32>
    %34 = arith.addf %32, %33 : vector<8x256xf32>
    %cst_15 = arith.constant 0.000000e+00 : f32
    %35 = vector.broadcast %cst_15 : f32 to vector<8x256xf32>
    %36 = arith.maximumf %34, %35 : vector<8x256xf32>
    %37 = arith.truncf %36 : vector<8x256xf32> to vector<8x256xbf16>
    %c0_16 = arith.constant 0 : index
    %c0_17 = arith.constant 0 : index
    %38 = vector.load %arg19[%c0_16, %c0_17] : memref<8x32xf32, #tpu.memory_space<vmem>>, vector<8x32xf32>
    %c0_18 = arith.constant 0 : index
    %c0_19 = arith.constant 0 : index
    %39 = vector.load %arg13[%c0_18, %c0_19] : memref<256x32xbf16, #tpu.memory_space<vmem>>, vector<256x32xbf16>
    %cst_20 = arith.constant dense<0.000000e+00> : vector<8x32xf32>
    %40 = tpu.matmul %37, %39, %cst_20 {dimension_numbers = #tpu.dot_dimension_numbers<[1], [0], [0], [1], [0, 0, 1, 1], [], []>} : vector<8x256xbf16>, vector<256x32xbf16>, vector<8x32xf32> -> vector<8x32xf32>
    %41 = arith.addf %38, %40 : vector<8x32xf32>
    %c0_21 = arith.constant 0 : index
    %c0_22 = arith.constant 0 : index
    %42 = vector.load %arg19[%c0_21, %c0_22] : memref<8x32xf32, #tpu.memory_space<vmem>>, vector<8x32xf32>
    tpu.vector_store %arg19[%c0_21, %c0_22], %41 {strides = array<i32>} : memref<8x32xf32, #tpu.memory_space<vmem>>, vector<8x32xf32>,
    %c0_23 = arith.constant 0 : index
    %c0_24 = arith.constant 0 : index
    %43 = vector.load %arg20[%c0_23, %c0_24] : memref<8x32xf32, #tpu.memory_space<vmem>>, vector<8x32xf32>
    %c0_25 = arith.constant 0 : index
    %c0_26 = arith.constant 0 : index
    %44 = vector.load %arg15[%c0_25, %c0_26] : memref<256x32xbf16, #tpu.memory_space<vmem>>, vector<256x32xbf16>
    %cst_27 = arith.constant dense<0.000000e+00> : vector<8x32xf32>
    %45 = tpu.matmul %37, %44, %cst_27 {dimension_numbers = #tpu.dot_dimension_numbers<[1], [0], [0], [1], [0, 0, 1, 1], [], []>} : vector<8x256xbf16>, vector<256x32xbf16>, vector<8x32xf32> -> vector<8x32xf32>
    %46 = arith.addf %43, %45 : vector<8x32xf32>
    %c0_28 = arith.constant 0 : index
    %c0_29 = arith.constant 0 : index
    %47 = vector.load %arg20[%c0_28, %c0_29] : memref<8x32xf32, #tpu.memory_space<vmem>>, vector<8x32xf32>
    tpu.vector_store %arg20[%c0_28, %c0_29], %46 {strides = array<i32>} : memref<8x32xf32, #tpu.memory_space<vmem>>, vector<8x32xf32>,
    %c3_i32 = arith.constant 3 : i32
    %48 = arith.cmpi eq, %arg0, %c3_i32 : i32
    %49 = arith.extui %48 : i1 to i32
    %c0_i32_30 = arith.constant 0 : i32
    %50 = arith.cmpi ne, %49, %c0_i32_30 : i32
    scf.if %50 {
      %c0_31 = arith.constant 0 : index
      %c0_32 = arith.constant 0 : index
      %51 = vector.load %arg19[%c0_31, %c0_32] : memref<8x32xf32, #tpu.memory_space<vmem>>, vector<8x32xf32>
      %cst_33 = arith.constant 0.000000e+00 : f32
      %52 = vector.broadcast %cst_33 : f32 to vector<8x32xf32>
      %53 = arith.subf %52, %51 : vector<8x32xf32>
      %54 = math.exp %53 : vector<8x32xf32>
      %cst_34 = arith.constant 1.000000e+00 : f32
      %55 = vector.broadcast %cst_34 : f32 to vector<8x32xf32>
      %56 = arith.addf %55, %54 : vector<8x32xf32>
      %57 = tpu.reciprocal %56 {approx = true} : vector<8x32xf32> -> vector<8x32xf32>
      %c0_35 = arith.constant 0 : index
      %c0_36 = arith.constant 0 : index
      %58 = vector.load %arg20[%c0_35, %c0_36] : memref<8x32xf32, #tpu.memory_space<vmem>>, vector<8x32xf32>
      %cst_37 = arith.constant 0.000000e+00 : f32
      %59 = vector.broadcast %cst_37 : f32 to vector<8x32xf32>
      %60 = arith.subf %59, %58 : vector<8x32xf32>
      %61 = math.exp %60 : vector<8x32xf32>
      %cst_38 = arith.constant 1.000000e+00 : f32
      %62 = vector.broadcast %cst_38 : f32 to vector<8x32xf32>
      %63 = arith.addf %62, %61 : vector<8x32xf32>
      %64 = tpu.reciprocal %63 {approx = true} : vector<8x32xf32> -> vector<8x32xf32>
      %65 = arith.addf %57, %64 : vector<8x32xf32>
      %c0_39 = arith.constant 0 : index
      %c0_40 = arith.constant 0 : index
      %66 = vector.load %arg1[%c0_39, %c0_40] : memref<8x32xf32, #tpu.memory_space<vmem>>, vector<8x32xf32>
      %67 = arith.mulf %66, %65 : vector<8x32xf32>
      %c0_41 = arith.constant 0 : index
      %c0_42 = arith.constant 0 : index
      %68 = vector.load %arg17[%c0_41, %c0_42] : memref<8x32xf32, #tpu.memory_space<vmem>>, vector<8x32xf32>
      tpu.vector_store %arg17[%c0_41, %c0_42], %67 {strides = array<i32>} : memref<8x32xf32, #tpu.memory_space<vmem>>, vector<8x32xf32>,
    } else {
    }
    return
  }
  func.func @transform_0(%arg0: i32) -> (i32, i32) {
    %c0_i32 = arith.constant 0 : i32
    %c0_i32_0 = arith.constant 0 : i32
    %c0_i32_1 = arith.constant 0 : i32
    return %c0_i32, %c0_i32_0 : i32, i32
  }
  func.func @transform_1(%arg0: i32) -> (i32, i32) {
    %c0_i32 = arith.constant 0 : i32
    %c0_i32_0 = arith.constant 0 : i32
    %c0_i32_1 = arith.constant 0 : i32
    return %c0_i32, %c0_i32_0 : i32, i32
  }
  func.func @transform_2(%arg0: i32) -> (i32, i32) {
    %c0_i32 = arith.constant 0 : i32
    %c0_i32_0 = arith.constant 0 : i32
    %c0_i32_1 = arith.constant 0 : i32
    return %c0_i32, %c0_i32_0 : i32, i32
  }
  func.func @transform_3(%arg0: i32) -> (i32, i32) {
    %c0_i32 = arith.constant 0 : i32
    %c0_i32_0 = arith.constant 0 : i32
    %c0_i32_1 = arith.constant 0 : i32
    return %c0_i32, %c0_i32_0 : i32, i32
  }
  func.func @transform_4(%arg0: i32) -> (i32, i32) {
    %c0_i32 = arith.constant 0 : i32
    %c0_i32_0 = arith.constant 0 : i32
    %c0_i32_1 = arith.constant 0 : i32
    return %c0_i32, %c0_i32_0 : i32, i32
  }
  func.func @transform_5(%arg0: i32) -> (i32, i32) {
    %c0_i32 = arith.constant 0 : i32
    %c0_i32_0 = arith.constant 0 : i32
    %c0_i32_1 = arith.constant 0 : i32
    return %c0_i32, %c0_i32_0 : i32, i32
  }
  func.func @transform_6(%arg0: i32) -> (i32, i32) {
    %c0_i32 = arith.constant 0 : i32
    %c0_i32_0 = arith.constant 0 : i32
    %c0_i32_1 = arith.constant 0 : i32
    return %c0_i32, %c0_i32_0 : i32, i32
  }
  func.func @transform_7(%arg0: i32) -> (i32, i32) {
    %c0_i32 = arith.constant 0 : i32
    %c0_i32_0 = arith.constant 0 : i32
    %c0_i32_1 = arith.constant 0 : i32
    return %c0_i32, %c0_i32_0 : i32, i32
  }
  func.func @transform_8(%arg0: i32) -> (i32, i32) {
    %c0_i32 = arith.constant 0 : i32
    %c0_i32_0 = arith.constant 0 : i32
    return %c0_i32, %arg0 : i32, i32
  }
  func.func @transform_9(%arg0: i32) -> (i32, i32) {
    %c0_i32 = arith.constant 0 : i32
    %c0_i32_0 = arith.constant 0 : i32
    return %c0_i32, %arg0 : i32, i32
  }
  func.func @transform_10(%arg0: i32) -> (i32, i32) {
    %c0_i32 = arith.constant 0 : i32
    %c0_i32_0 = arith.constant 0 : i32
    return %c0_i32, %arg0 : i32, i32
  }
  func.func @transform_11(%arg0: i32) -> (i32, i32) {
    %c0_i32 = arith.constant 0 : i32
    %c0_i32_0 = arith.constant 0 : i32
    return %c0_i32, %arg0 : i32, i32
  }
  func.func @transform_12(%arg0: i32) -> (i32, i32) {
    %c0_i32 = arith.constant 0 : i32
    %c0_i32_0 = arith.constant 0 : i32
    return %arg0, %c0_i32 : i32, i32
  }
  func.func @transform_13(%arg0: i32) -> (i32, i32) {
    %c0_i32 = arith.constant 0 : i32
    %c0_i32_0 = arith.constant 0 : i32
    %c0_i32_1 = arith.constant 0 : i32
    return %c0_i32, %c0_i32_0 : i32, i32
  }
  func.func @transform_14(%arg0: i32) -> (i32, i32) {
    %c0_i32 = arith.constant 0 : i32
    %c0_i32_0 = arith.constant 0 : i32
    return %arg0, %c0_i32 : i32, i32
  }
  func.func @transform_15(%arg0: i32) -> (i32, i32) {
    %c0_i32 = arith.constant 0 : i32
    %c0_i32_0 = arith.constant 0 : i32
    %c0_i32_1 = arith.constant 0 : i32
    return %c0_i32, %c0_i32_0 : i32, i32
  }
  func.func @transform_16(%arg0: i32) -> (i32, i32) {
    %c0_i32 = arith.constant 0 : i32
    %c0_i32_0 = arith.constant 0 : i32
    %c0_i32_1 = arith.constant 0 : i32
    return %c0_i32, %c0_i32_0 : i32, i32
  }
}

</mosaic_0001>

<bundles_post_ra>
// kernel: tpu_custom_call.1
= control target key start
LH: loop header
LB: loop body
LE: loop exit
PB: predicated region body
PF: predicated region fallthrough
CT: control target
= control target key end

     0   :  { %s7566_s0 = inlined_call_operand.hbm [shape: f32[8,32], index: 0, kind: input, shape index: {}]   ;;  %s7567_s1 = inlined_call_operand.hbm [shape: f32[8,8], index: 1, kind: input, shape index: {}]   ;;  %s7568_s2 = inlined_call_operand.hbm [shape: f32[8,32], index: 2, kind: input, shape index: {}]   ;;  %s7569_s3 = inlined_call_operand.hbm [shape: f32[8,8], index: 3, kind: input, shape index: {}]   ;;  %s7570_s4 = inlined_call_operand.hbm [shape: bf16[512,1024], index: 4, kind: input, shape index: {}]   ;;  %s7571_s5 = inlined_call_operand.hbm [shape: f32[1,1024], index: 5, kind: input, shape index: {}]   ;;  %s7572_s6 = inlined_call_operand.hbm [shape: f32[1,1024], index: 6, kind: input, shape index: {}]   ;;  %s7573_s7 = inlined_call_operand.hbm [shape: f32[1,1024], index: 7, kind: input, shape index: {}]   ;;  %s7574_s8 = inlined_call_operand.hbm [shape: bf16[1024,1024], index: 8, kind: input, shape index: {}]   ;;  %s7575_s9 = inlined_call_operand.hbm [shape: f32[1,1024], index: 9, kind: input, shape index: {}]   ;;  %s7576_s10 = inlined_call_operand.hbm [shape: f32[1,1024], index: 10, kind: input, shape index: {}]   ;;  %s7577_s11 = inlined_call_operand.hbm [shape: f32[1,1024], index: 11, kind: input, shape index: {}]   ;;  %s7578_s12 = inlined_call_operand.vmem [shape: bf16[1024,32], index: 12, kind: input, shape index: {}]   ;;  %s7579_s13 = inlined_call_operand.hbm [shape: f32[1,32], index: 13, kind: input, shape index: {}]   ;;  %s7580_s14 = inlined_call_operand.vmem [shape: bf16[1024,32], index: 14, kind: input, shape index: {}]   ;;  %s7581_s15 = inlined_call_operand.hbm [shape: f32[1,32], index: 15, kind: input, shape index: {}]   ;;  %s7582_s16 = inlined_call_operand.hbm [shape: f32[8,32], index: 16, kind: output, shape index: {}]  }
   0x1   :  { %7618 = sst [smem:[#allocation41_spill]] %s7566_s0 }
   0x2   :  { %7619 = sst [smem:[#allocation42_spill]] %s7567_s1 }
   0x3   :  { %7620 = sst [smem:[#allocation43_spill]] %s7573_s7 }
   0x4   :  { %7621 = sst [smem:[#allocation44_spill]] %s7574_s8 }
   0x5   :  { %7622 = sst [smem:[#allocation45_spill]] %s7577_s11 }
   0x6   :  { %7623 = sst [smem:[#allocation46_spill]] %s7578_s12 }
   0x7   :  { %7624 = sst [smem:[#allocation47_spill]] %s7579_s13 }
   0x8   :  { %7625 = sst [smem:[#allocation48_spill]] %s7580_s14 }
   0x9   :  { %7626 = sst [smem:[#allocation49_spill]] %s7581_s15 }
   0xa   :  { %7627 = sst [smem:[#allocation50_spill]] %s7582_s16 }
   0xb   :  { %21 = vsyncpa [#allocation6], 0 }
   0xc   :  { %22 = vsyncpa [#allocation9], 0 }
   0xd   :  { %23 = vsyncpa [#allocation12], 0 }
   0xe   :  { %24 = vsyncpa [#allocation15], 0 }
   0xf   :  { %25 = vsyncpa [#allocation18], 0 }
  0x10   :  { %26 = vsyncpa [#allocation7], 0  ;;  %s6743_s21 = smov 0   ;;  %s6745_s22 = smov 0  }
  0x11   :  { %s6747_s23 = smov 0   ;;  %s6749_s24 = smov 0  }
  0x12 LB: > { %7628 = sst [smem:[#allocation35_spill]] %s6625_s22  ;;  %s6635_s25 = smov [#allocation5]   ;;  %s6633_s24 = sphi %s6749_s24, %s7696_s24   ;;  %s6629_s23 = sphi %s6747_s23, %s7700_s23   ;;  %s6625_s22 = sphi %s6745_s22, %s7699_s22   ;;  %s6621_s21 = sphi %s6743_s21, %s7697_s21  }
  0x13   : > { %s437_s26 = sshll.u32 %s6635_s25, 4  ;;  %s6764_s27 = sadd.s32 4294967295, %s6633_s24   ;;  %s438_s26 = int_to_ptr.vmem [resolvable:$true] %s437_s26 }
  0x14   : > { %7629 = sst [smem:[#allocation36_spill]] %s6764_s27  ;;  %p5126_p0 = scmp.ge.s32.totalorder %s6633_s24, 1 }
  0x15   : > { %p7587_p1 = scmp.eq.s32.totalorder %s6764_s27, 0  ;;  %p424_p2 = scmp.lt.s32.totalorder %s6633_s24, 5 }
  0x16   : > { %s6783_s30 = sadd.s32 1, %s6633_s24   ;;  %s207_s0 = sadd.s32 1, %s6629_s23 }
  0x17   : > { %p6770_p4 = pnand %p5126_p0, %p424_p2  ;;  %7633 = sst [smem:[#allocation38_spill]] %s6783_s30 }
  0x18   : > { %s204_s17 = ssub.s32 %s6633_s24, %s6783_s30  ;;  %s7634_s20 = sld [smem:[#allocation41_spill]] }
  0x19   : > { %s7630_s28 = scalar_select %p6770_p4, 1, 0 }
  0x1a   : > { %p5755_p5 = pneg %p6770_p4 }
  0x1b   : > { %7631 = sst [smem:[#allocation37_spill]] %s7630_s28 }
  0x1c   : > { %p6778_p6 = pnand %p5755_p5, %p7587_p1 }
  0x1e   : > { %s7632_s29 = scalar_select %p6778_p6, 1, 0 }
  0x1f   : > { %s6141_s25 = scalar_lea.hbm %s7634_s20, 128  ;;  %p6796_p8 = pneg %p6778_p6 }
  0x20   : > { %p6142_p7 = scmp.ne.s32.totalorder %s7634_s20, %s6141_s25  ;;  %p6148_p11 = scmp.lt.u32.totalorder %s6141_s25, %s7634_s20 }
  0x21   : > { %s7635_s12 = scalar_select %p6796_p8, 1, 0 }
  0x22   : > { %p6144_p9 = pnand %p6796_p8, %p6142_p7 }
  0x24   : > { %p6145_p10 = pneg %p6144_p9 }
  0x26   : > { %p6150_p12 = pnand %p6148_p11, %p6145_p10 }
  0x28   : > { %6153 = shalt.err (!%p6150_p12)
}
  0x29   : > { %s6154_s18 = scalar_lea.vmem %s438_s26, 128  ;;  %p6162_p5 = scmp.lt.s32.totalorder %s438_s26, %s438_s26 }
  0x2a   : > { %p6155_p13 = scmp.ne.s32.totalorder %s438_s26, %s6154_s18  ;;  %p6163_p3 = scmp.lt.s32.totalorder %s6154_s18, %s6154_s18 }
  0x2c   : > { %p6157_p0 = pnand %p6155_p13, %p6796_p8  ;;  %p6164_p1 = por %p6163_p3, %p6162_p5 }
  0x2e   : > { %p6158_p2 = pneg %p6157_p0 }
  0x30   : > { %p6165_p4 = pnand %p6164_p1, %p6158_p2 }
  0x32   : > { %6168 = shalt.err (!%p6165_p4)
}
  0x33   : > { %5758 = dma.hbm_to_vmem [thread:$0]  (!%p6778_p6), %s7634_s20, 128, %s438_s26, [#allocation6]  }
  0x34   : > { %p205_p1 = scmp.eq.s32.totalorder %s204_s17, 0  ;;  %p214_p3 = scmp.ne.s32.totalorder %s6629_s23, %s6625_s22 }
  0x35   : > { %p215_p4 = scmp.eq.s32.totalorder %s6633_s24, 0  ;;  %p220_p7 = scmp.ne.s32.totalorder %s6625_s22, %s6621_s21 }
  0x36   : > { %s6818_s11 = scalar_select %p205_p1, %s6629_s23, %s207_s0  }
  0x37   : > { %p216_p9 = por %p215_p4, %p214_p3  ;;  %p7637_p10 = scmp.eq.s32.totalorder %s6764_s27, 0 }
  0x38   : > { %7636 = sst [smem:[#allocation39_spill]] %s6818_s11  ;;  %p5809_p12 = scmp.lt.s32.totalorder %s6633_s24, 4 }
  0x39   : > { %p6822_p11 = por %p7637_p10, %p220_p7  ;;  %s549_s19 = sand.u32 1, %s6633_s24  }
  0x3a   : > { %s7590_s25 = sand.u32 1, %s6629_s23   ;;  %s5639_s14 = sshll.u32 %s6633_s24, 7 }
  0x3b   : > { %s7638_s28 = scalar_select %p6822_p11, 1, 0 }
  0x3c   : > { %s5138_s18 = sshll.u32 %s7590_s25, 10  ;;  %s7640_s8 = sld [smem:[#allocation44_spill]] }
  0x3d   : > { %7639 = sst [smem:[#allocation40_spill]] %s7638_s28  ;;  %s553_s21 = scalar_lea.vmem [#allocation19], %s5138_s18 }
  0x3e   : > { %s560_s0 = sshll.u32 %s553_s21, 4  ;;  %p6839_p13 = pnand %p5809_p12, %p216_p9  ;;  %s6837_s0 = int_to_ptr.vmem [resolvable:$true] %s560_s0 }
  0x3f   : > { %s6843_s25 = scalar_lea.sflag [#allocation6], %s549_s19 }
  0x40   : > { %s7641_s20 = scalar_select %p6839_p13, 1, 0 }
  0x41   : > { %p6849_p2 = pneg %p6839_p13 }
  0x42   : > { %s6835_s17 = scalar_lea.hbm %s7640_s8, %s5639_s14  ;;  %s6174_s26 = scalar_lea.hbm %s7640_s8, 65536 }
  0x43   : > { %s6169_s11 = scalar_lea.hbm %s6835_s17, 16384  ;;  %p6175_p3 = scmp.lt.u32.totalorder %s6835_s17, %s7640_s8 }
  0x44   : > { %p6170_p0 = scmp.ne.s32.totalorder %s6835_s17, %s6169_s11  ;;  %p6176_p4 = scmp.lt.u32.totalorder %s6174_s26, %s6169_s11 }
  0x45   : > { %s7642_s14 = scalar_select %p6849_p2, 1, 0 }
  0x46   : > { %p6172_p5 = pnand %p6849_p2, %p6170_p0  ;;  %p6177_p7 = por %p6176_p4, %p6175_p3 }
  0x47   : > { %p6178_p9 = scmp.lt.u32.totalorder %s6169_s11, %s6835_s17 }
  0x48   : > { %p6173_p1 = pneg %p6172_p5 }
  0x49   : > { %p6179_p10 = por %p6178_p9, %p6177_p7 }
  0x4b   : > { %p6180_p12 = pnand %p6179_p10, %p6173_p1 }
  0x4d   : > { %6183 = shalt.err (!%p6180_p12)
}
  0x4e   : > { %s6184_s19 = scalar_lea.vmem %s6837_s0, 16384  ;;  %s6636_s18 = smov [#allocation19]  }
  0x4f   : > { %p6185_p0 = scmp.ne.s32.totalorder %s6837_s0, %s6184_s19  ;;  %s6189_s16 = sshll.u32 %s6636_s18, 4  ;;  %s6190_s16 = int_to_ptr.vmem [resolvable:$false] %s6189_s16 }
  0x50   : > { %s6191_s30 = scalar_lea.vmem %s6190_s16, 32768  ;;  %p6192_p6 = scmp.lt.s32.totalorder %s6837_s0, %s6190_s16 }
  0x51   : > { %p6187_p5 = pnand %p6185_p0, %p6849_p2  ;;  %p6193_p8 = scmp.lt.s32.totalorder %s6191_s30, %s6184_s19 }
  0x53   : > { %p6188_p11 = pneg %p6187_p5  ;;  %p6194_p3 = por %p6193_p8, %p6192_p6 }
  0x55   : > { %p6195_p4 = pnand %p6194_p3, %p6188_p11 }
  0x57   : > { %6198 = shalt.err (!%p6195_p4)
}
  0x58   : > { %s6637_s11 = smov 512   ;;  %s6638_s26 = smov 128  }
  0x59   : > { %s6639_s21 = smov 8   ;;  %s6640_s8 = smov [#allocation8]  }
  0x5a   : > { %5789 = dma.hbm_to_vmem [thread:$0]  (!%p6839_p13), %s6835_s17, 16384, %s6837_s0, %s6843_s25, %s6637_s11, %s6638_s26, %s6639_s21  }
  0x5b   : > { %s448_s18 = sshll.u32 %s6640_s8, 4  ;;  %s6641_s28 = smov [#allocation11]   ;;  %s449_s18 = int_to_ptr.vmem [resolvable:$true] %s448_s18 }
  0x5c   : > { %s470_s16 = sshll.u32 %s6641_s28, 4  ;;  %s7643_s1 = sld [smem:[#allocation42_spill]]  ;;  %s471_s16 = int_to_ptr.vmem [resolvable:$true] %s470_s16 }
  0x5d   : > { %p7644_p8 = scmp.ne.s32.totalorder %s7635_s12, 0 }
  0x62   : > { %s6199_s22 = scalar_lea.hbm %s7643_s1, 128 }
  0x63   : > { %p6200_p6 = scmp.ne.s32.totalorder %s7643_s1, %s6199_s22  ;;  %p6206_p7 = scmp.lt.u32.totalorder %s6199_s22, %s7643_s1 }
  0x65   : > { %p6202_p11 = pnand %p6200_p6, %p7644_p8 }
  0x67   : > { %p6203_p1 = pneg %p6202_p11 }
  0x69   : > { %p6208_p9 = pnand %p6206_p7, %p6203_p1 }
  0x6b   : > { %6211 = shalt.err (!%p6208_p9)
}
  0x6c   : > { %s6212_s8 = scalar_lea.vmem %s449_s18, 128  ;;  %p6220_p5 = scmp.lt.s32.totalorder %s449_s18, %s449_s18 }
  0x6d   : > { %p6213_p10 = scmp.ne.s32.totalorder %s449_s18, %s6212_s8  ;;  %p6221_p3 = scmp.lt.s32.totalorder %s6212_s8, %s6212_s8 }
  0x6f   : > { %p6215_p12 = pnand %p6213_p10, %p7644_p8  ;;  %p6222_p4 = por %p6221_p3, %p6220_p5 }
  0x71   : > { %p6216_p0 = pneg %p6215_p12 }
  0x73   : > { %p6223_p13 = pnand %p6222_p4, %p6216_p0 }
  0x75   : > { %6226 = shalt.err (!%p6223_p13)
}
  0x76   : > { %p7645_p6 = scmp.ne.s32.totalorder %s7632_s29, 0  ;;  %s7646_s7 = sand.u32 1, %s6629_s23  }
  0x77   : > { %s6894_s13 = sshll.u32 %s7646_s7, 1  ;;  %s6227_s17 = scalar_lea.hbm %s7569_s3, 128 }
  0x78   : > { %5761 = dma.hbm_to_vmem [thread:$0]  (!%p7645_p6), %s7643_s1, 128, %s449_s18, [#allocation9]  }
  0x79   : > { %p6228_p13 = scmp.ne.s32.totalorder %s7569_s3, %s6227_s17  ;;  %p6234_p7 = scmp.lt.u32.totalorder %s6227_s17, %s7569_s3 }
  0x7b   : > { %p6230_p11 = pnand %p6228_p13, %p7644_p8 }
  0x7d   : > { %p6231_p1 = pneg %p6230_p11 }
  0x7f   : > { %p6236_p9 = pnand %p6234_p7, %p6231_p1 }
  0x81   : > { %6239 = shalt.err (!%p6236_p9)
}
  0x82   : > { %s6240_s18 = scalar_lea.vmem %s471_s16, 128  ;;  %p6248_p5 = scmp.lt.s32.totalorder %s471_s16, %s471_s16 }
  0x83   : > { %p6241_p10 = scmp.ne.s32.totalorder %s471_s16, %s6240_s18  ;;  %p6249_p3 = scmp.lt.s32.totalorder %s6240_s18, %s6240_s18 }
  0x85   : > { %p6243_p12 = pnand %p6241_p10, %p7644_p8  ;;  %p6250_p4 = por %p6249_p3, %p6248_p5 }
  0x87   : > { %p6244_p0 = pneg %p6243_p12 }
  0x89   : > { %p6251_p2 = pnand %p6250_p4, %p6244_p0 }
  0x8b   : > { %6254 = shalt.err (!%p6251_p2)
}
  0x8c   : > { %5767 = dma.hbm_to_vmem [thread:$0]  (!%p7645_p6), %s7569_s3, 128, %s471_s16, [#allocation12]  }
  0x8d   : > { %s6915_s15 = sshll.u32 %s6633_s24, 5  ;;  %s574_s28 = scalar_lea.vmem [#allocation20], %s6894_s13 }
  0x8e   : > { %s6921_s22 = scalar_lea.hbm %s7575_s9, %s6915_s15  ;;  %s582_s17 = sshll.u32 %s574_s28, 4  ;;  %s583_s17 = int_to_ptr.vmem [resolvable:$true] %s582_s17 }
  0x8f   : > { %s6255_s0 = scalar_lea.hbm %s6921_s22, 32  ;;  %p7647_p13 = scmp.ne.s32.totalorder %s7642_s14, 0 }
  0x90   : > { %p6256_p2 = scmp.ne.s32.totalorder %s6921_s22, %s6255_s0  ;;  %s6260_s26 = scalar_lea.hbm %s7575_s9, 128 }
  0x91   : > { %p6261_p7 = scmp.lt.u32.totalorder %s6921_s22, %s7575_s9  ;;  %p6262_p9 = scmp.lt.u32.totalorder %s6260_s26, %s6255_s0 }
  0x92   : > { %p6258_p11 = pnand %p6256_p2, %p7647_p13  ;;  %p6264_p12 = scmp.lt.u32.totalorder %s6255_s0, %s6921_s22 }
  0x93   : > { %p6263_p10 = por %p6262_p9, %p6261_p7 }
  0x94   : > { %p6259_p1 = pneg %p6258_p11 }
  0x95   : > { %p6265_p0 = por %p6264_p12, %p6263_p10 }
  0x97   : > { %p6266_p5 = pnand %p6265_p0, %p6259_p1 }
  0x99   : > { %6269 = shalt.err (!%p6266_p5)
}
  0x9a   : > { %s6270_s18 = scalar_lea.vmem %s583_s17, 32  ;;  %s6642_s30 = smov [#allocation20]  }
  0x9b   : > { %p6271_p3 = scmp.ne.s32.totalorder %s583_s17, %s6270_s18  ;;  %s6275_s8 = sshll.u32 %s6642_s30, 4  ;;  %s6276_s8 = int_to_ptr.vmem [resolvable:$false] %s6275_s8 }
  0x9c   : > { %s6277_s27 = scalar_lea.vmem %s6276_s8, 64  ;;  %p6278_p11 = scmp.lt.s32.totalorder %s583_s17, %s6276_s8 }
  0x9d   : > { %p6273_p4 = pnand %p6271_p3, %p7647_p13  ;;  %p6279_p6 = scmp.lt.s32.totalorder %s6277_s27, %s6270_s18 }
  0x9f   : > { %p6274_p2 = pneg %p6273_p4  ;;  %p6280_p8 = por %p6279_p6, %p6278_p11 }
  0xa1   : > { %p6281_p7 = pnand %p6280_p8, %p6274_p2 }
  0xa3   : > { %6284 = shalt.err (!%p6281_p7)
}
  0xa4   : > { %p7648_p9 = scmp.ne.s32.totalorder %s7641_s20, 0  ;;  %s6643_s7 = smov [#allocation10]  }
  0xa5   : > { %s459_s28 = sshll.u32 %s6643_s7, 4  ;;  %s6644_s0 = smov [#allocation13]   ;;  %s460_s28 = int_to_ptr.vmem [resolvable:$true] %s459_s28 }
  0xa6   : > { %5792 = dma.hbm_to_vmem [thread:$0]  (!%p7648_p9), %s6921_s22, 32, %s583_s17, %s6843_s25  }
  0xa7   : > { %s480_s24 = sshll.u32 %s6644_s0, 4  ;;  %s6285_s21 = scalar_lea.hbm %s7568_s2, 128  ;;  %s481_s24 = int_to_ptr.vmem [resolvable:$true] %s480_s24 }
  0xa8   : > { %p6286_p8 = scmp.ne.s32.totalorder %s7568_s2, %s6285_s21  ;;  %p7649_p6 = scmp.ne.s32.totalorder %s7635_s12, 0 }
  0xa9   : > { %p6292_p12 = scmp.lt.u32.totalorder %s6285_s21, %s7568_s2 }
  0xaa   : > { %p6288_p1 = pnand %p6286_p8, %p7649_p6 }
  0xac   : > { %p6289_p10 = pneg %p6288_p1 }
  0xae   : > { %p6294_p0 = pnand %p6292_p12, %p6289_p10 }
  0xb0   : > { %6297 = shalt.err (!%p6294_p0)
}
  0xb1   : > { %s6298_s22 = scalar_lea.vmem %s460_s28, 128  ;;  %p6306_p2 = scmp.lt.s32.totalorder %s460_s28, %s460_s28 }
  0xb2   : > { %p6299_p5 = scmp.ne.s32.totalorder %s460_s28, %s6298_s22  ;;  %p6307_p11 = scmp.lt.s32.totalorder %s6298_s22, %s6298_s22 }
  0xb4   : > { %p6301_p3 = pnand %p6299_p5, %p7649_p6  ;;  %p6308_p7 = por %p6307_p11, %p6306_p2 }
  0xb6   : > { %p6302_p4 = pneg %p6301_p3 }
  0xb8   : > { %p6309_p9 = pnand %p6308_p7, %p6302_p4 }
  0xba   : > { %6312 = shalt.err (!%p6309_p9)
}
  0xbb   : > { %p7650_p8 = scmp.ne.s32.totalorder %s7632_s29, 0  ;;  %s6313_s16 = scalar_lea.hbm %s7570_s4, 32768 }
  0xbc   : > { %p6314_p1 = scmp.ne.s32.totalorder %s7570_s4, %s6313_s16  ;;  %p6320_p9 = scmp.lt.u32.totalorder %s6313_s16, %s7570_s4 }
  0xbd   : > { %5764 = dma.hbm_to_vmem [thread:$0]  (!%p7650_p8), %s7568_s2, 128, %s460_s28, [#allocation9]  }
  0xbe   : > { %p6316_p10 = pnand %p6314_p1, %p7649_p6 }
  0xc0   : > { %p6317_p12 = pneg %p6316_p10 }
  0xc2   : > { %p6322_p0 = pnand %p6320_p9, %p6317_p12 }
  0xc4   : > { %6325 = shalt.err (!%p6322_p0)
}
  0xc5   : > { %s6326_s30 = scalar_lea.vmem %s481_s24, 32768  ;;  %p6334_p2 = scmp.lt.s32.totalorder %s481_s24, %s481_s24 }
  0xc6   : > { %p6327_p5 = scmp.ne.s32.totalorder %s481_s24, %s6326_s30  ;;  %p6335_p11 = scmp.lt.s32.totalorder %s6326_s30, %s6326_s30 }
  0xc8   : > { %p6329_p3 = pnand %p6327_p5, %p7649_p6  ;;  %p6336_p7 = por %p6335_p11, %p6334_p2 }
  0xca   : > { %p6330_p4 = pneg %p6329_p3 }
  0xcc   : > { %p6337_p13 = pnand %p6336_p7, %p6330_p4 }
  0xce   : > { %6340 = shalt.err (!%p6337_p13)
}
  0xcf   : > { %s6645_s28 = smov 32   ;;  %s6646_s17 = smov [#allocation14]  }
  0xd0   : > { %5770 = dma.hbm_to_vmem [thread:$0]  (!%p7650_p8), %s7570_s4, 32768, %s481_s24, [#allocation12], %s6637_s11, %s6637_s11, %s6645_s28  }
  0xd1   : > { %s494_s27 = sshll.u32 %s6646_s17, 4  ;;  %s6984_s16 = scalar_lea.hbm %s7576_s10, %s6915_s15  ;;  %s495_s27 = int_to_ptr.vmem [resolvable:$true] %s494_s27 }
  0xd2   : > { %s593_s26 = scalar_lea.vmem [#allocation21], %s6894_s13  ;;  %s6341_s30 = scalar_lea.hbm %s7571_s5, 128 }
  0xd3   : > { %s601_s21 = sshll.u32 %s593_s26, 4  ;;  %p6342_p13 = scmp.ne.s32.totalorder %s7571_s5, %s6341_s30  ;;  %s602_s21 = int_to_ptr.vmem [resolvable:$true] %s601_s21 }
  0xd4   : > { %p6348_p12 = scmp.lt.u32.totalorder %s6341_s30, %s7571_s5 }
  0xd5   : > { %p6344_p1 = pnand %p6342_p13, %p7649_p6 }
  0xd7   : > { %p6345_p10 = pneg %p6344_p1 }
  0xd9   : > { %p6350_p9 = pnand %p6348_p12, %p6345_p10 }
  0xdb   : > { %6353 = shalt.err (!%p6350_p9)
}
  0xdc   : > { %s6354_s28 = scalar_lea.vmem %s495_s27, 128  ;;  %p6362_p4 = scmp.lt.s32.totalorder %s495_s27, %s495_s27 }
  0xdd   : > { %p6355_p0 = scmp.ne.s32.totalorder %s495_s27, %s6354_s28  ;;  %p6363_p2 = scmp.lt.s32.totalorder %s6354_s28, %s6354_s28 }
  0xdf   : > { %p6357_p5 = pnand %p6355_p0, %p7649_p6  ;;  %p6364_p11 = por %p6363_p2, %p6362_p4 }
  0xe1   : > { %p6358_p3 = pneg %p6357_p5 }
  0xe3   : > { %p6365_p7 = pnand %p6364_p11, %p6358_p3 }
  0xe5   : > { %6368 = shalt.err (!%p6365_p7)
}
  0xe6   : > { %5773 = dma.hbm_to_vmem [thread:$0]  (!%p7650_p8), %s7571_s5, 128, %s495_s27, [#allocation15]  }
  0xe7   : > { %s6369_s17 = scalar_lea.hbm %s6984_s16, 32  ;;  %p7651_p1 = scmp.ne.s32.totalorder %s7642_s14, 0 }
  0xe8   : > { %p6370_p13 = scmp.ne.s32.totalorder %s6984_s16, %s6369_s17  ;;  %s6374_s26 = scalar_lea.hbm %s7576_s10, 128 }
  0xe9   : > { %p6375_p9 = scmp.lt.u32.totalorder %s6984_s16, %s7576_s10  ;;  %p6376_p0 = scmp.lt.u32.totalorder %s6374_s26, %s6369_s17 }
  0xea   : > { %p6372_p10 = pnand %p6370_p13, %p7651_p1  ;;  %p6378_p3 = scmp.lt.u32.totalorder %s6369_s17, %s6984_s16 }
  0xeb   : > { %p6377_p5 = por %p6376_p0, %p6375_p9 }
  0xec   : > { %p6373_p12 = pneg %p6372_p10 }
  0xed   : > { %p6379_p4 = por %p6378_p3, %p6377_p5 }
  0xef   : > { %p6380_p2 = pnand %p6379_p4, %p6373_p12 }
  0xf1   : > { %6383 = shalt.err (!%p6380_p2)
}
  0xf2   : > { %s6384_s27 = scalar_lea.vmem %s602_s21, 32  ;;  %s6647_s30 = smov [#allocation21]  }
  0xf3   : > { %p6385_p11 = scmp.ne.s32.totalorder %s602_s21, %s6384_s27  ;;  %s6389_s8 = sshll.u32 %s6647_s30, 4  ;;  %s6390_s8 = int_to_ptr.vmem [resolvable:$false] %s6389_s8 }
  0xf4   : > { %s6391_s11 = scalar_lea.vmem %s6390_s8, 64  ;;  %p6392_p10 = scmp.lt.s32.totalorder %s602_s21, %s6390_s8 }
  0xf5   : > { %p6387_p7 = pnand %p6385_p11, %p7651_p1  ;;  %p6393_p8 = scmp.lt.s32.totalorder %s6391_s11, %s6384_s27 }
  0xf7   : > { %p6388_p13 = pneg %p6387_p7  ;;  %p6394_p6 = por %p6393_p8, %p6392_p10 }
  0xf9   : > { %p6395_p0 = pnand %p6394_p6, %p6388_p13 }
  0xfb   : > { %6398 = shalt.err (!%p6395_p0)
}
  0xfc   : > { %p7652_p9 = scmp.ne.s32.totalorder %s7641_s20, 0  ;;  %s6648_s24 = smov [#allocation16]  }
  0xfd   : > { %s505_s28 = sshll.u32 %s6648_s24, 4  ;;  %s6649_s1 = smov [#allocation17]   ;;  %s506_s28 = int_to_ptr.vmem [resolvable:$true] %s505_s28 }
  0xfe   : > { %5795 = dma.hbm_to_vmem [thread:$0]  (!%p7652_p9), %s6984_s16, 32, %s602_s21, %s6843_s25  }
  0xff   : > { %s516_s22 = sshll.u32 %s6649_s1, 4  ;;  %s6399_s0 = scalar_lea.hbm %s7572_s6, 128  ;;  %s517_s22 = int_to_ptr.vmem [resolvable:$true] %s516_s22 }
 0x100   : > { %p6400_p6 = scmp.ne.s32.totalorder %s7572_s6, %s6399_s0  ;;  %p7653_p8 = scmp.ne.s32.totalorder %s7635_s12, 0 }
 0x101   : > { %p6406_p3 = scmp.lt.u32.totalorder %s6399_s0, %s7572_s6 }
 0x102   : > { %p6402_p12 = pnand %p6400_p6, %p7653_p8 }
 0x104   : > { %p6403_p5 = pneg %p6402_p12 }
 0x106   : > { %p6408_p4 = pnand %p6406_p3, %p6403_p5 }
 0x108   : > { %6411 = shalt.err (!%p6408_p4)
}
 0x109   : > { %s6412_s16 = scalar_lea.vmem %s506_s28, 128  ;;  %p6420_p13 = scmp.lt.s32.totalorder %s506_s28, %s506_s28 }
 0x10a   : > { %p6413_p2 = scmp.ne.s32.totalorder %s506_s28, %s6412_s16  ;;  %p6421_p10 = scmp.lt.s32.totalorder %s6412_s16, %s6412_s16 }
 0x10c   : > { %p6415_p11 = pnand %p6413_p2, %p7653_p8  ;;  %p6422_p0 = por %p6421_p10, %p6420_p13 }
 0x10e   : > { %p6416_p7 = pneg %p6415_p11 }
 0x110   : > { %p6423_p9 = pnand %p6422_p0, %p6416_p7 }
 0x112   : > { %6426 = shalt.err (!%p6423_p9)
}
 0x113   : > { %p7654_p6 = scmp.ne.s32.totalorder %s7632_s29, 0  ;;  %s7655_s24 = sld [smem:[#allocation43_spill]] }
 0x115   : > { %5776 = dma.hbm_to_vmem [thread:$0]  (!%p7654_p6), %s7572_s6, 128, %s506_s28, [#allocation15]  }
 0x119   : > { %s7656_s1 = smov %s7655_s24  ;;  %s6427_s17 = scalar_lea.hbm %s7655_s24, 128 }
 0x11a   : > { %p6428_p12 = scmp.ne.s32.totalorder %s7656_s1, %s6427_s17  ;;  %p6434_p9 = scmp.lt.u32.totalorder %s6427_s17, %s7656_s1 }
 0x11c   : > { %p6430_p5 = pnand %p6428_p12, %p7653_p8 }
 0x11e   : > { %p6431_p3 = pneg %p6430_p5 }
 0x120   : > { %p6436_p4 = pnand %p6434_p9, %p6431_p3 }
 0x122   : > { %6439 = shalt.err (!%p6436_p4)
}
 0x123   : > { %s6440_s18 = scalar_lea.vmem %s517_s22, 128  ;;  %p6448_p13 = scmp.lt.s32.totalorder %s517_s22, %s517_s22 }
 0x124   : > { %p6441_p2 = scmp.ne.s32.totalorder %s517_s22, %s6440_s18  ;;  %p6449_p10 = scmp.lt.s32.totalorder %s6440_s18, %s6440_s18 }
 0x126   : > { %p6443_p11 = pnand %p6441_p2, %p7653_p8  ;;  %p6450_p0 = por %p6449_p10, %p6448_p13 }
 0x128   : > { %p6444_p7 = pneg %p6443_p11 }
 0x12a   : > { %p6451_p1 = pnand %p6450_p0, %p6444_p7 }
 0x12c   : > { %6454 = shalt.err (!%p6451_p1)
}
 0x12d   : > { %5779 = dma.hbm_to_vmem [thread:$0]  (!%p7654_p6), %s7656_s1, 128, %s517_s22, [#allocation18]  }
 0x12e   : > { %s6650_s16 = smov [#allocation23]   ;;  %s6651_s30 = smov [#allocation24]  }
 0x12f   : > { %s527_s21 = sshll.u32 %s6650_s16, 4  ;;  %s538_s8 = sshll.u32 %s6651_s30, 4  ;;  %s528_s21 = int_to_ptr.vmem [resolvable:$true] %s527_s21  ;;  %s539_s8 = int_to_ptr.vmem [resolvable:$true] %s538_s8 }
 0x130   : > { %s7657_s17 = sld [smem:[#allocation47_spill]] }
 0x136   : > { %s6455_s7 = scalar_lea.hbm %s7657_s17, 16 }
 0x137   : > { %p6456_p1 = scmp.ne.s32.totalorder %s7657_s17, %s6455_s7  ;;  %p6462_p3 = scmp.lt.u32.totalorder %s6455_s7, %s7657_s17 }
 0x139   : > { %p6458_p12 = pnand %p6456_p1, %p7653_p8 }
 0x13b   : > { %p6459_p5 = pneg %p6458_p12 }
 0x13d   : > { %p6464_p9 = pnand %p6462_p3, %p6459_p5 }
 0x13f   : > { %6467 = shalt.err (!%p6464_p9)
}
 0x140   : > { %s6468_s22 = scalar_lea.vmem %s528_s21, 16  ;;  %s6475_s28 = scalar_lea.vmem %s528_s21, 32 }
 0x141   : > { %p6469_p4 = scmp.ne.s32.totalorder %s528_s21, %s6468_s22  ;;  %p6476_p7 = scmp.lt.s32.totalorder %s528_s21, %s528_s21 }
 0x142   : > { %p6477_p13 = scmp.lt.s32.totalorder %s6475_s28, %s6468_s22 }
 0x143   : > { %p6471_p2 = pnand %p6469_p4, %p7653_p8 }
 0x144   : > { %p6478_p10 = por %p6477_p13, %p6476_p7 }
 0x145   : > { %p6472_p11 = pneg %p6471_p2 }
 0x147   : > { %p6479_p0 = pnand %p6478_p10, %p6472_p11 }
 0x149   : > { %6482 = shalt.err (!%p6479_p0)
}
 0x14a   : > { %5782 = dma.hbm_to_vmem [thread:$0]  (!%p7654_p6), %s7657_s17, 16, %s528_s21, [#allocation9]  }
 0x14b   : > { %s7658_s24 = sld [smem:[#allocation49_spill]] }
 0x151   : > { %s7659_s7 = smov %s7658_s24  ;;  %s6483_s0 = scalar_lea.hbm %s7658_s24, 16 }
 0x152   : > { %p6484_p1 = scmp.ne.s32.totalorder %s7659_s7, %s6483_s0  ;;  %p6490_p3 = scmp.lt.u32.totalorder %s6483_s0, %s7659_s7 }
 0x154   : > { %p6486_p12 = pnand %p6484_p1, %p7653_p8 }
 0x156   : > { %p6487_p5 = pneg %p6486_p12 }
 0x158   : > { %p6492_p9 = pnand %p6490_p3, %p6487_p5 }
 0x15a   : > { %6495 = shalt.err (!%p6492_p9)
}
 0x15b   : > { %s6496_s28 = scalar_lea.vmem %s539_s8, 16  ;;  %s6503_s21 = scalar_lea.vmem %s539_s8, 32 }
 0x15c   : > { %p6497_p4 = scmp.ne.s32.totalorder %s539_s8, %s6496_s28  ;;  %p6504_p7 = scmp.lt.s32.totalorder %s539_s8, %s539_s8 }
 0x15d   : > { %p6505_p13 = scmp.lt.s32.totalorder %s6503_s21, %s6496_s28 }
 0x15e   : > { %p6499_p2 = pnand %p6497_p4, %p7653_p8 }
 0x15f   : > { %p6506_p10 = por %p6505_p13, %p6504_p7 }
 0x160   : > { %p6500_p11 = pneg %p6499_p2 }
 0x162   : > { %p6507_p0 = pnand %p6506_p10, %p6500_p11 }
 0x164   : > { %6510 = shalt.err (!%p6507_p0)
}
 0x165   : > { %5785 = dma.hbm_to_vmem [thread:$0]  (!%p7654_p6), %s7659_s7, 16, %s539_s8, [#allocation12]  }
 0x166   : > { %s7660_s12 = sld [smem:[#allocation45_spill]]  ;;  %s612_s0 = scalar_lea.vmem [#allocation22], %s6894_s13 }
 0x167   : > { %s620_s26 = sshll.u32 %s612_s0, 4  ;;  %p7661_p1 = scmp.ne.s32.totalorder %s7642_s14, 0  ;;  %s621_s26 = int_to_ptr.vmem [resolvable:$true] %s620_s26 }
 0x16c   : > { %s7099_s24 = scalar_lea.hbm %s7660_s12, %s6915_s15  ;;  %s6516_s8 = scalar_lea.hbm %s7660_s12, 128 }
 0x16d   : > { %s6511_s29 = scalar_lea.hbm %s7099_s24, 32  ;;  %p6517_p6 = scmp.lt.u32.totalorder %s7099_s24, %s7660_s12 }
 0x16e   : > { %p6512_p8 = scmp.ne.s32.totalorder %s7099_s24, %s6511_s29  ;;  %p6518_p3 = scmp.lt.u32.totalorder %s6516_s8, %s6511_s29 }
 0x16f   : > { %p6520_p4 = scmp.lt.u32.totalorder %s6511_s29, %s7099_s24 }
 0x170   : > { %p6514_p12 = pnand %p6512_p8, %p7661_p1  ;;  %p6519_p9 = por %p6518_p3, %p6517_p6 }
 0x172   : > { %p6515_p5 = pneg %p6514_p12  ;;  %p6521_p2 = por %p6520_p4, %p6519_p9 }
 0x174   : > { %p6522_p11 = pnand %p6521_p2, %p6515_p5 }
 0x176   : > { %6525 = shalt.err (!%p6522_p11)
}
 0x177   : > { %s6526_s13 = scalar_lea.vmem %s621_s26, 32  ;;  %s6652_s15 = smov [#allocation22]  }
 0x178   : > { %p6527_p7 = scmp.ne.s32.totalorder %s621_s26, %s6526_s13  ;;  %s6531_s21 = sshll.u32 %s6652_s15, 4  ;;  %s6532_s21 = int_to_ptr.vmem [resolvable:$false] %s6531_s21 }
 0x179   : > { %s6533_s27 = scalar_lea.vmem %s6532_s21, 64  ;;  %p6534_p0 = scmp.lt.s32.totalorder %s621_s26, %s6532_s21 }
 0x17a   : > { %p6529_p13 = pnand %p6527_p7, %p7661_p1  ;;  %p6535_p8 = scmp.lt.s32.totalorder %s6533_s27, %s6526_s13 }
 0x17c   : > { %p6530_p10 = pneg %p6529_p13  ;;  %p6536_p12 = por %p6535_p8, %p6534_p0 }
 0x17e   : > { %p6537_p3 = pnand %p6536_p12, %p6530_p10 }
 0x180   : > { %6540 = shalt.err (!%p6537_p3)
}
 0x181   : > { %p7662_p6 = scmp.ne.s32.totalorder %s7641_s20, 0  ;;  %s7663_s16 = sld [smem:[#allocation37_spill]] }
 0x183   : > { %5798 = dma.hbm_to_vmem [thread:$0]  (!%p7662_p6), %s7099_s24, 32, %s621_s26, %s6843_s25  }
 0x187   : > { %p7664_p5 = scmp.ne.s32.totalorder %s7663_s16, 0 }
 0x188   : > { %s7665_s14 = sld [smem:[#allocation36_spill]] (!%p7664_p5) }
 0x189   : > { %647 = sbr.rel (%p7664_p5) target bundleno = 2221 (0x8ad), region = 84 }
 0x18e   : > { %p7666_p1 = scmp.eq.s32.totalorder (!%p7664_p5), %s7665_s14, 0 }
 0x190   : > { %6584 = dma.done.wait (%p7666_p1), [#allocation6], 128   ;;  %p7667_p9 = pmov %p7666_p1 }
 0x191   : > { %p7668_p4 = pmov %p7666_p1 }
 0x192   : > { %6586 = vsyncadd (%p7667_p9), [#allocation6], 4294967168 }
 0x193   : > { %6588 = dma.done.wait (%p7668_p4), [#allocation9], 256   ;;  %p7669_p2 = pmov %p7666_p1 }
 0x194   : > { %p7670_p11 = pmov %p7666_p1 }
 0x195   : > { %6590 = vsyncadd (%p7669_p2), [#allocation9], 4294967040 }
 0x196   : > { %6592 = dma.done.wait (%p7670_p11), [#allocation12], 32896   ;;  %p7671_p7 = pmov %p7666_p1 }
 0x197   : > { %p7672_p13 = pmov %p7666_p1 }
 0x198   : > { %6594 = vsyncadd (%p7671_p7), [#allocation12], 4294934400 }
 0x199   : > { %6596 = dma.done.wait (%p7672_p13), [#allocation15], 256   ;;  %p7673_p10 = pmov %p7666_p1 }
 0x19a   : > { %p7674_p0 = pmov %p7666_p1 }
 0x19b   : > { %6598 = vsyncadd (%p7673_p10), [#allocation15], 4294967040 }
 0x19c   : > { %6600 = dma.done.wait (%p7674_p0), [#allocation18], 128   ;;  %p7675_p8 = pmov %p7674_p0 }
 0x19d   : > { %s7676_s20 = sld [smem:[#allocation35_spill]]  ;;  %s7677_s25 = sld [smem:[#allocation40_spill]] }
 0x19e   : > { %6602 = vsyncadd (%p7675_p8), [#allocation18], 4294967168  ;;  %s681_s30 = sand.u32 1, %s7665_s14  }
 0x19f   : > { %s682_s0 = scalar_lea.sflag [#allocation6], %s681_s30 }
 0x1a3   : > { %s683_s11 = sand.u32 1, %s7676_s20   ;;  %p7678_p12 = scmp.ne.s32.totalorder %s7677_s25, 0 }
 0x1a4   : > { %s5159_s24 = sshll.u32 %s683_s11, 10 }
 0x1a5   : > { %s7144_s26 = scalar_lea.vmem [#allocation19], %s5159_s24 }
 0x1a6   : > { %6604 = dma.done.wait (%p7678_p12), %s682_s0, 16480  }
 0x1a7   : > { %6606 = vsyncadd (%p7678_p12), %s682_s0, 4294950816  ;;  %s7150_s29 = sshll.u32 %s683_s11, 1  ;;  %p7679_p3 = pmov %p7674_p0 }
 0x1a8   : > { %s694_s19 = scalar_lea.vmem [#allocation20], %s7150_s29  ;;  %s703_s18 = scalar_lea.vmem [#allocation21], %s7150_s29 }
 0x1a9   : > { %s712_s8 = scalar_lea.vmem [#allocation22], %s7150_s29 }
 0x1aa   : > { %6608 = dma.done.wait (%p7679_p3), [#allocation9], 16   ;;  %p7680_p6 = pmov %p7674_p0 }
 0x1ab   : > { %p7681_p5 = pmov %p7674_p0 }
 0x1ac   : > { %6610 = vsyncadd (%p7680_p6), [#allocation9], 4294967280 }
 0x1ad   : > { %6612 = dma.done.wait (%p7681_p5), [#allocation12], 16   ;;  %p7682_p1 = pmov %p7674_p0 }
 0x1ae   : > { %s5165_s22 = sshll.u32 %s7665_s14, 5  ;;  %s7683_s21 = sld [smem:[#allocation46_spill]] }
 0x1af   : > { %6614 = vsyncadd (%p7682_p1), [#allocation12], 4294967280  ;;  %p794_p9 = scmp.lt.s32.totalorder %s5165_s22, 127  ;;  %s7684_s25 = sld [smem:[#allocation48_spill]] }
 0x1b0   : > { %p7685_p4 = scmp.ne.s32.totalorder %s7665_s14, 0 }
 0x1b1   : > { %s7702_s22 = smov (!%p794_p9, %s5165_s22), 127  ;;  %vm7617_vm0 = vcmask (!%p7685_p4), 64512   ;;  %v7176_v0 = vld [vmem:[#allocation11] sm:$0xff] (!%p7685_p4)  ;;  %v7178_v1 = vld [vmem:[#allocation8] sm:$0xff] (!%p7685_p4)  ;;  %v835_v4 = vlaneseq (!%p7685_p4)  ;;  %v7686_v12 = vmov (!%p7685_p4), 0  ;;  %v1051_v31 = vld [vmem:[#allocation10] sm:$0xff] (!%p7685_p4) }
 0x1b2   : > { %s5166_s28 = sshll.u32 %s7702_s22, 2  ;;  %809 = sbr.rel (%p7685_p4) target bundleno = 1433 (0x599), region = 144  ;;  %v824_v2 = vsel (!%p7685_p4), %vm7617_vm0, %v7176_v0, -inf  ;;  %v812_v3 = vsel (!%p7685_p4), %vm7617_vm0, %v7178_v1, -inf  ;;  %v6653_v17 = vmov (!%p7685_p4), 1.0|1.0   ;;  %v1052_v32 = vpack.c.bf16 (!%p7685_p4), %v1051_v31, %v1051_v31 }
 0x1b3   : > { %825 = vmax.xlane.f32.xlu0 (!%p7685_p4), %v824_v2  ;;  %813 = vmax.xlane.f32.xlu1 (!%p7685_p4), %v812_v3  ;;  %v7184_v5 = vshrl.u32 (!%p7685_p4), %v835_v4, 7  ;;  %v7186_v6 = vand.u32 (!%p7685_p4), 127, %v835_v4  ;;  %v6654_v33 = vmov (!%p7685_p4), 0   ;;  %v1004_v34 = vld [vmem:[#allocation5] sm:$0xff] (!%p7685_p4)  ;;  %v6655_v41 = vmov (!%p7685_p4), 1.0   ;;  %v1382_v45 = vld [vmem:[#allocation13 + $0x408] sm:$0xff] (!%p7685_p4) }
 0x1b4   : > { %s7167_s27 = scalar_lea.vmem %s7683_s21, %s5166_s28  ;;  %1088 = vmatprep.mubr.bf16.mxu1 (!%p7685_p4), %v6654_v33  ;;  %1042 = vmatprep.mubr.bf16.mxu0 (!%p7685_p4), %v6654_v33  ;;  %v1005_v35 = vpack.c.bf16 (!%p7685_p4), %v1004_v34, %v1004_v34  ;;  %v5464_v39 = vld [vmem:[#allocation23] ss:$0 sm:$0xff] (!%p7685_p4)  ;;  %v5465_v40 = vld [vmem:[#allocation24] ss:$0 sm:$0xff] (!%p7685_p4)  ;;  %v6656_v42 = vmov (!%p7685_p4), 0.0   ;;  %v1386_v48 = vld [vmem:[#allocation13 + $0x428] sm:$0xff] (!%p7685_p4) }
 0x1b5   : > { %s7172_s30 = scalar_lea.vmem %s7684_s25, %s5166_s28  ;;  %v837_v7 = vadd.s32 (!%p7685_p4), 8, %v7184_v5  ;;  %v7190_v8 = vadd.s32 (!%p7685_p4), 128, %v7186_v6  ;;  %v843_v9 = vsub.s32 (!%p7685_p4), %v7186_v6, %v7184_v5  ;;  %v838_v14 = vadd.s32 (!%p7685_p4), 16, %v7184_v5  ;;  %v1381_v43 = vld [vmem:[#allocation13 + $0x400] sm:$0xff] (!%p7685_p4)  ;;  %v1390_v53 = vld [vmem:[#allocation13 + $0x448] sm:$0xff] (!%p7685_p4) }
 0x1b6   : > { %v839_v15 = vadd.s32 (!%p7685_p4), 24, %v7184_v5  ;;  %v994_v36 = vadd.s32 (!%p7685_p4), 1, %v7184_v5  ;;  %v991_v37 = vmul.u32 (!%p7685_p4), 32, %v7184_v5  ;;  %v1385_v44 = vld [vmem:[#allocation13 + $0x420] sm:$0xff] (!%p7685_p4)  ;;  %v5206_v49 = vcombine.low (!%p7685_p4), %v1382_v45, %v1386_v48  ;;  %v1394_v54 = vld [vmem:[#allocation13 + $0x468] sm:$0xff] (!%p7685_p4) }
 0x1b7   : > { %v844_v10 = vsub.s32 (!%p7685_p4), %v7190_v8, %v7184_v5  ;;  %v846_v11 = vsub.s32 (!%p7685_p4), %v7190_v8, %v837_v7  ;;  %vm851_vm1 = vcmp.eq.s32.totalorder (!%p7685_p4), %v843_v9, 0  ;;  %vm859_vm2 = vcmp.eq.s32.totalorder (!%p7685_p4), %v843_v9, 32  ;;  %v1389_v55 = vld [vmem:[#allocation13 + $0x440] sm:$0xff] (!%p7685_p4)  ;;  %v1398_v63 = vld [vmem:[#allocation13 + $0x488] sm:$0xff] (!%p7685_p4) }
 0x1b8   : > { %vm7197_vm7 = vmor (!%p7685_p4), %vm851_vm1, %vm859_vm2  ;;  %v845_v13 = vsub.s32 (!%p7685_p4), %v7186_v6, %v837_v7  ;;  %v848_v16 = vsub.s32 (!%p7685_p4), %v7190_v8, %v838_v14  ;;  %v850_v18 = vsub.s32 (!%p7685_p4), %v7190_v8, %v839_v15  ;;  %v847_v19 = vsub.s32 (!%p7685_p4), %v7186_v6, %v838_v14  ;;  %v1393_v56 = vld [vmem:[#allocation13 + $0x460] sm:$0xff] (!%p7685_p4)  ;;  %v1434_v33 = vld [vmem:[#allocation13 + $0x5a8] sm:$0xff] (!%p7685_p4) }
 0x1b9   : > { %vm908_vm3 = vcmp.eq.s32.totalorder %v844_v10, 128  ;;  %vm910_vm4 = vcmp.eq.s32.totalorder %v846_v11, 128  ;;  %vm924_vm5 = vcmp.eq.s32.totalorder %v844_v10, 160  ;;  %vm926_vm6 = vcmp.eq.s32.totalorder %v846_v11, 160  ;;  %v1401_v2 = vld [vmem:[#allocation13 + $0x4a0] sm:$0xff] }
 0x1ba   : > { %v7687_v12 = vsel %vm7197_vm7, 4294967295, %v7686_v12  ;;  %vm932_vm8 = vmor %vm908_vm3, %vm924_vm5  ;;  %vm940_vm9 = vcmp.eq.s32.totalorder %v844_v10, 192  ;;  %vm942_vm10 = vcmp.eq.s32.totalorder %v846_v11, 192  ;;  %vm956_vm12 = vcmp.eq.s32.totalorder %v844_v10, 224  ;;  %v1405_v10 = vld [vmem:[#allocation13 + $0x4c0] sm:$0xff] }
 0x1bb   : > { %vm934_vm11 = vmor %vm910_vm4, %vm926_vm6  ;;  %vm958_vm14 = vcmp.eq.s32.totalorder %v846_v11, 224  ;;  %vm853_vm1 = vcmp.eq.s32.totalorder %v845_v13, 0  ;;  %vm861_vm2 = vcmp.eq.s32.totalorder %v845_v13, 32  ;;  %vm875_vm3 = vcmp.eq.s32.totalorder %v843_v9, 64  ;;  %v1409_v11 = vld [vmem:[#allocation13 + $0x4e0] sm:$0xff] }
 0x1bc   : > { %vm948_vm13 = vmor %vm932_vm8, %vm940_vm9  ;;  %vm877_vm4 = vcmp.eq.s32.totalorder %v845_v13, 64  ;;  %vm891_vm8 = vcmp.eq.s32.totalorder %v843_v9, 96  ;;  %vm7688_vm9 = vnez %v7687_v12  ;;  %v849_v20 = vsub.s32 %v7186_v6, %v839_v15  ;;  %v1410_v9 = vld [vmem:[#allocation13 + $0x4e8] sm:$0xff]  ;;  %v1429_v34 = vld [vmem:[#allocation13 + $0x580] sm:$0xff] }
 0x1bd   : > { %vm950_vm15 = vmor %vm934_vm11, %vm942_vm10  ;;  %vm893_vm11 = vcmp.eq.s32.totalorder %v845_v13, 96  ;;  %v995_v38 = vmul.u32 32, %v994_v36  ;;  %v5204_v46 = vcombine.low %v1381_v43, %v1385_v44  ;;  %v5205_v47 = vcombine.high %v1381_v43, %v1385_v44  ;;  %v1441_v43 = vld [vmem:[#allocation13 + $0x5e0] sm:$0xff] }
 0x1be   : > { %vm964_vm0 = vmor %vm948_vm13, %vm956_vm12  ;;  %v5207_v50 = vcombine.high %v1382_v45, %v1386_v48  ;;  %v5215_v60 = vcombine.high %v1390_v53, %v1394_v54  ;;  %v5213_v62 = vcombine.high %v1389_v55, %v1393_v56  ;;  %v5214_v3 = vcombine.low %v1390_v53, %v1394_v54  ;;  %v1446_v48 = vld [vmem:[#allocation13 + $0x608] sm:$0xff] }
 0x1bf   : > { %vm966_vm7 = vmor %vm950_vm15, %vm958_vm14  ;;  %vm912_vm14 = vcmp.eq.s32.totalorder %v848_v16, 128  ;;  %vm928_vm15 = vcmp.eq.s32.totalorder %v848_v16, 160  ;;  %v5212_v4 = vcombine.low %v1389_v55, %v1393_v56  ;;  %v5229_v15 = vcombine.high %v1405_v10, %v1409_v11  ;;  %v1454_v56 = vld [vmem:[#allocation13 + $0x648] sm:$0xff] }
 0x1c0   : > { %vm5180_vm5 = vmpackc.low %vm966_vm7, %vm964_vm0  ;;  %vm914_vm7 = vcmp.eq.s32.totalorder %v850_v18, 128 }
 0x1c1   : > { %5190 = vmatprep.subr.msk.bf16.mxu1 %vm5180_vm5, %v6653_v17  ;;  %vm869_vm6 = vmor %vm853_vm1, %vm861_vm2  ;;  %5181 = vmatprep.subr.msk.bf16.mxu0 %vm5180_vm5, %v6653_v17  ;;  %vm930_vm1 = vcmp.eq.s32.totalorder %v850_v18, 160  ;;  %vm944_vm5 = vcmp.eq.s32.totalorder %v848_v16, 192 }
 0x1c2   : > { %vm883_vm10 = vmor %vm7688_vm9, %vm875_vm3  ;;  %vm946_vm9 = vcmp.eq.s32.totalorder %v850_v18, 192 }
 0x1c3   : > { %vm885_vm12 = vmor %vm869_vm6, %vm877_vm4  ;;  %vm960_vm6 = vcmp.eq.s32.totalorder %v848_v16, 224  ;;  %v1414_v16 = vld [vmem:[#allocation13 + $0x508] sm:$0xff] }
 0x1c4   : > { %vm899_vm13 = vmor %vm883_vm10, %vm891_vm8  ;;  %vm962_vm10 = vcmp.eq.s32.totalorder %v850_v18, 224  ;;  %v1413_v18 = vld [vmem:[#allocation13 + $0x500] sm:$0xff] }
 0x1c5   : > { %vm901_vm0 = vmor %vm885_vm12, %vm893_vm11 }
 0x1c6   : > { %vm5182_vm2 = vmpackc.low %vm901_vm0, %vm899_vm13  ;;  %vm855_vm0 = vcmp.eq.s32.totalorder %v847_v19, 0  ;;  %vm863_vm13 = vcmp.eq.s32.totalorder %v847_v19, 32 }
 0x1c7   : > { %5192 = vmatpush1.bf16.msk.msra.mxu1 %vm5182_vm2, %v6653_v17  ;;  %5183 = vmatpush1.bf16.msk.msra.mxu0 %vm5182_vm2, %v6653_v17  ;;  %vm936_vm3 = vmor %vm912_vm14, %vm928_vm15  ;;  %vm857_vm14 = vcmp.eq.s32.totalorder %v849_v20, 0  ;;  %vm865_vm15 = vcmp.eq.s32.totalorder %v849_v20, 32 }
 0x1c8   : > { %vm938_vm4 = vmor %vm914_vm7, %vm930_vm1  ;;  %vm879_vm7 = vcmp.eq.s32.totalorder %v847_v19, 64 }
 0x1c9   : > { %vm952_vm8 = vmor %vm936_vm3, %vm944_vm5  ;;  %vm881_vm5 = vcmp.eq.s32.totalorder %v849_v20, 64 }
 0x1ca   : > { %vm954_vm11 = vmor %vm938_vm4, %vm946_vm9  ;;  %vm895_vm9 = vcmp.eq.s32.totalorder %v847_v19, 96  ;;  %v1417_v19 = vld [vmem:[#allocation13 + $0x520] sm:$0xff] }
 0x1cb   : > { %vm968_vm12 = vmor %vm952_vm8, %vm960_vm6  ;;  %vm897_vm8 = vcmp.eq.s32.totalorder %v849_v20, 96 }
 0x1cc   : > { %vm970_vm2 = vmor %vm954_vm11, %vm962_vm10 }
 0x1cd   : > { %vm5184_vm1 = vmpackc.low %vm970_vm2, %vm968_vm12 }
 0x1ce   : > { %5194 = vmatprep.subr.msk.bf16.mxu1 %vm5184_vm1, %v6653_v17  ;;  %vm871_vm3 = vmor %vm855_vm0, %vm863_vm13  ;;  %5185 = vmatprep.subr.msk.bf16.mxu0 %vm5184_vm1, %v6653_v17  ;;  %vm7689_vm0 = vcmask 64512   ;;  %vm997_vm1 = vcmp.lt.s32.totalorder %v7190_v8, %v995_v38 }
 0x1cf   : > { %vm873_vm4 = vmor %vm857_vm14, %vm865_vm15  ;;  %vm1006_vm14 = vcmask 261120   ;;  %vm993_vm15 = vcmp.ge.s32.totalorder %v7190_v8, %v991_v37  ;;  %v1406_v8 = vld [vmem:[#allocation13 + $0x4c8] sm:$0xff] }
 0x1d0   : > { %vm887_vm6 = vmor %vm871_vm3, %vm879_vm7  ;;  %vm992_vm3 = vcmp.ge.s32.totalorder %v7186_v6, %v991_v37  ;;  %3471 = vst.msk [vmem:[#allocation3] sm:$0xff] %vm1006_vm14, %v5464_v39  ;;  %v5231_v14 = vcombine.high %v1406_v8, %v1410_v9  ;;  %v5230_v20 = vcombine.low %v1406_v8, %v1410_v9  ;;  %v1470_v9 = vld [vmem:[#allocation13 + $0x6c8] sm:$0xff] }
 0x1d1   : > { %vm889_vm10 = vmor %vm873_vm4, %vm881_vm5  ;;  %vm996_vm5 = vcmp.lt.s32.totalorder %v7186_v6, %v995_v38  ;;  %3479 = vst.msk [vmem:[#allocation4] sm:$0xff] %vm1006_vm14, %v5465_v40  ;;  %v1438_v40 = vld [vmem:[#allocation13 + $0x5c8] sm:$0xff] }
 0x1d2   : > { %vm903_vm11 = vmor %vm887_vm6, %vm895_vm9 }
 0x1d3   : > { %vm905_vm2 = vmor %vm889_vm10, %vm897_vm8 }
 0x1d4   : > { %vm5186_vm12 = vmpackc.low %vm905_vm2, %vm903_vm11 }
 0x1d5   : > { %5196 = vmatpush1.bf16.msk.msra.mxu1 %vm5186_vm12, %v6653_v17  ;;  %5187 = vmatpush1.bf16.msk.msra.mxu0 %vm5186_vm12, %v6653_v17  ;;  %vm7690_vm13 = vmmov %vm7689_vm0  ;;  %v1418_v17 = vld [vmem:[#allocation13 + $0x528] sm:$0xff] }
 0x1d6   : > { %vm999_vm7 = vmand %vm993_vm15, %vm997_vm1 }
 0x1d7   : > { %5201 = vmatprep.subr.msk.mxu1 %vm999_vm7, %v6655_v41  ;;  %vm998_vm4 = vmand %vm992_vm3, %vm996_vm5  ;;  %5198 = vmatprep.subr.msk.mxu0 %vm999_vm7, %v6655_v41 }
 0x1d8   : > { %5197 = vmatmul.mubr.msk.bf16.vlgmr.msra.gmra.mrb[0].mxu1 %vm1006_vm14, %v1052_v32  ;;  %5188 = vmatmul.mubr.msk.bf16.vlgmr.msra.gmra.mrb[0].mxu0 %vm1006_vm14, %v1005_v35  ;;  %vm7691_vm9 = vmmov %vm7689_vm0  ;;  %v1430_v32 = vld [vmem:[#allocation13 + $0x588] sm:$0xff]  ;;  %v1433_v35 = vld [vmem:[#allocation13 + $0x5a0] sm:$0xff] }
 0x1d9   : > { %5202 = vmatpush1.msk.msra.mxu1 %vm998_vm4, %v6655_v41  ;;  %5199 = vmatpush1.msk.msra.mxu0 %vm998_vm4, %v6655_v41  ;;  %vm7692_vm6 = vmmov %vm7689_vm0  ;;  %v5255_v38 = vcombine.high %v1430_v32, %v1434_v33  ;;  %v5253_v39 = vcombine.high %v1429_v34, %v1433_v35  ;;  %v1442_v41 = vld [vmem:[#allocation13 + $0x5e8] sm:$0xff]  ;;  %v5254_v44 = vcombine.low %v1430_v32, %v1434_v33 }
 0x1da   : > { %1164 = vmatprep.mubr.f32.mxu0 %v6656_v42  ;;  %1238 = vmatprep.mubr.f32.mxu1 %v6656_v42  ;;  %v1437_v42 = vld [vmem:[#allocation13 + $0x5c0] sm:$0xff]  ;;  %v5252_v45 = vcombine.low %v1429_v34, %v1433_v35  ;;  %v1494_v33 = vld [vmem:[#allocation13 + $0x788] sm:$0xff] }
 0x1db   : > { %2149 = vmatprep.subr.bf16.mxu0 %v5205_v47  ;;  %2190 = vmatprep.subr.bf16.mxu1 %v5207_v50  ;;  %v5261_v47 = vcombine.high %v1437_v42, %v1441_v43  ;;  %v1445_v50 = vld [vmem:[#allocation13 + $0x600] sm:$0xff]  ;;  %v5260_v53 = vcombine.low %v1437_v42, %v1441_v43  ;;  %v1498_v34 = vld [vmem:[#allocation13 + $0x7a8] sm:$0xff] }
 0x1dc   : > { %v1493_v35 = vld [vmem:[#allocation13 + $0x780] sm:$0xff] }
 0x240   : > { %v826_v21 = vpop.xlane.xlu0 %825  ;;  %v814_v22 = vpop.xlane.xlu1 %813 }
 0x241   : > { %v827_v23 = vsub.f32 %v7176_v0, %v826_v21  ;;  %v815_v24 = vsub.f32 %v7178_v1, %v814_v22  ;;  %v1402_v0 = vld [vmem:[#allocation13 + $0x4a8] sm:$0xff]  ;;  %v1397_v1 = vld [vmem:[#allocation13 + $0x480] sm:$0xff]  ;;  %v5228_v21 = vcombine.low %v1405_v10, %v1409_v11  ;;  %v5239_v22 = vcombine.high %v1414_v16, %v1418_v17 }
 0x242   : > { %v5223_v6 = vcombine.high %v1398_v63, %v1402_v0  ;;  %v5221_v7 = vcombine.high %v1397_v1, %v1401_v2  ;;  %v5222_v12 = vcombine.low %v1398_v63, %v1402_v0  ;;  %v5220_v13 = vcombine.low %v1397_v1, %v1401_v2  ;;  %v1462_v0 = vld [vmem:[#allocation13 + $0x688] sm:$0xff]  ;;  %v1461_v2 = vld [vmem:[#allocation13 + $0x680] sm:$0xff] }
 0x243   : > { %v828_v25 = vmul.f32 1.442695, %v827_v23  ;;  %v816_v26 = vmul.f32 1.442695, %v815_v24  ;;  %v5237_v23 = vcombine.high %v1413_v18, %v1417_v19  ;;  %v1422_v24 = vld [vmem:[#allocation13 + $0x548] sm:$0xff]  ;;  %v1469_v11 = vld [vmem:[#allocation13 + $0x6c0] sm:$0xff] }
 0x244   : > { %v1466_v1 = vld [vmem:[#allocation13 + $0x6a8] sm:$0xff] }
 0x245   : > { %5873 = vpow2.f32 %v828_v25  ;;  %v1426_v25 = vld [vmem:[#allocation13 + $0x568] sm:$0xff] }
 0x246   : > { %5875 = vpow2.f32 %v816_v26  ;;  %v1421_v26 = vld [vmem:[#allocation13 + $0x540] sm:$0xff]  ;;  %v5246_v36 = vcombine.low %v1422_v24, %v1426_v25  ;;  %v1474_v10 = vld [vmem:[#allocation13 + $0x6e8] sm:$0xff] }
 0x24f   : > { %v5874_v27 = vpop.eup %5873 }
 0x250   : > { %v5876_v28 = vpop.eup %5875  ;;  %v830_v29 = vsel %vm7689_vm0, %v5874_v27, 0.0 }
 0x251   : > { %831 = vadd.xlane.f32.xlu0 %v830_v29  ;;  %v818_v30 = vsel %vm7690_vm13, %v5876_v28, 0.0  ;;  %v5236_v29 = vcombine.low %v1413_v18, %v1417_v19  ;;  %v1482_v18 = vld [vmem:[#allocation13 + $0x728] sm:$0xff]  ;;  %v1477_v19 = vld [vmem:[#allocation13 + $0x700] sm:$0xff] }
 0x252   : > { %819 = vadd.xlane.f32.xlu1 %v818_v30  ;;  %v5247_v30 = vcombine.high %v1422_v24, %v1426_v25  ;;  %v1486_v25 = vld [vmem:[#allocation13 + $0x748] sm:$0xff] }
 0x2ab   : > { %v1090_v43 = vpop.f32.mrb[0].mxu1 }
 0x2de   : > { %v832_v51 = vpop.xlane.xlu0 %831 }
 0x2df   : > { %5877 = vrcp.f32 %v832_v51  ;;  %v820_v52 = vpop.xlane.xlu1 %819  ;;  %v1449_v51 = vld [vmem:[#allocation13 + $0x620] sm:$0xff] }
 0x2e0   : > { %5879 = vrcp.f32 %v820_v52  ;;  %v5262_v52 = vcombine.low %v1438_v40, %v1442_v41  ;;  %v5269_v55 = vcombine.high %v1445_v50, %v1449_v51 }
 0x2e9   : > { %v5878_v57 = vpop.eup %5877 }
 0x2ea   : > { %v5880_v58 = vpop.eup %5879  ;;  %v834_v59 = vmul.f32 %v5878_v57, %v5874_v27  ;;  %v1425_v27 = vld [vmem:[#allocation13 + $0x560] sm:$0xff]  ;;  %v1458_v57 = vld [vmem:[#allocation13 + $0x668] sm:$0xff] }
 0x2eb   : > { %v822_v61 = vmul.f32 %v5880_v58, %v5876_v28  ;;  %v5238_v28 = vcombine.low %v1414_v16, %v1418_v17  ;;  %v5245_v31 = vcombine.high %v1421_v26, %v1425_v27  ;;  %v5244_v37 = vcombine.low %v1421_v26, %v1425_v27  ;;  %v1453_v58 = vld [vmem:[#allocation13 + $0x640] sm:$0xff]  ;;  %v1478_v17 = vld [vmem:[#allocation13 + $0x708] sm:$0xff] }
 0x2ec   : > { %5203 = vmatmul.mubr.msk.f32.vlgmr.msra.gmra.mrb[4].mxu1 %vm7691_vm9, %v834_v59  ;;  %v1457_v59 = vld [vmem:[#allocation13 + $0x660] sm:$0xff]  ;;  %v1490_v26 = vld [vmem:[#allocation13 + $0x768] sm:$0xff] }
 0x2ed   : > { %5200 = vmatmul.mubr.msk.f32.vlgmr.msra.gmra.mrb[4].mxu0 %vm7692_vm6, %v822_v61  ;;  %2191 = vmatpush1.bf16.msra.mxu1 %v5206_v49  ;;  %v1450_v49 = vld [vmem:[#allocation13 + $0x628] sm:$0xff]  ;;  %v5268_v61 = vcombine.low %v1445_v50, %v1449_v51  ;;  %v5277_v63 = vcombine.high %v1453_v58, %v1457_v59  ;;  %v1485_v27 = vld [vmem:[#allocation13 + $0x740] sm:$0xff] }
 0x2ee   : > { %2150 = vmatpush1.bf16.msra.mxu0 %v5204_v46  ;;  %2192 = vmatprep.subr.bf16.mxu1 %v5215_v60  ;;  %v5263_v46 = vcombine.high %v1438_v40, %v1442_v41  ;;  %v5271_v54 = vcombine.high %v1446_v48, %v1450_v49  ;;  %v5270_v60 = vcombine.low %v1446_v48, %v1450_v49  ;;  %v1501_v51 = vld [vmem:[#allocation13 + $0x7c0] sm:$0xff] }
 0x2ef   : > { %2151 = vmatprep.subr.bf16.mxu0 %v5213_v62  ;;  %v5279_v62 = vcombine.high %v1454_v56, %v1458_v57  ;;  %v5318_v41 = vcombine.low %v1494_v33, %v1498_v34 }
 0x2f1   : > { %2193 = vmatpush1.bf16.msra.mxu1 %v5214_v3  ;;  %v1465_v3 = vld [vmem:[#allocation13 + $0x6a0] sm:$0xff] }
 0x2f2   : > { %2152 = vmatpush1.bf16.msra.mxu0 %v5212_v4  ;;  %2194 = vmatprep.subr.bf16.mxu1 %v5223_v6  ;;  %v5278_v4 = vcombine.low %v1454_v56, %v1458_v57  ;;  %v5276_v6 = vcombine.low %v1453_v58, %v1457_v59  ;;  %v5285_v8 = vcombine.high %v1461_v2, %v1465_v3  ;;  %v1383_v59 = vld [vmem:[#allocation13 + $0x410] sm:$0xff] }
 0x2f3   : > { %2153 = vmatprep.subr.bf16.mxu0 %v5221_v7  ;;  %v5287_v7 = vcombine.high %v1462_v0, %v1466_v1 }
 0x2f5   : > { %2195 = vmatpush1.bf16.msra.mxu1 %v5222_v12  ;;  %v1473_v12 = vld [vmem:[#allocation13 + $0x6e0] sm:$0xff] }
 0x2f6   : > { %2154 = vmatpush1.bf16.msra.mxu0 %v5220_v13  ;;  %2196 = vmatprep.subr.bf16.mxu1 %v5231_v14  ;;  %v5286_v13 = vcombine.low %v1462_v0, %v1466_v1  ;;  %v5284_v14 = vcombine.low %v1461_v2, %v1465_v3  ;;  %v5293_v16 = vcombine.high %v1469_v11, %v1473_v12 }
 0x2f7   : > { %2155 = vmatprep.subr.bf16.mxu0 %v5229_v15  ;;  %v5295_v15 = vcombine.high %v1470_v9, %v1474_v10 }
 0x2f9   : > { %2197 = vmatpush1.bf16.msra.mxu1 %v5230_v20  ;;  %v1481_v20 = vld [vmem:[#allocation13 + $0x720] sm:$0xff] }
 0x2fa   : > { %2156 = vmatpush1.bf16.msra.mxu0 %v5228_v21  ;;  %2198 = vmatprep.subr.bf16.mxu1 %v5239_v22  ;;  %v5294_v21 = vcombine.low %v1470_v9, %v1474_v10  ;;  %v5292_v22 = vcombine.low %v1469_v11, %v1473_v12  ;;  %v5301_v24 = vcombine.high %v1477_v19, %v1481_v20  ;;  %v1391_v11 = vld [vmem:[#allocation13 + $0x450] sm:$0xff] }
 0x2fb   : > { %2157 = vmatprep.subr.bf16.mxu0 %v5237_v23  ;;  %v5303_v23 = vcombine.high %v1478_v17, %v1482_v18 }
 0x2fd   : > { %2199 = vmatpush1.bf16.msra.mxu1 %v5238_v28  ;;  %v1489_v28 = vld [vmem:[#allocation13 + $0x760] sm:$0xff] }
 0x2fe   : > { %2158 = vmatpush1.bf16.msra.mxu0 %v5236_v29  ;;  %2200 = vmatprep.subr.bf16.mxu1 %v5247_v30  ;;  %v5302_v29 = vcombine.low %v1478_v17, %v1482_v18  ;;  %v5300_v30 = vcombine.low %v1477_v19, %v1481_v20  ;;  %v5309_v32 = vcombine.high %v1485_v27, %v1489_v28  ;;  %v1399_v18 = vld [vmem:[#allocation13 + $0x490] sm:$0xff] }
 0x2ff   : > { %2159 = vmatprep.subr.bf16.mxu0 %v5245_v31  ;;  %v5311_v31 = vcombine.high %v1486_v25, %v1490_v26 }
 0x301   : > { %2201 = vmatpush1.bf16.msra.mxu1 %v5246_v36  ;;  %v1497_v36 = vld [vmem:[#allocation13 + $0x7a0] sm:$0xff] }
 0x302   : > { %2160 = vmatpush1.bf16.msra.mxu0 %v5244_v37  ;;  %2202 = vmatprep.subr.bf16.mxu1 %v5255_v38  ;;  %v5310_v37 = vcombine.low %v1486_v25, %v1490_v26  ;;  %v5308_v38 = vcombine.low %v1485_v27, %v1489_v28  ;;  %v5317_v40 = vcombine.high %v1493_v35, %v1497_v36  ;;  %v1407_v28 = vld [vmem:[#allocation13 + $0x4d0] sm:$0xff] }
 0x303   : > { %2161 = vmatprep.subr.bf16.mxu0 %v5253_v39  ;;  %v5319_v39 = vcombine.high %v1494_v33, %v1498_v34  ;;  %v5316_v42 = vcombine.low %v1493_v35, %v1497_v36  ;;  %v1415_v36 = vld [vmem:[#allocation13 + $0x510] sm:$0xff] }
 0x305   : > { %2203 = vmatpush1.bf16.msra.mxu1 %v5254_v44  ;;  %v1092_v44 = vpop.f32.mrb[1].mxu1 }
 0x306   : > { %2162 = vmatpush1.bf16.msra.mxu0 %v5252_v45  ;;  %2204 = vmatprep.subr.bf16.mxu1 %v5263_v46  ;;  %v1094_v45 = vpop.f32.mrb[2].mxu1 }
 0x307   : > { %2163 = vmatprep.subr.bf16.mxu0 %v5261_v47  ;;  %v1095_v46 = vpop.f32.mrb[3].mxu1  ;;  %v1044_v47 = vpop.f32.mrb[0].mxu0  ;;  %v1427_v45 = vld [vmem:[#allocation13 + $0x570] sm:$0xff] }
 0x308   : > { %v1046_v48 = vpop.f32.mrb[1].mxu0  ;;  %v1424_v46 = vld [vmem:[#allocation13 + $0x558] sm:$0xff] }
 0x309   : > { %2205 = vmatpush1.bf16.msra.mxu1 %v5262_v52  ;;  %v1048_v49 = vpop.f32.mrb[2].mxu0  ;;  %v1505_v52 = vld [vmem:[#allocation13 + $0x7e0] sm:$0xff] }
 0x30a   : > { %2164 = vmatpush1.bf16.msra.mxu0 %v5260_v53  ;;  %2206 = vmatprep.subr.bf16.mxu1 %v5271_v54  ;;  %v1049_v50 = vpop.f32.mrb[3].mxu0  ;;  %v1502_v53 = vld [vmem:[#allocation13 + $0x7c8] sm:$0xff]  ;;  %v5325_v54 = vcombine.high %v1501_v51, %v1505_v52  ;;  %v5324_v56 = vcombine.low %v1501_v51, %v1505_v52  ;;  %v1431_v52 = vld [vmem:[#allocation13 + $0x590] sm:$0xff] }
 0x30b   : > { %2165 = vmatprep.subr.bf16.mxu0 %v5269_v55  ;;  %v1506_v55 = vld [vmem:[#allocation13 + $0x7e8] sm:$0xff] }
 0x30c   : > { %v5326_v57 = vcombine.low %v1502_v53, %v1506_v55  ;;  %v5327_v58 = vcombine.high %v1502_v53, %v1506_v55  ;;  %v1435_v53 = vld [vmem:[#allocation13 + $0x5b0] sm:$0xff]  ;;  %v1436_v55 = vld [vmem:[#allocation13 + $0x5b8] sm:$0xff] }
 0x30d   : > { %2207 = vmatpush1.bf16.msra.mxu1 %v5270_v60  ;;  %v1387_v60 = vld [vmem:[#allocation13 + $0x430] sm:$0xff] }
 0x30e   : > { %2166 = vmatpush1.bf16.msra.mxu0 %v5268_v61  ;;  %2208 = vmatprep.subr.bf16.mxu1 %v5279_v62  ;;  %v1384_v61 = vld [vmem:[#allocation13 + $0x418] sm:$0xff]  ;;  %v5209_v62 = vcombine.high %v1383_v59, %v1387_v60  ;;  %v5208_v0 = vcombine.low %v1383_v59, %v1387_v60  ;;  %v1439_v60 = vld [vmem:[#allocation13 + $0x5d0] sm:$0xff] }
 0x30f   : > { %2167 = vmatprep.subr.bf16.mxu0 %v5277_v63  ;;  %v1388_v63 = vld [vmem:[#allocation13 + $0x438] sm:$0xff] }
 0x310   : > { %v5210_v1 = vcombine.low %v1384_v61, %v1388_v63  ;;  %v5211_v2 = vcombine.high %v1384_v61, %v1388_v63  ;;  %v1443_v61 = vld [vmem:[#allocation13 + $0x5f0] sm:$0xff]  ;;  %v1444_v63 = vld [vmem:[#allocation13 + $0x5f8] sm:$0xff] }
 0x311   : > { %2209 = vmatpush1.bf16.msra.mxu1 %v5278_v4 }
 0x312   : > { %2168 = vmatpush1.bf16.msra.mxu0 %v5276_v6  ;;  %2210 = vmatprep.subr.bf16.mxu1 %v5287_v7 }
 0x313   : > { %2169 = vmatprep.subr.bf16.mxu0 %v5285_v8 }
 0x315   : > { %2211 = vmatpush1.bf16.msra.mxu1 %v5286_v13  ;;  %v1395_v13 = vld [vmem:[#allocation13 + $0x470] sm:$0xff] }
 0x316   : > { %2170 = vmatpush1.bf16.msra.mxu0 %v5284_v14  ;;  %2212 = vmatprep.subr.bf16.mxu1 %v5295_v15  ;;  %v1392_v14 = vld [vmem:[#allocation13 + $0x458] sm:$0xff]  ;;  %v5217_v19 = vcombine.high %v1391_v11, %v1395_v13 }
 0x317   : > { %2171 = vmatprep.subr.bf16.mxu0 %v5293_v16  ;;  %v1396_v15 = vld [vmem:[#allocation13 + $0x478] sm:$0xff] }
 0x318   : > { %v5219_v20 = vcombine.high %v1392_v14, %v1396_v15  ;;  %v5218_v25 = vcombine.low %v1392_v14, %v1396_v15  ;;  %v1455_v15 = vld [vmem:[#allocation13 + $0x650] sm:$0xff] }
 0x319   : > { %2213 = vmatpush1.bf16.msra.mxu1 %v5294_v21  ;;  %v1403_v21 = vld [vmem:[#allocation13 + $0x4b0] sm:$0xff] }
 0x31a   : > { %2172 = vmatpush1.bf16.msra.mxu0 %v5292_v22  ;;  %2214 = vmatprep.subr.bf16.mxu1 %v5303_v23  ;;  %v1400_v22 = vld [vmem:[#allocation13 + $0x498] sm:$0xff]  ;;  %v5225_v26 = vcombine.high %v1399_v18, %v1403_v21 }
 0x31b   : > { %2173 = vmatprep.subr.bf16.mxu0 %v5301_v24  ;;  %v1404_v23 = vld [vmem:[#allocation13 + $0x4b8] sm:$0xff]  ;;  %v5216_v24 = vcombine.low %v1391_v11, %v1395_v13 }
 0x31c   : > { %v5227_v27 = vcombine.high %v1400_v22, %v1404_v23  ;;  %v5226_v33 = vcombine.low %v1400_v22, %v1404_v23 }
 0x31d   : > { %2215 = vmatpush1.bf16.msra.mxu1 %v5302_v29  ;;  %v1411_v29 = vld [vmem:[#allocation13 + $0x4f0] sm:$0xff] }
 0x31e   : > { %2174 = vmatpush1.bf16.msra.mxu0 %v5300_v30  ;;  %2216 = vmatprep.subr.bf16.mxu1 %v5311_v31  ;;  %v1408_v30 = vld [vmem:[#allocation13 + $0x4d8] sm:$0xff]  ;;  %v5233_v34 = vcombine.high %v1407_v28, %v1411_v29 }
 0x31f   : > { %2175 = vmatprep.subr.bf16.mxu0 %v5309_v32  ;;  %v1412_v31 = vld [vmem:[#allocation13 + $0x4f8] sm:$0xff]  ;;  %v5224_v32 = vcombine.low %v1399_v18, %v1403_v21 }
 0x320   : > { %v5235_v35 = vcombine.high %v1408_v30, %v1412_v31  ;;  %v1456_v18 = vld [vmem:[#allocation13 + $0x658] sm:$0xff] }
 0x321   : > { %2217 = vmatpush1.bf16.msra.mxu1 %v5310_v37  ;;  %v1419_v37 = vld [vmem:[#allocation13 + $0x530] sm:$0xff] }
 0x322   : > { %2176 = vmatpush1.bf16.msra.mxu0 %v5308_v38  ;;  %2218 = vmatprep.subr.bf16.mxu1 %v5319_v39  ;;  %v1416_v38 = vld [vmem:[#allocation13 + $0x518] sm:$0xff] }
 0x323   : > { %2177 = vmatprep.subr.bf16.mxu0 %v5317_v40  ;;  %v1420_v39 = vld [vmem:[#allocation13 + $0x538] sm:$0xff]  ;;  %v5232_v40 = vcombine.low %v1407_v28, %v1411_v29 }
 0x324   : > { %v5242_v49 = vcombine.low %v1416_v38, %v1420_v39 }
 0x325   : > { %2219 = vmatpush1.bf16.msra.mxu1 %v5318_v41  ;;  %v5234_v41 = vcombine.low %v1408_v30, %v1412_v31 }
 0x326   : > { %2178 = vmatpush1.bf16.msra.mxu0 %v5316_v42  ;;  %2220 = vmatprep.subr.bf16.mxu1 %v5327_v58  ;;  %v5241_v42 = vcombine.high %v1415_v36, %v1419_v37  ;;  %v5257_v58 = vcombine.high %v1431_v52, %v1435_v53 }
 0x327   : > { %2179 = vmatprep.subr.bf16.mxu0 %v5325_v54  ;;  %v1432_v54 = vld [vmem:[#allocation13 + $0x598] sm:$0xff] }
 0x328   : > { %v5259_v59 = vcombine.high %v1432_v54, %v1436_v55 }
 0x329   : > { %2221 = vmatpush1.bf16.msra.mxu1 %v5326_v57 }
 0x32a   : > { %2180 = vmatpush1.bf16.msra.mxu0 %v5324_v56  ;;  %2272 = vmatprep.subr.bf16.mxu1 %v5211_v2  ;;  %v5265_v2 = vcombine.high %v1439_v60, %v1443_v61 }
 0x32b   : > { %2231 = vmatprep.subr.bf16.mxu0 %v5209_v62  ;;  %v1440_v62 = vld [vmem:[#allocation13 + $0x5d8] sm:$0xff] }
 0x32c   : > { %v5266_v11 = vcombine.low %v1440_v62, %v1444_v63 }
 0x3bf   : > { %v1240_v3 = vpop.f32.mrb[4].mxu1 }
 0x3c0   : > { %v1166_v4 = vpop.f32.mrb[4].mxu0  ;;  %v1249_v6 = vmul.f32 %v1240_v3, %v1090_v43  ;;  %v1242_v7 = vpop.f32.mrb[5].mxu1  ;;  %v5243_v43 = vcombine.high %v1416_v38, %v1420_v39  ;;  %v5267_v3 = vcombine.high %v1440_v62, %v1444_v63 }
 0x3c1   : > { %v7226_v8 = vmul.f32 %v1166_v4, %v1044_v47  ;;  %v1168_v9 = vpop.f32.mrb[5].mxu0  ;;  %v1250_v10 = vmul.f32 %v1242_v7, %v1092_v44  ;;  %v1423_v44 = vld [vmem:[#allocation13 + $0x550] sm:$0xff]  ;;  %v1428_v47 = vld [vmem:[#allocation13 + $0x578] sm:$0xff] }
 0x3c2   : > { %v7228_v12 = vmul.f32 %v1168_v9, %v1046_v48  ;;  %v7230_v17 = vpack.c.bf16 %v1249_v6, %v1249_v6  ;;  %v5240_v48 = vcombine.low %v1415_v36, %v1419_v37  ;;  %v5249_v50 = vcombine.high %v1423_v44, %v1427_v45  ;;  %v1447_v4 = vld [vmem:[#allocation13 + $0x610] sm:$0xff]  ;;  %v1448_v7 = vld [vmem:[#allocation13 + $0x618] sm:$0xff] }
 0x3c3   : > { %v1252_v16 = vpack.c.bf16 %v1250_v10, %v1250_v10  ;;  %v5251_v51 = vcombine.high %v1424_v46, %v1428_v47  ;;  %v5248_v56 = vcombine.low %v1423_v44, %v1427_v45  ;;  %v5250_v57 = vcombine.low %v1424_v46, %v1428_v47  ;;  %v1451_v6 = vld [vmem:[#allocation13 + $0x630] sm:$0xff]  ;;  %v1452_v9 = vld [vmem:[#allocation13 + $0x638] sm:$0xff] }
 0x3c4   : > { %v5264_v10 = vcombine.low %v1439_v60, %v1443_v61  ;;  %v5273_v13 = vcombine.high %v1447_v4, %v1451_v6  ;;  %v5275_v14 = vcombine.high %v1448_v7, %v1452_v9  ;;  %v5274_v21 = vcombine.low %v1448_v7, %v1452_v9 }
 0x3c5   : > { %2181 = vmatprep.mubr.bf16.mxu0 %v1252_v16  ;;  %2222 = vmatprep.mubr.bf16.mxu1 %v1252_v16 }
 0x3c6   : > { %2182 = vmatmul.mubr.bf16.vlgmr.msra.gmra.mrb[8].mxu0 %v7230_v17  ;;  %2223 = vmatmul.mubr.bf16.vlgmr.msra.gmra.mrb[8].mxu1 %v7230_v17 }
 0x3c7   : > { %2232 = vmatpush1.bf16.msra.mxu0 %v5208_v0  ;;  %2273 = vmatpush1.bf16.msra.mxu1 %v5210_v1  ;;  %v5256_v0 = vcombine.low %v1431_v52, %v1435_v53  ;;  %v5258_v1 = vcombine.low %v1432_v54, %v1436_v55 }
 0x3c8   : > { %2263 = vmatprep.mubr.bf16.mxu0 %v1252_v16  ;;  %2304 = vmatprep.mubr.bf16.mxu1 %v1252_v16  ;;  %v1459_v16 = vld [vmem:[#allocation13 + $0x670] sm:$0xff] }
 0x3c9   : > { %2233 = vmatprep.subr.bf16.mxu0 %v5217_v19  ;;  %2274 = vmatprep.subr.bf16.mxu1 %v5219_v20  ;;  %v1460_v19 = vld [vmem:[#allocation13 + $0x678] sm:$0xff]  ;;  %v5272_v20 = vcombine.low %v1447_v4, %v1451_v6  ;;  %v5281_v22 = vcombine.high %v1455_v15, %v1459_v16  ;;  %v5280_v28 = vcombine.low %v1455_v15, %v1459_v16 }
 0x3ca   : > { %v5283_v23 = vcombine.high %v1456_v18, %v1460_v19  ;;  %v5282_v29 = vcombine.low %v1456_v18, %v1460_v19 }
 0x3cb   : > { %2234 = vmatpush1.bf16.msra.mxu0 %v5216_v24  ;;  %2275 = vmatpush1.bf16.msra.mxu1 %v5218_v25  ;;  %v1463_v24 = vld [vmem:[#allocation13 + $0x690] sm:$0xff] }
 0x3cc   : > { %2235 = vmatprep.subr.bf16.mxu0 %v5225_v26  ;;  %2276 = vmatprep.subr.bf16.mxu1 %v5227_v27  ;;  %v1467_v25 = vld [vmem:[#allocation13 + $0x6b0] sm:$0xff]  ;;  %v1464_v26 = vld [vmem:[#allocation13 + $0x698] sm:$0xff] }
 0x3cd   : > { %v1468_v27 = vld [vmem:[#allocation13 + $0x6b8] sm:$0xff]  ;;  %v5289_v30 = vcombine.high %v1463_v24, %v1467_v25  ;;  %v5288_v36 = vcombine.low %v1463_v24, %v1467_v25 }
 0x3ce   : > { %v5291_v31 = vcombine.high %v1464_v26, %v1468_v27  ;;  %v5290_v37 = vcombine.low %v1464_v26, %v1468_v27  ;;  %v7236_v26 = vpack.c.bf16 %v7228_v12, %v7228_v12 }
 0x3cf   : > { %2236 = vmatpush1.bf16.msra.mxu0 %v5224_v32  ;;  %2277 = vmatpush1.bf16.msra.mxu1 %v5226_v33  ;;  %v1471_v32 = vld [vmem:[#allocation13 + $0x6d0] sm:$0xff] }
 0x3d0   : > { %2237 = vmatprep.subr.bf16.mxu0 %v5233_v34  ;;  %2278 = vmatprep.subr.bf16.mxu1 %v5235_v35  ;;  %v1475_v33 = vld [vmem:[#allocation13 + $0x6f0] sm:$0xff]  ;;  %v1472_v34 = vld [vmem:[#allocation13 + $0x6d8] sm:$0xff] }
 0x3d1   : > { %v1476_v35 = vld [vmem:[#allocation13 + $0x6f8] sm:$0xff]  ;;  %v5297_v38 = vcombine.high %v1471_v32, %v1475_v33  ;;  %v5296_v44 = vcombine.low %v1471_v32, %v1475_v33  ;;  %v1274_v32 = vld [vmem:[#allocation13 + $0xa8] sm:$0xff] }
 0x3d2   : > { %v5299_v39 = vcombine.high %v1472_v34, %v1476_v35  ;;  %v5298_v45 = vcombine.low %v1472_v34, %v1476_v35 }
 0x3d3   : > { %2238 = vmatpush1.bf16.msra.mxu0 %v5232_v40  ;;  %2279 = vmatpush1.bf16.msra.mxu1 %v5234_v41  ;;  %v1479_v40 = vld [vmem:[#allocation13 + $0x710] sm:$0xff] }
 0x3d4   : > { %2239 = vmatprep.subr.bf16.mxu0 %v5241_v42  ;;  %2280 = vmatprep.subr.bf16.mxu1 %v5243_v43  ;;  %v1483_v41 = vld [vmem:[#allocation13 + $0x730] sm:$0xff]  ;;  %v1480_v42 = vld [vmem:[#allocation13 + $0x718] sm:$0xff] }
 0x3d5   : > { %v1484_v43 = vld [vmem:[#allocation13 + $0x738] sm:$0xff]  ;;  %v5305_v46 = vcombine.high %v1479_v40, %v1483_v41  ;;  %v5304_v52 = vcombine.low %v1479_v40, %v1483_v41 }
 0x3d6   : > { %v5307_v47 = vcombine.high %v1480_v42, %v1484_v43  ;;  %v5306_v53 = vcombine.low %v1480_v42, %v1484_v43  ;;  %v1285_v43 = vld [vmem:[#allocation13 + $0x100] sm:$0xff] }
 0x3d7   : > { %2240 = vmatpush1.bf16.msra.mxu0 %v5240_v48  ;;  %2281 = vmatpush1.bf16.msra.mxu1 %v5242_v49  ;;  %v1487_v48 = vld [vmem:[#allocation13 + $0x750] sm:$0xff] }
 0x3d8   : > { %2241 = vmatprep.subr.bf16.mxu0 %v5249_v50  ;;  %2282 = vmatprep.subr.bf16.mxu1 %v5251_v51  ;;  %v1491_v49 = vld [vmem:[#allocation13 + $0x770] sm:$0xff]  ;;  %v1488_v50 = vld [vmem:[#allocation13 + $0x758] sm:$0xff] }
 0x3d9   : > { %v1492_v51 = vld [vmem:[#allocation13 + $0x778] sm:$0xff]  ;;  %v5313_v54 = vcombine.high %v1487_v48, %v1491_v49  ;;  %v5312_v60 = vcombine.low %v1487_v48, %v1491_v49 }
 0x3da   : > { %v5315_v55 = vcombine.high %v1488_v50, %v1492_v51  ;;  %v5314_v61 = vcombine.low %v1488_v50, %v1492_v51  ;;  %v1293_v51 = vld [vmem:[#allocation13 + $0x140] sm:$0xff] }
 0x3db   : > { %2242 = vmatpush1.bf16.msra.mxu0 %v5248_v56  ;;  %2283 = vmatpush1.bf16.msra.mxu1 %v5250_v57  ;;  %v1495_v56 = vld [vmem:[#allocation13 + $0x790] sm:$0xff] }
 0x3dc   : > { %2243 = vmatprep.subr.bf16.mxu0 %v5257_v58  ;;  %2284 = vmatprep.subr.bf16.mxu1 %v5259_v59  ;;  %v1499_v57 = vld [vmem:[#allocation13 + $0x7b0] sm:$0xff]  ;;  %v1496_v58 = vld [vmem:[#allocation13 + $0x798] sm:$0xff] }
 0x3dd   : > { %v1500_v59 = vld [vmem:[#allocation13 + $0x7b8] sm:$0xff]  ;;  %v5321_v62 = vcombine.high %v1495_v56, %v1499_v57  ;;  %v5320_v4 = vcombine.low %v1495_v56, %v1499_v57 }
 0x3de   : > { %v5323_v63 = vcombine.high %v1496_v58, %v1500_v59  ;;  %v5322_v6 = vcombine.low %v1496_v58, %v1500_v59  ;;  %v1301_v59 = vld [vmem:[#allocation13 + $0x180] sm:$0xff] }
 0x3df   : > { %2244 = vmatpush1.bf16.msra.mxu0 %v5256_v0  ;;  %2285 = vmatpush1.bf16.msra.mxu1 %v5258_v1  ;;  %v1503_v0 = vld [vmem:[#allocation13 + $0x7d0] sm:$0xff] }
 0x3e0   : > { %2245 = vmatprep.subr.bf16.mxu0 %v5265_v2  ;;  %2286 = vmatprep.subr.bf16.mxu1 %v5267_v3  ;;  %v1507_v1 = vld [vmem:[#allocation13 + $0x7f0] sm:$0xff]  ;;  %v1504_v2 = vld [vmem:[#allocation13 + $0x7d8] sm:$0xff] }
 0x3e1   : > { %v1508_v3 = vld [vmem:[#allocation13 + $0x7f8] sm:$0xff]  ;;  %v5329_v7 = vcombine.high %v1503_v0, %v1507_v1  ;;  %v5328_v15 = vcombine.low %v1503_v0, %v1507_v1 }
 0x3e2   : > { %v5331_v9 = vcombine.high %v1504_v2, %v1508_v3  ;;  %v5330_v16 = vcombine.low %v1504_v2, %v1508_v3  ;;  %v1309_v3 = vld [vmem:[#allocation13 + $0x1c0] sm:$0xff] }
 0x3e3   : > { %2246 = vmatpush1.bf16.msra.mxu0 %v5264_v10  ;;  %2287 = vmatpush1.bf16.msra.mxu1 %v5266_v11  ;;  %v1253_v10 = vld [vmem:[#allocation13] sm:$0xff] }
 0x3e4   : > { %2247 = vmatprep.subr.bf16.mxu0 %v5273_v13  ;;  %2288 = vmatprep.subr.bf16.mxu1 %v5275_v14  ;;  %v1257_v11 = vld [vmem:[#allocation13 + $0x20] sm:$0xff]  ;;  %v1254_v13 = vld [vmem:[#allocation13 + $0x8] sm:$0xff] }
 0x3e5   : > { %v1258_v14 = vld [vmem:[#allocation13 + $0x28] sm:$0xff]  ;;  %v5333_v18 = vcombine.high %v1253_v10, %v1257_v11  ;;  %v5332_v24 = vcombine.low %v1253_v10, %v1257_v11 }
 0x3e6   : > { %v5335_v19 = vcombine.high %v1254_v13, %v1258_v14  ;;  %v5334_v25 = vcombine.low %v1254_v13, %v1258_v14  ;;  %v1317_v14 = vld [vmem:[#allocation13 + $0x200] sm:$0xff] }
 0x3e7   : > { %2248 = vmatpush1.bf16.msra.mxu0 %v5272_v20  ;;  %2289 = vmatpush1.bf16.msra.mxu1 %v5274_v21  ;;  %v1261_v20 = vld [vmem:[#allocation13 + $0x40] sm:$0xff] }
 0x3e8   : > { %2249 = vmatprep.subr.bf16.mxu0 %v5281_v22  ;;  %2290 = vmatprep.subr.bf16.mxu1 %v5283_v23  ;;  %v1265_v21 = vld [vmem:[#allocation13 + $0x60] sm:$0xff]  ;;  %v1262_v22 = vld [vmem:[#allocation13 + $0x48] sm:$0xff] }
 0x3e9   : > { %v1266_v23 = vld [vmem:[#allocation13 + $0x68] sm:$0xff]  ;;  %v5341_v27 = vcombine.high %v1261_v20, %v1265_v21  ;;  %v5340_v33 = vcombine.low %v1261_v20, %v1265_v21 }
 0x3ea   : > { %v5342_v34 = vcombine.low %v1262_v22, %v1266_v23 }
 0x3eb   : > { %2250 = vmatpush1.bf16.msra.mxu0 %v5280_v28  ;;  %2291 = vmatpush1.bf16.msra.mxu1 %v5282_v29  ;;  %v5343_v28 = vcombine.high %v1262_v22, %v1266_v23  ;;  %v1269_v29 = vld [vmem:[#allocation13 + $0x80] sm:$0xff] }
 0x3ec   : > { %2251 = vmatprep.subr.bf16.mxu0 %v5289_v30  ;;  %2292 = vmatprep.subr.bf16.mxu1 %v5291_v31  ;;  %v1273_v30 = vld [vmem:[#allocation13 + $0xa0] sm:$0xff]  ;;  %v1270_v31 = vld [vmem:[#allocation13 + $0x88] sm:$0xff] }
 0x3ed   : > { %v5349_v12 = vcombine.high %v1269_v29, %v1273_v30  ;;  %v5351_v35 = vcombine.high %v1270_v31, %v1274_v32  ;;  %v5350_v40 = vcombine.low %v1270_v31, %v1274_v32  ;;  %v1325_v23 = vld [vmem:[#allocation13 + $0x240] sm:$0xff] }
 0x3ee   : > { %v1333_v32 = vld [vmem:[#allocation13 + $0x280] sm:$0xff] }
 0x3ef   : > { %2252 = vmatpush1.bf16.msra.mxu0 %v5288_v36  ;;  %2293 = vmatpush1.bf16.msra.mxu1 %v5290_v37  ;;  %v1277_v36 = vld [vmem:[#allocation13 + $0xc0] sm:$0xff] }
 0x3f0   : > { %2253 = vmatprep.subr.bf16.mxu0 %v5297_v38  ;;  %2294 = vmatprep.subr.bf16.mxu1 %v5299_v39  ;;  %v1281_v37 = vld [vmem:[#allocation13 + $0xe0] sm:$0xff]  ;;  %v1278_v38 = vld [vmem:[#allocation13 + $0xc8] sm:$0xff] }
 0x3f1   : > { %v1282_v39 = vld [vmem:[#allocation13 + $0xe8] sm:$0xff]  ;;  %v5357_v41 = vcombine.high %v1277_v36, %v1281_v37 }
 0x3f2   : > { %v5359_v42 = vcombine.high %v1278_v38, %v1282_v39  ;;  %v5358_v48 = vcombine.low %v1278_v38, %v1282_v39  ;;  %v1341_v39 = vld [vmem:[#allocation13 + $0x2c0] sm:$0xff] }
 0x3f3   : > { %2254 = vmatpush1.bf16.msra.mxu0 %v5296_v44  ;;  %2295 = vmatpush1.bf16.msra.mxu1 %v5298_v45  ;;  %v1289_v44 = vld [vmem:[#allocation13 + $0x120] sm:$0xff]  ;;  %v1286_v45 = vld [vmem:[#allocation13 + $0x108] sm:$0xff] }
 0x3f4   : > { %2255 = vmatprep.subr.bf16.mxu0 %v5305_v46  ;;  %2296 = vmatprep.subr.bf16.mxu1 %v5307_v47  ;;  %v1290_v46 = vld [vmem:[#allocation13 + $0x128] sm:$0xff]  ;;  %v5356_v47 = vcombine.low %v1277_v36, %v1281_v37  ;;  %v5365_v49 = vcombine.high %v1285_v43, %v1289_v44 }
 0x3f5   : > { %v5367_v50 = vcombine.high %v1286_v45, %v1290_v46  ;;  %v5366_v56 = vcombine.low %v1286_v45, %v1290_v46  ;;  %v1349_v46 = vld [vmem:[#allocation13 + $0x300] sm:$0xff] }
 0x3f7   : > { %2256 = vmatpush1.bf16.msra.mxu0 %v5304_v52  ;;  %2297 = vmatpush1.bf16.msra.mxu1 %v5306_v53  ;;  %v1297_v52 = vld [vmem:[#allocation13 + $0x160] sm:$0xff]  ;;  %v1294_v53 = vld [vmem:[#allocation13 + $0x148] sm:$0xff] }
 0x3f8   : > { %2257 = vmatprep.subr.bf16.mxu0 %v5313_v54  ;;  %2298 = vmatprep.subr.bf16.mxu1 %v5315_v55  ;;  %v1298_v54 = vld [vmem:[#allocation13 + $0x168] sm:$0xff]  ;;  %v5364_v55 = vcombine.low %v1285_v43, %v1289_v44  ;;  %v5373_v57 = vcombine.high %v1293_v51, %v1297_v52 }
 0x3f9   : > { %v5375_v58 = vcombine.high %v1294_v53, %v1298_v54  ;;  %v5374_v0 = vcombine.low %v1294_v53, %v1298_v54  ;;  %v1357_v54 = vld [vmem:[#allocation13 + $0x340] sm:$0xff] }
 0x3fb   : > { %2258 = vmatpush1.bf16.msra.mxu0 %v5312_v60  ;;  %2299 = vmatpush1.bf16.msra.mxu1 %v5314_v61  ;;  %v1305_v60 = vld [vmem:[#allocation13 + $0x1a0] sm:$0xff]  ;;  %v1302_v61 = vld [vmem:[#allocation13 + $0x188] sm:$0xff] }
 0x3fc   : > { %2259 = vmatprep.subr.bf16.mxu0 %v5321_v62  ;;  %2300 = vmatprep.subr.bf16.mxu1 %v5323_v63  ;;  %v1306_v62 = vld [vmem:[#allocation13 + $0x1a8] sm:$0xff]  ;;  %v5372_v63 = vcombine.low %v1293_v51, %v1297_v52  ;;  %v5381_v1 = vcombine.high %v1301_v59, %v1305_v60 }
 0x3fd   : > { %v5383_v2 = vcombine.high %v1302_v61, %v1306_v62  ;;  %v5382_v10 = vcombine.low %v1302_v61, %v1306_v62  ;;  %v1365_v62 = vld [vmem:[#allocation13 + $0x380] sm:$0xff] }
 0x3ff   : > { %2260 = vmatpush1.bf16.msra.mxu0 %v5320_v4  ;;  %2301 = vmatpush1.bf16.msra.mxu1 %v5322_v6  ;;  %v1313_v4 = vld [vmem:[#allocation13 + $0x1e0] sm:$0xff]  ;;  %v1310_v6 = vld [vmem:[#allocation13 + $0x1c8] sm:$0xff] }
 0x400   : > { %2261 = vmatprep.subr.bf16.mxu0 %v5329_v7  ;;  %2302 = vmatprep.subr.bf16.mxu1 %v5331_v9  ;;  %v1314_v7 = vld [vmem:[#allocation13 + $0x1e8] sm:$0xff]  ;;  %v5380_v9 = vcombine.low %v1301_v59, %v1305_v60  ;;  %v5389_v11 = vcombine.high %v1309_v3, %v1313_v4 }
 0x401   : > { %v5391_v13 = vcombine.high %v1310_v6, %v1314_v7  ;;  %v5390_v20 = vcombine.low %v1310_v6, %v1314_v7  ;;  %v1373_v7 = vld [vmem:[#allocation13 + $0x3c0] sm:$0xff] }
 0x403   : > { %2262 = vmatpush1.bf16.msra.mxu0 %v5328_v15  ;;  %2303 = vmatpush1.bf16.msra.mxu1 %v5330_v16  ;;  %v1321_v15 = vld [vmem:[#allocation13 + $0x220] sm:$0xff]  ;;  %v1318_v16 = vld [vmem:[#allocation13 + $0x208] sm:$0xff] }
 0x404   : > { %2953 = vmatprep.subr.bf16.mxu0 %v5333_v18  ;;  %2994 = vmatprep.subr.bf16.mxu1 %v5335_v19  ;;  %v1322_v18 = vld [vmem:[#allocation13 + $0x228] sm:$0xff]  ;;  %v5388_v19 = vcombine.low %v1309_v3, %v1313_v4  ;;  %v5397_v21 = vcombine.high %v1317_v14, %v1321_v15 }
 0x405   : > { %v5399_v22 = vcombine.high %v1318_v16, %v1322_v18 }
 0x406   : > { %2264 = vmatmul.mubr.bf16.vlgmr.msra.gmra.mrb[12].mxu0 %v7230_v17  ;;  %2305 = vmatmul.mubr.bf16.vlgmr.msra.gmra.mrb[12].mxu1 %v7230_v17  ;;  %v5348_v17 = vcombine.low %v1269_v29, %v1273_v30  ;;  %v5398_v29 = vcombine.low %v1318_v16, %v1322_v18  ;;  %v1255_v18 = vld [vmem:[#allocation13 + $0x10] sm:$0xff] }
 0x407   : > { %2954 = vmatpush1.bf16.msra.mxu0 %v5332_v24  ;;  %2985 = vmatprep.mubr.bf16.mxu0 %v7236_v26  ;;  %v1329_v24 = vld [vmem:[#allocation13 + $0x260] sm:$0xff] }
 0x408   : > { %2995 = vmatpush1.bf16.msra.mxu1 %v5334_v25  ;;  %3026 = vmatprep.mubr.bf16.mxu1 %v7236_v26  ;;  %v1326_v25 = vld [vmem:[#allocation13 + $0x248] sm:$0xff]  ;;  %v5405_v30 = vcombine.high %v1325_v23, %v1329_v24 }
 0x409   : > { %2955 = vmatprep.subr.bf16.mxu0 %v5341_v27  ;;  %2996 = vmatprep.subr.bf16.mxu1 %v5343_v28  ;;  %v1330_v27 = vld [vmem:[#allocation13 + $0x268] sm:$0xff]  ;;  %v5396_v28 = vcombine.low %v1317_v14, %v1321_v15 }
 0x40a   : > { %v5407_v31 = vcombine.high %v1326_v25, %v1330_v27  ;;  %v5406_v36 = vcombine.low %v1326_v25, %v1330_v27  ;;  %v1263_v27 = vld [vmem:[#allocation13 + $0x50] sm:$0xff] }
 0x40b   : > { %2956 = vmatpush1.bf16.msra.mxu0 %v5340_v33  ;;  %v1337_v33 = vld [vmem:[#allocation13 + $0x2a0] sm:$0xff] }
 0x40c   : > { %2997 = vmatpush1.bf16.msra.mxu1 %v5342_v34  ;;  %2957 = vmatprep.subr.bf16.mxu0 %v5349_v12  ;;  %v1334_v34 = vld [vmem:[#allocation13 + $0x288] sm:$0xff]  ;;  %v5413_v37 = vcombine.high %v1333_v32, %v1337_v33 }
 0x40d   : > { %2998 = vmatprep.subr.bf16.mxu1 %v5351_v35  ;;  %v1338_v12 = vld [vmem:[#allocation13 + $0x2a8] sm:$0xff]  ;;  %v5404_v35 = vcombine.low %v1325_v23, %v1329_v24 }
 0x40e   : > { %v5415_v38 = vcombine.high %v1334_v34, %v1338_v12  ;;  %v5414_v43 = vcombine.low %v1334_v34, %v1338_v12  ;;  %v1271_v12 = vld [vmem:[#allocation13 + $0x90] sm:$0xff] }
 0x40f   : > { %2958 = vmatpush1.bf16.msra.mxu0 %v5348_v17  ;;  %v1345_v17 = vld [vmem:[#allocation13 + $0x2e0] sm:$0xff] }
 0x410   : > { %2999 = vmatpush1.bf16.msra.mxu1 %v5350_v40  ;;  %2959 = vmatprep.subr.bf16.mxu0 %v5357_v41  ;;  %v1342_v40 = vld [vmem:[#allocation13 + $0x2c8] sm:$0xff]  ;;  %v5421_v44 = vcombine.high %v1341_v39, %v1345_v17 }
 0x411   : > { %3000 = vmatprep.subr.bf16.mxu1 %v5359_v42  ;;  %v1346_v41 = vld [vmem:[#allocation13 + $0x2e8] sm:$0xff]  ;;  %v5412_v42 = vcombine.low %v1333_v32, %v1337_v33  ;;  %v7244_v32 = vpack.c.bf16 %v7226_v8, %v7226_v8 }
 0x412   : > { %v5423_v45 = vcombine.high %v1342_v40, %v1346_v41  ;;  %v5422_v51 = vcombine.low %v1342_v40, %v1346_v41  ;;  %v1279_v41 = vld [vmem:[#allocation13 + $0xd0] sm:$0xff] }
 0x413   : > { %2960 = vmatpush1.bf16.msra.mxu0 %v5356_v47  ;;  %v1353_v47 = vld [vmem:[#allocation13 + $0x320] sm:$0xff] }
 0x414   : > { %3001 = vmatpush1.bf16.msra.mxu1 %v5358_v48  ;;  %2961 = vmatprep.subr.bf16.mxu0 %v5365_v49  ;;  %v1350_v48 = vld [vmem:[#allocation13 + $0x308] sm:$0xff]  ;;  %v5429_v52 = vcombine.high %v1349_v46, %v1353_v47 }
 0x415   : > { %3002 = vmatprep.subr.bf16.mxu1 %v5367_v50  ;;  %v1354_v49 = vld [vmem:[#allocation13 + $0x328] sm:$0xff]  ;;  %v5420_v50 = vcombine.low %v1341_v39, %v1345_v17 }
 0x416   : > { %v5431_v53 = vcombine.high %v1350_v48, %v1354_v49  ;;  %v5430_v59 = vcombine.low %v1350_v48, %v1354_v49  ;;  %v1287_v49 = vld [vmem:[#allocation13 + $0x110] sm:$0xff] }
 0x417   : > { %2962 = vmatpush1.bf16.msra.mxu0 %v5364_v55  ;;  %v1361_v55 = vld [vmem:[#allocation13 + $0x360] sm:$0xff] }
 0x418   : > { %3003 = vmatpush1.bf16.msra.mxu1 %v5366_v56  ;;  %2963 = vmatprep.subr.bf16.mxu0 %v5373_v57  ;;  %v1358_v56 = vld [vmem:[#allocation13 + $0x348] sm:$0xff]  ;;  %v5437_v60 = vcombine.high %v1357_v54, %v1361_v55 }
 0x419   : > { %3004 = vmatprep.subr.bf16.mxu1 %v5375_v58  ;;  %v1362_v57 = vld [vmem:[#allocation13 + $0x368] sm:$0xff]  ;;  %v5428_v58 = vcombine.low %v1349_v46, %v1353_v47 }
 0x41a   : > { %v5439_v61 = vcombine.high %v1358_v56, %v1362_v57  ;;  %v5438_v3 = vcombine.low %v1358_v56, %v1362_v57  ;;  %v1295_v56 = vld [vmem:[#allocation13 + $0x150] sm:$0xff] }
 0x41b   : > { %2964 = vmatpush1.bf16.msra.mxu0 %v5372_v63  ;;  %v1369_v63 = vld [vmem:[#allocation13 + $0x3a0] sm:$0xff]  ;;  %v1299_v57 = vld [vmem:[#allocation13 + $0x170] sm:$0xff] }
 0x41c   : > { %3005 = vmatpush1.bf16.msra.mxu1 %v5374_v0  ;;  %2965 = vmatprep.subr.bf16.mxu0 %v5381_v1  ;;  %v1366_v0 = vld [vmem:[#allocation13 + $0x388] sm:$0xff]  ;;  %v5445_v4 = vcombine.high %v1365_v62, %v1369_v63 }
 0x41d   : > { %3006 = vmatprep.subr.bf16.mxu1 %v5383_v2  ;;  %v1370_v1 = vld [vmem:[#allocation13 + $0x3a8] sm:$0xff]  ;;  %v5436_v2 = vcombine.low %v1357_v54, %v1361_v55 }
 0x41e   : > { %v5447_v6 = vcombine.high %v1366_v0, %v1370_v1  ;;  %v5446_v14 = vcombine.low %v1366_v0, %v1370_v1  ;;  %v1303_v0 = vld [vmem:[#allocation13 + $0x190] sm:$0xff] }
 0x41f   : > { %2966 = vmatpush1.bf16.msra.mxu0 %v5380_v9  ;;  %v1377_v9 = vld [vmem:[#allocation13 + $0x3e0] sm:$0xff]  ;;  %v1307_v1 = vld [vmem:[#allocation13 + $0x1b0] sm:$0xff] }
 0x420   : > { %3007 = vmatpush1.bf16.msra.mxu1 %v5382_v10  ;;  %2967 = vmatprep.subr.bf16.mxu0 %v5389_v11  ;;  %v1374_v10 = vld [vmem:[#allocation13 + $0x3c8] sm:$0xff]  ;;  %v5453_v15 = vcombine.high %v1373_v7, %v1377_v9 }
 0x421   : > { %3008 = vmatprep.subr.bf16.mxu1 %v5391_v13  ;;  %v1378_v11 = vld [vmem:[#allocation13 + $0x3e8] sm:$0xff]  ;;  %v5444_v13 = vcombine.low %v1365_v62, %v1369_v63  ;;  %v5377_v62 = vcombine.high %v1295_v56, %v1299_v57 }
 0x422   : > { %v5455_v16 = vcombine.high %v1374_v10, %v1378_v11  ;;  %v5454_v23 = vcombine.low %v1374_v10, %v1378_v11  ;;  %v1311_v10 = vld [vmem:[#allocation13 + $0x1d0] sm:$0xff] }
 0x423   : > { %2968 = vmatpush1.bf16.msra.mxu0 %v5388_v19  ;;  %v1259_v19 = vld [vmem:[#allocation13 + $0x30] sm:$0xff] }
 0x424   : > { %3009 = vmatpush1.bf16.msra.mxu1 %v5390_v20  ;;  %2969 = vmatprep.subr.bf16.mxu0 %v5397_v21  ;;  %v1256_v20 = vld [vmem:[#allocation13 + $0x18] sm:$0xff]  ;;  %v5337_v24 = vcombine.high %v1255_v18, %v1259_v19  ;;  %v1315_v11 = vld [vmem:[#allocation13 + $0x1f0] sm:$0xff] }
 0x425   : > { %3010 = vmatprep.subr.bf16.mxu1 %v5399_v22  ;;  %v1260_v21 = vld [vmem:[#allocation13 + $0x38] sm:$0xff]  ;;  %v5452_v22 = vcombine.low %v1373_v7, %v1377_v9  ;;  %v5385_v7 = vcombine.high %v1303_v0, %v1307_v1 }
 0x426   : > { %v5339_v25 = vcombine.high %v1256_v20, %v1260_v21  ;;  %v5338_v33 = vcombine.low %v1256_v20, %v1260_v21  ;;  %v1319_v20 = vld [vmem:[#allocation13 + $0x210] sm:$0xff] }
 0x427   : > { %2970 = vmatpush1.bf16.msra.mxu0 %v5396_v28  ;;  %v1267_v28 = vld [vmem:[#allocation13 + $0x70] sm:$0xff] }
 0x428   : > { %3011 = vmatpush1.bf16.msra.mxu1 %v5398_v29  ;;  %2971 = vmatprep.subr.bf16.mxu0 %v5405_v30  ;;  %v5336_v29 = vcombine.low %v1255_v18, %v1259_v19  ;;  %v1264_v30 = vld [vmem:[#allocation13 + $0x58] sm:$0xff]  ;;  %v5345_v34 = vcombine.high %v1263_v27, %v1267_v28  ;;  %v5344_v39 = vcombine.low %v1263_v27, %v1267_v28  ;;  %v1323_v21 = vld [vmem:[#allocation13 + $0x230] sm:$0xff] }
 0x429   : > { %3012 = vmatprep.subr.bf16.mxu1 %v5407_v31  ;;  %v1268_v31 = vld [vmem:[#allocation13 + $0x78] sm:$0xff]  ;;  %v5393_v18 = vcombine.high %v1311_v10, %v1315_v11  ;;  %v5401_v27 = vcombine.high %v1319_v20, %v1323_v21 }
 0x42a   : > { %v5346_v8 = vcombine.low %v1264_v30, %v1268_v31 }
 0x42b   : > { %2972 = vmatpush1.bf16.msra.mxu0 %v5404_v35  ;;  %v1275_v35 = vld [vmem:[#allocation13 + $0xb0] sm:$0xff] }
 0x42c   : > { %3013 = vmatpush1.bf16.msra.mxu1 %v5406_v36  ;;  %2973 = vmatprep.subr.bf16.mxu0 %v5413_v37  ;;  %v5347_v36 = vcombine.high %v1264_v30, %v1268_v31  ;;  %v1272_v37 = vld [vmem:[#allocation13 + $0x98] sm:$0xff]  ;;  %v5353_v17 = vcombine.high %v1271_v12, %v1275_v35  ;;  %v1331_v30 = vld [vmem:[#allocation13 + $0x270] sm:$0xff] }
 0x42d   : > { %3014 = vmatprep.subr.bf16.mxu1 %v5415_v38  ;;  %v1276_v38 = vld [vmem:[#allocation13 + $0xb8] sm:$0xff] }
 0x42e   : > { %v5355_v40 = vcombine.high %v1272_v37, %v1276_v38  ;;  %v5354_v46 = vcombine.low %v1272_v37, %v1276_v38  ;;  %v1328_v31 = vld [vmem:[#allocation13 + $0x258] sm:$0xff]  ;;  %v1335_v37 = vld [vmem:[#allocation13 + $0x290] sm:$0xff] }
 0x42f   : > { %2974 = vmatpush1.bf16.msra.mxu0 %v5412_v42  ;;  %v1283_v42 = vld [vmem:[#allocation13 + $0xf0] sm:$0xff] }
 0x430   : > { %3015 = vmatpush1.bf16.msra.mxu1 %v5414_v43  ;;  %2975 = vmatprep.subr.bf16.mxu0 %v5421_v44  ;;  %v1280_v43 = vld [vmem:[#allocation13 + $0xd8] sm:$0xff]  ;;  %v5361_v47 = vcombine.high %v1279_v41, %v1283_v42  ;;  %v1339_v38 = vld [vmem:[#allocation13 + $0x2b0] sm:$0xff] }
 0x431   : > { %3016 = vmatprep.subr.bf16.mxu1 %v5423_v45  ;;  %v1284_v44 = vld [vmem:[#allocation13 + $0xf8] sm:$0xff]  ;;  %v5352_v45 = vcombine.low %v1271_v12, %v1275_v35 }
 0x432   : > { %v5363_v48 = vcombine.high %v1280_v43, %v1284_v44 }
 0x433   : > { %2976 = vmatpush1.bf16.msra.mxu0 %v5420_v50  ;;  %v1291_v50 = vld [vmem:[#allocation13 + $0x130] sm:$0xff] }
 0x434   : > { %3017 = vmatpush1.bf16.msra.mxu1 %v5422_v51  ;;  %2977 = vmatprep.subr.bf16.mxu0 %v5429_v52  ;;  %v1288_v51 = vld [vmem:[#allocation13 + $0x118] sm:$0xff]  ;;  %v5369_v54 = vcombine.high %v1287_v49, %v1291_v50 }
 0x435   : > { %3018 = vmatprep.subr.bf16.mxu1 %v5431_v53  ;;  %v1292_v52 = vld [vmem:[#allocation13 + $0x138] sm:$0xff]  ;;  %v5362_v53 = vcombine.low %v1280_v43, %v1284_v44  ;;  %v1343_v43 = vld [vmem:[#allocation13 + $0x2d0] sm:$0xff] }
 0x436   : > { %v5371_v55 = vcombine.high %v1288_v51, %v1292_v52  ;;  %v1347_v44 = vld [vmem:[#allocation13 + $0x2f0] sm:$0xff] }
 0x437   : > { %2978 = vmatpush1.bf16.msra.mxu0 %v5428_v58  ;;  %v1296_v58 = vld [vmem:[#allocation13 + $0x158] sm:$0xff] }
 0x438   : > { %3019 = vmatpush1.bf16.msra.mxu1 %v5430_v59  ;;  %2979 = vmatprep.subr.bf16.mxu0 %v5437_v60  ;;  %v1300_v59 = vld [vmem:[#allocation13 + $0x178] sm:$0xff]  ;;  %v5368_v60 = vcombine.low %v1287_v49, %v1291_v50  ;;  %v5425_v49 = vcombine.high %v1343_v43, %v1347_v44 }
 0x439   : > { %3020 = vmatprep.subr.bf16.mxu1 %v5439_v61  ;;  %v5370_v61 = vcombine.low %v1288_v51, %v1292_v52  ;;  %v5379_v63 = vcombine.high %v1296_v58, %v1300_v59  ;;  %v1351_v51 = vld [vmem:[#allocation13 + $0x310] sm:$0xff] }
 0x43a   : > { %v1355_v52 = vld [vmem:[#allocation13 + $0x330] sm:$0xff] }
 0x43b   : > { %2980 = vmatpush1.bf16.msra.mxu0 %v5436_v2  ;;  %v1304_v2 = vld [vmem:[#allocation13 + $0x198] sm:$0xff] }
 0x43c   : > { %3021 = vmatpush1.bf16.msra.mxu1 %v5438_v3  ;;  %2981 = vmatprep.subr.bf16.mxu0 %v5445_v4  ;;  %v1308_v3 = vld [vmem:[#allocation13 + $0x1b8] sm:$0xff]  ;;  %v5376_v4 = vcombine.low %v1295_v56, %v1299_v57  ;;  %v5433_v56 = vcombine.high %v1351_v51, %v1355_v52 }
 0x43d   : > { %3022 = vmatprep.subr.bf16.mxu1 %v5447_v6  ;;  %v5378_v6 = vcombine.low %v1296_v58, %v1300_v59  ;;  %v5387_v9 = vcombine.high %v1304_v2, %v1308_v3  ;;  %v1359_v58 = vld [vmem:[#allocation13 + $0x350] sm:$0xff] }
 0x43e   : > { %v1363_v59 = vld [vmem:[#allocation13 + $0x370] sm:$0xff] }
 0x43f   : > { %2982 = vmatpush1.bf16.msra.mxu0 %v5444_v13  ;;  %v1312_v13 = vld [vmem:[#allocation13 + $0x1d8] sm:$0xff] }
 0x440   : > { %3023 = vmatpush1.bf16.msra.mxu1 %v5446_v14  ;;  %2983 = vmatprep.subr.bf16.mxu0 %v5453_v15  ;;  %v1316_v14 = vld [vmem:[#allocation13 + $0x1f8] sm:$0xff]  ;;  %v5384_v15 = vcombine.low %v1303_v0, %v1307_v1  ;;  %v5441_v0 = vcombine.high %v1359_v58, %v1363_v59 }
 0x441   : > { %3024 = vmatprep.subr.bf16.mxu1 %v5455_v16  ;;  %v5386_v16 = vcombine.low %v1304_v2, %v1308_v3  ;;  %v5395_v19 = vcombine.high %v1312_v13, %v1316_v14  ;;  %v1367_v2 = vld [vmem:[#allocation13 + $0x390] sm:$0xff] }
 0x442   : > { %v1371_v3 = vld [vmem:[#allocation13 + $0x3b0] sm:$0xff] }
 0x443   : > { %2984 = vmatpush1.bf16.msra.mxu0 %v5452_v22  ;;  %v1320_v22 = vld [vmem:[#allocation13 + $0x218] sm:$0xff] }
 0x444   : > { %3025 = vmatpush1.bf16.msra.mxu1 %v5454_v23  ;;  %3035 = vmatprep.subr.bf16.mxu0 %v5337_v24  ;;  %v1324_v23 = vld [vmem:[#allocation13 + $0x238] sm:$0xff]  ;;  %v5392_v24 = vcombine.low %v1311_v10, %v1315_v11  ;;  %v5449_v10 = vcombine.high %v1367_v2, %v1371_v3 }
 0x445   : > { %3076 = vmatprep.subr.bf16.mxu1 %v5339_v25  ;;  %v5394_v25 = vcombine.low %v1312_v13, %v1316_v14  ;;  %v5403_v28 = vcombine.high %v1320_v22, %v1324_v23  ;;  %v5402_v12 = vcombine.low %v1320_v22, %v1324_v23  ;;  %v1375_v13 = vld [vmem:[#allocation13 + $0x3d0] sm:$0xff] }
 0x446   : > { %2986 = vmatmul.mubr.bf16.vlgmr.msra.gmra.mrb[16].mxu0 %v7244_v32  ;;  %v1379_v14 = vld [vmem:[#allocation13 + $0x3f0] sm:$0xff] }
 0x447   : > { %3027 = vmatmul.mubr.bf16.vlgmr.msra.gmra.mrb[16].mxu1 %v7244_v32  ;;  %3036 = vmatpush1.bf16.msra.mxu0 %v5336_v29  ;;  %v1327_v29 = vld [vmem:[#allocation13 + $0x250] sm:$0xff]  ;;  %v5456_v22 = vcombine.low %v1375_v13, %v1379_v14 }
 0x448   : > { %3067 = vmatprep.mubr.bf16.mxu0 %v7236_v26  ;;  %3077 = vmatpush1.bf16.msra.mxu1 %v5338_v33  ;;  %v1332_v33 = vld [vmem:[#allocation13 + $0x278] sm:$0xff]  ;;  %v5409_v35 = vcombine.high %v1327_v29, %v1331_v30 }
 0x449   : > { %3108 = vmatprep.mubr.bf16.mxu1 %v7236_v26  ;;  %3037 = vmatprep.subr.bf16.mxu0 %v5345_v34  ;;  %v5360_v26 = vcombine.low %v1279_v41, %v1283_v42  ;;  %v5400_v34 = vcombine.low %v1319_v20, %v1323_v21  ;;  %v5417_v41 = vcombine.high %v1335_v37, %v1339_v38 }
 0x44a   : > { %3078 = vmatprep.subr.bf16.mxu1 %v5347_v36  ;;  %v5411_v36 = vcombine.high %v1328_v31, %v1332_v33  ;;  %v5457_v20 = vcombine.high %v1375_v13, %v1379_v14 }
 0x44b   : > { %3038 = vmatpush1.bf16.msra.mxu0 %v5344_v39  ;;  %v1336_v39 = vld [vmem:[#allocation13 + $0x298] sm:$0xff] }
 0x44c   : > { %3079 = vmatpush1.bf16.msra.mxu1 %v5346_v8  ;;  %3039 = vmatprep.subr.bf16.mxu0 %v5353_v17  ;;  %v1340_v8 = vld [vmem:[#allocation13 + $0x2b8] sm:$0xff]  ;;  %v5408_v17 = vcombine.low %v1327_v29, %v1331_v30 }
 0x44d   : > { %3080 = vmatprep.subr.bf16.mxu1 %v5355_v40  ;;  %v5410_v40 = vcombine.low %v1328_v31, %v1332_v33  ;;  %v5419_v42 = vcombine.high %v1336_v39, %v1340_v8 }
 0x44f   : > { %3040 = vmatpush1.bf16.msra.mxu0 %v5352_v45  ;;  %v1344_v45 = vld [vmem:[#allocation13 + $0x2d8] sm:$0xff] }
 0x450   : > { %3081 = vmatpush1.bf16.msra.mxu1 %v5354_v46  ;;  %3041 = vmatprep.subr.bf16.mxu0 %v5361_v47  ;;  %v1348_v46 = vld [vmem:[#allocation13 + $0x2f8] sm:$0xff]  ;;  %v5416_v47 = vcombine.low %v1335_v37, %v1339_v38 }
 0x451   : > { %3082 = vmatprep.subr.bf16.mxu1 %v5363_v48  ;;  %v5418_v48 = vcombine.low %v1336_v39, %v1340_v8  ;;  %v5427_v50 = vcombine.high %v1344_v45, %v1348_v46  ;;  %v7261_v8 = vsub.s32 0, %v7184_v5 }
 0x453   : > { %3042 = vmatpush1.bf16.msra.mxu0 %v5360_v26  ;;  %v1352_v26 = vld [vmem:[#allocation13 + $0x318] sm:$0xff] }
 0x454   : > { %3083 = vmatpush1.bf16.msra.mxu1 %v5362_v53  ;;  %3043 = vmatprep.subr.bf16.mxu0 %v5369_v54  ;;  %v1356_v53 = vld [vmem:[#allocation13 + $0x338] sm:$0xff]  ;;  %v5424_v54 = vcombine.low %v1343_v43, %v1347_v44 }
 0x455   : > { %3084 = vmatprep.subr.bf16.mxu1 %v5371_v55  ;;  %v5426_v55 = vcombine.low %v1344_v45, %v1348_v46  ;;  %v5435_v57 = vcombine.high %v1352_v26, %v1356_v53 }
 0x457   : > { %3044 = vmatpush1.bf16.msra.mxu0 %v5368_v60  ;;  %v1360_v60 = vld [vmem:[#allocation13 + $0x358] sm:$0xff] }
 0x458   : > { %3085 = vmatpush1.bf16.msra.mxu1 %v5370_v61  ;;  %3045 = vmatprep.subr.bf16.mxu0 %v5377_v62  ;;  %v1364_v61 = vld [vmem:[#allocation13 + $0x378] sm:$0xff]  ;;  %v5432_v62 = vcombine.low %v1351_v51, %v1355_v52 }
 0x459   : > { %3086 = vmatprep.subr.bf16.mxu1 %v5379_v63  ;;  %v5434_v63 = vcombine.low %v1352_v26, %v1356_v53  ;;  %v5443_v1 = vcombine.high %v1360_v60, %v1364_v61 }
 0x45b   : > { %3046 = vmatpush1.bf16.msra.mxu0 %v5376_v4  ;;  %v1368_v4 = vld [vmem:[#allocation13 + $0x398] sm:$0xff] }
 0x45c   : > { %3087 = vmatpush1.bf16.msra.mxu1 %v5378_v6  ;;  %3047 = vmatprep.subr.bf16.mxu0 %v5385_v7  ;;  %v1372_v6 = vld [vmem:[#allocation13 + $0x3b8] sm:$0xff]  ;;  %v5440_v7 = vcombine.low %v1359_v58, %v1363_v59 }
 0x45d   : > { %3088 = vmatprep.subr.bf16.mxu1 %v5387_v9  ;;  %v5442_v9 = vcombine.low %v1360_v60, %v1364_v61  ;;  %v5451_v11 = vcombine.high %v1368_v4, %v1372_v6 }
 0x45f   : > { %3048 = vmatpush1.bf16.msra.mxu0 %v5384_v15  ;;  %v1376_v15 = vld [vmem:[#allocation13 + $0x3d8] sm:$0xff] }
 0x460   : > { %3089 = vmatpush1.bf16.msra.mxu1 %v5386_v16  ;;  %3049 = vmatprep.subr.bf16.mxu0 %v5393_v18  ;;  %v1380_v16 = vld [vmem:[#allocation13 + $0x3f8] sm:$0xff]  ;;  %v5448_v18 = vcombine.low %v1367_v2, %v1371_v3 }
 0x461   : > { %3090 = vmatprep.subr.bf16.mxu1 %v5395_v19  ;;  %v5450_v19 = vcombine.low %v1368_v4, %v1372_v6  ;;  %v5459_v21 = vcombine.high %v1376_v15, %v1380_v16  ;;  %v5458_v23 = vcombine.low %v1376_v15, %v1380_v16 }
 0x463   : > { %3050 = vmatpush1.bf16.msra.mxu0 %v5392_v24 }
 0x464   : > { %3091 = vmatpush1.bf16.msra.mxu1 %v5394_v25  ;;  %3051 = vmatprep.subr.bf16.mxu0 %v5401_v27 }
 0x465   : > { %3092 = vmatprep.subr.bf16.mxu1 %v5403_v28 }
 0x467   : > { %3052 = vmatpush1.bf16.msra.mxu0 %v5400_v34 }
 0x468   : > { %3093 = vmatpush1.bf16.msra.mxu1 %v5402_v12  ;;  %3053 = vmatprep.subr.bf16.mxu0 %v5409_v35 }
 0x469   : > { %3094 = vmatprep.subr.bf16.mxu1 %v5411_v36 }
 0x46b   : > { %3054 = vmatpush1.bf16.msra.mxu0 %v5408_v17  ;;  %v7263_v17 = vld [vmem:[#allocation14] sm:$0xff] }
 0x46c   : > { %3095 = vmatpush1.bf16.msra.mxu1 %v5410_v40  ;;  %3055 = vmatprep.subr.bf16.mxu0 %v5417_v41  ;;  %v7266_v40 = vsub.s32 2, %v7184_v5  ;;  %v7269_v41 = vsub.s32 1, %v7184_v5  ;;  %v3122_v43 = vrot.slane %v7263_v17, %v7261_v8 }
 0x46d   : > { %3096 = vmatprep.subr.bf16.mxu1 %v5419_v42  ;;  %v7272_v42 = vsub.s32 3, %v7184_v5 }
 0x46e   : > { %v3130_v45 = vrot.slane %v7263_v17, %v7266_v40  ;;  %v3126_v46 = vrot.slane %v7263_v17, %v7269_v41 }
 0x46f   : > { %3056 = vmatpush1.bf16.msra.mxu0 %v5416_v47 }
 0x470   : > { %3097 = vmatpush1.bf16.msra.mxu1 %v5418_v48  ;;  %3057 = vmatprep.subr.bf16.mxu0 %v5425_v49 }
 0x471   : > { %3098 = vmatprep.subr.bf16.mxu1 %v5427_v50  ;;  %v3134_v50 = vrot.slane %v7263_v17, %v7272_v42 }
 0x473   : > { %3058 = vmatpush1.bf16.msra.mxu0 %v5424_v54 }
 0x474   : > { %3099 = vmatpush1.bf16.msra.mxu1 %v5426_v55  ;;  %3059 = vmatprep.subr.bf16.mxu0 %v5433_v56 }
 0x475   : > { %3100 = vmatprep.subr.bf16.mxu1 %v5435_v57 }
 0x477   : > { %3060 = vmatpush1.bf16.msra.mxu0 %v5432_v62 }
 0x478   : > { %3101 = vmatpush1.bf16.msra.mxu1 %v5434_v63  ;;  %3061 = vmatprep.subr.bf16.mxu0 %v5441_v0 }
 0x479   : > { %3102 = vmatprep.subr.bf16.mxu1 %v5443_v1 }
 0x47b   : > { %3062 = vmatpush1.bf16.msra.mxu0 %v5440_v7 }
 0x47c   : > { %3103 = vmatpush1.bf16.msra.mxu1 %v5442_v9  ;;  %3063 = vmatprep.subr.bf16.mxu0 %v5449_v10 }
 0x47d   : > { %3104 = vmatprep.subr.bf16.mxu1 %v5451_v11 }
 0x47f   : > { %3064 = vmatpush1.bf16.msra.mxu0 %v5448_v18 }
 0x480   : > { %3105 = vmatpush1.bf16.msra.mxu1 %v5450_v19  ;;  %3065 = vmatprep.subr.bf16.mxu0 %v5457_v20 }
 0x481   : > { %3106 = vmatprep.subr.bf16.mxu1 %v5459_v21 }
 0x483   : > { %3066 = vmatpush1.bf16.msra.mxu0 %v5456_v22 }
 0x484   : > { %3107 = vmatpush1.bf16.msra.mxu1 %v5458_v23 }
 0x486   : > { %3068 = vmatmul.mubr.bf16.vlgmr.msra.gmra.mrb[20].mxu0 %v7244_v32 }
 0x487   : > { %3109 = vmatmul.mubr.bf16.vlgmr.msra.gmra.mrb[20].mxu1 %v7244_v32 }
 0x499   : > { %v2183_v24 = vpop.f32.mrb[8].mxu0  ;;  %v2224_v25 = vpop.f32.mrb[8].mxu1 }
 0x49a   : > { %v2185_v27 = vpop.f32.mrb[9].mxu0  ;;  %v2226_v28 = vpop.f32.mrb[9].mxu1 }
 0x49b   : > { %v2187_v29 = vpop.f32.mrb[10].mxu0  ;;  %v2228_v30 = vpop.f32.mrb[10].mxu1 }
 0x49c   : > { %v2188_v31 = vpop.f32.mrb[11].mxu0  ;;  %v2229_v33 = vpop.f32.mrb[11].mxu1 }
 0x4d9   : > { %v7252_v34 = vpop.f32.mrb[12].mxu0  ;;  %v7254_v12 = vpop.f32.mrb[12].mxu1 }
 0x4da   : > { %v7256_v35 = vpop.f32.mrb[13].mxu0  ;;  %v7258_v36 = vpop.f32.mrb[13].mxu1 }
 0x4db   : > { %v2269_v37 = vpop.f32.mrb[14].mxu0  ;;  %v2310_v38 = vpop.f32.mrb[14].mxu1 }
 0x4dc   : > { %v2270_v39 = vpop.f32.mrb[15].mxu0  ;;  %v2311_v32 = vpop.f32.mrb[15].mxu1 }
 0x519   : > { %v2987_v44 = vpop.f32.mrb[16].mxu0 }
 0x51a   : > { %v2988_v47 = vadd.f32 %v2987_v44, %v2183_v24  ;;  %v3028_v48 = vpop.f32.mrb[16].mxu1  ;;  %v2989_v49 = vpop.f32.mrb[17].mxu0 }
 0x51b   : > { %v3029_v51 = vadd.f32 %v3028_v48, %v2224_v25  ;;  %v2990_v52 = vadd.f32 %v2989_v49, %v2185_v27  ;;  %v3030_v26 = vpop.f32.mrb[17].mxu1  ;;  %v2991_v53 = vpop.f32.mrb[18].mxu0 }
 0x51c   : > { %v3159_v54 = vadd.f32 %v3122_v43, %v2988_v47  ;;  %v3031_v55 = vadd.f32 %v3030_v26, %v2226_v28  ;;  %v3032_v56 = vpop.f32.mrb[18].mxu1  ;;  %v2992_v57 = vpop.f32.mrb[19].mxu0 }
 0x51d   : > { %v3161_v58 = vadd.f32 %v3130_v45, %v3029_v51  ;;  %v3160_v59 = vadd.f32 %v3126_v46, %v2990_v52  ;;  %v3033_v60 = vpop.f32.mrb[19].mxu1 }
 0x51e   : > { %v3169_v61 = vrot.slane %v3159_v54, 4  ;;  %v3162_v62 = vadd.f32 %v3134_v50, %v3031_v55 }
 0x51f   : > { %v3181_v63 = vrot.slane %v3161_v58, 4  ;;  %v3175_v0 = vrot.slane %v3160_v59, 4 }
 0x520   : > { %v3170_v1 = vadd.f32 %v3169_v61, %v3159_v54  ;;  %v3187_v2 = vrot.slane %v3162_v62, 4 }
 0x521   : > { %v3182_v3 = vadd.f32 %v3181_v63, %v3161_v58  ;;  %v3176_v4 = vadd.f32 %v3175_v0, %v3160_v59 }
 0x522   : > { %v3171_v6 = vrot.slane %v3170_v1, 2  ;;  %v3188_v7 = vadd.f32 %v3187_v2, %v3162_v62 }
 0x523   : > { %v3183_v9 = vrot.slane %v3182_v3, 2  ;;  %v3177_v10 = vrot.slane %v3176_v4, 2 }
 0x524   : > { %v3172_v11 = vadd.f32 %v3171_v6, %v3170_v1  ;;  %v3189_v13 = vrot.slane %v3188_v7, 2 }
 0x525   : > { %v3184_v14 = vadd.f32 %v3183_v9, %v3182_v3  ;;  %v3178_v15 = vadd.f32 %v3177_v10, %v3176_v4 }
 0x526   : > { %v3173_v16 = vrot.slane %v3172_v11, 1  ;;  %v3190_v18 = vadd.f32 %v3189_v13, %v3188_v7 }
 0x527   : > { %v3185_v19 = vrot.slane %v3184_v14, 1  ;;  %v3179_v20 = vrot.slane %v3178_v15, 1 }
 0x528   : > { %v3174_v21 = vadd.f32 %v3173_v16, %v3172_v11  ;;  %v3191_v22 = vrot.slane %v3190_v18, 1  ;;  %v7284_v16 = vld [vmem:[#allocation17] sm:$0xff] }
 0x529   : > { %v3186_v23 = vadd.f32 %v3185_v19, %v3184_v14  ;;  %v3180_v24 = vadd.f32 %v3179_v20, %v3178_v15  ;;  %v7282_v15 = vld [vmem:[#allocation16] sm:$0xff] }
 0x52a   : > { %v3218_v25 = vmul.f32 0.125, %v3174_v21  ;;  %v3192_v27 = vadd.f32 %v3191_v22, %v3190_v18  ;;  %v3326_v18 = vrot.slane %v7282_v15, %v7261_v8  ;;  %v3334_v20 = vrot.slane %v7282_v15, %v7266_v40 }
 0x52b   : > { %v3220_v28 = vmul.f32 0.125, %v3186_v23  ;;  %v3219_v29 = vmul.f32 0.125, %v3180_v24  ;;  %v3375_v23 = vrot.slane %v7284_v16, %v7261_v8  ;;  %v3330_v24 = vrot.slane %v7282_v15, %v7269_v41 }
 0x52c   : > { %v3226_v30 = vsub.f32 %v3159_v54, %v3218_v25  ;;  %v3221_v31 = vmul.f32 0.125, %v3192_v27  ;;  %v3387_v8 = vrot.slane %v7284_v16, %v7272_v42 }
 0x52d   : > { %v3228_v33 = vsub.f32 %v3161_v58, %v3220_v28  ;;  %v3227_v37 = vsub.f32 %v3160_v59, %v3219_v29  ;;  %v3383_v28 = vrot.slane %v7284_v16, %v7266_v40  ;;  %v3338_v29 = vrot.slane %v7282_v15, %v7272_v42 }
 0x52e   : > { %v3234_v38 = vmul.f32 %v3226_v30, %v3226_v30  ;;  %v3229_v39 = vsub.f32 %v3162_v62, %v3221_v31 }
 0x52f   : > { %v3236_v32 = vmul.f32 %v3228_v33, %v3228_v33  ;;  %v3235_v43 = vmul.f32 %v3227_v37, %v3227_v37 }
 0x530   : > { %v3242_v44 = vrot.slane %v3234_v38, 4  ;;  %v3237_v45 = vmul.f32 %v3229_v39, %v3229_v39 }
 0x531   : > { %v3254_v46 = vrot.slane %v3236_v32, 4  ;;  %v3248_v47 = vrot.slane %v3235_v43, 4 }
 0x532   : > { %v3243_v48 = vadd.f32 %v3242_v44, %v3234_v38  ;;  %v3260_v49 = vrot.slane %v3237_v45, 4 }
 0x533   : > { %v3255_v50 = vadd.f32 %v3254_v46, %v3236_v32  ;;  %v3249_v51 = vadd.f32 %v3248_v47, %v3235_v43 }
 0x534   : > { %v3244_v52 = vrot.slane %v3243_v48, 2  ;;  %v3261_v26 = vadd.f32 %v3260_v49, %v3237_v45 }
 0x535   : > { %v3256_v53 = vrot.slane %v3255_v50, 2  ;;  %v3250_v55 = vrot.slane %v3249_v51, 2 }
 0x536   : > { %v3245_v54 = vadd.f32 %v3244_v52, %v3243_v48  ;;  %v3262_v56 = vrot.slane %v3261_v26, 2 }
 0x537   : > { %v3257_v57 = vadd.f32 %v3256_v53, %v3255_v50  ;;  %v3251_v58 = vadd.f32 %v3250_v55, %v3249_v51  ;;  %v7312_v53 = vsub.s32 7, %v7184_v5 }
 0x538   : > { %v3246_v59 = vrot.slane %v3245_v54, 1  ;;  %v3263_v60 = vadd.f32 %v3262_v56, %v3261_v26 }
 0x539   : > { %v3258_v61 = vrot.slane %v3257_v57, 1  ;;  %v3252_v62 = vrot.slane %v3251_v58, 1 }
 0x53a   : > { %v3247_v63 = vadd.f32 %v3246_v59, %v3245_v54  ;;  %v3264_v0 = vrot.slane %v3263_v60, 1 }
 0x53b   : > { %v3259_v1 = vadd.f32 %v3258_v61, %v3257_v57  ;;  %v3253_v2 = vadd.f32 %v3252_v62, %v3251_v58 }
 0x53c   : > { %v3290_v3 = vmul.f32 0.125, %v3247_v63  ;;  %v3265_v4 = vadd.f32 %v3264_v0, %v3263_v60 }
 0x53d   : > { %v3292_v6 = vmul.f32 0.125, %v3259_v1  ;;  %v3291_v7 = vmul.f32 0.125, %v3253_v2 }
 0x53e   : > { %v3298_v9 = vadd.f32 1e-05, %v3290_v3  ;;  %v3293_v10 = vmul.f32 0.125, %v3265_v4 }
 0x53f   : > { %v3300_v11 = vadd.f32 1e-05, %v3292_v6  ;;  %v3299_v13 = vadd.f32 1e-05, %v3291_v7 }
 0x540   : > { %5881 = vrsqrt.f32 %v3298_v9  ;;  %v3301_v14 = vadd.f32 1e-05, %v3293_v10 }
 0x541   : > { %5883 = vrsqrt.f32 %v3300_v11 }
 0x542   : > { %5885 = vrsqrt.f32 %v3299_v13 }
 0x543   : > { %5887 = vrsqrt.f32 %v3301_v14 }
 0x54a   : > { %v5882_v19 = vpop.eup %5881 }
 0x54b   : > { %v5884_v21 = vpop.eup %5883  ;;  %v3314_v22 = vmul.f32 %v5882_v19, %v3226_v30  ;;  %v3379_v30 = vrot.slane %v7284_v16, %v7269_v41  ;;  %v7306_v41 = vsub.s32 6, %v7184_v5 }
 0x54c   : > { %v5886_v25 = vpop.eup %5885  ;;  %v3316_v27 = vmul.f32 %v5884_v21, %v3228_v33 }
 0x54d   : > { %v5888_v31 = vpop.eup %5887  ;;  %v3363_v38 = vmul.f32 %v3326_v18, %v3314_v22  ;;  %v3315_v32 = vmul.f32 %v5886_v25, %v3227_v37  ;;  %v7303_v37 = vsub.s32 4, %v7184_v5  ;;  %v3146_v56 = vrot.slane %v7263_v17, %v7306_v41 }
 0x54e   : > { %v3365_v43 = vmul.f32 %v3334_v20, %v3316_v27  ;;  %v3317_v44 = vmul.f32 %v5888_v31, %v3229_v39  ;;  %v7309_v39 = vsub.s32 5, %v7184_v5  ;;  %v3150_v5 = vrot.slane %v7263_v17, %v7312_v53 }
 0x54f   : > { %v3412_v45 = vadd.f32 %v3375_v23, %v3363_v38  ;;  %v3364_v46 = vmul.f32 %v3330_v24, %v3315_v32  ;;  %v3138_v55 = vrot.slane %v7263_v17, %v7303_v37 }
 0x550   : > { %v3414_v33 = vadd.f32 %v3383_v28, %v3365_v43  ;;  %v3366_v47 = vmul.f32 %v3338_v29, %v3317_v44  ;;  %v3142_v57 = vrot.slane %v7263_v17, %v7309_v39 }
 0x551   : > { %v3420_v48 = vmax.f32 %v3412_v45, 0.0  ;;  %v3413_v40 = vadd.f32 %v3379_v30, %v3364_v46 }
 0x552   : > { %v3422_v49 = vmax.f32 %v3414_v33, 0.0  ;;  %v3415_v50 = vadd.f32 %v3387_v8, %v3366_v47 }
 0x553   : > { %v3421_v51 = vmax.f32 %v3413_v40, 0.0 }
 0x554   : > { %v3423_v52 = vmax.f32 %v3415_v50, 0.0 }
 0x555   : > { %v5643_v26 = vpack.c.bf16 %v3421_v51, %v3420_v48 }
 0x556   : > { %v5644_v42 = vpack.c.bf16 %v3423_v52, %v3422_v49 }
 0x557   : > { %3460 = vst [vmem:[#allocation2] sm:$0xff] %v5643_v26 }
 0x558   : > { %3461 = vst [vmem:[#allocation2 + $0x8] sm:$0xff] %v5644_v42 }
 0x559   : > { %v3069_v54 = vpop.f32.mrb[20].mxu0 }
 0x55a   : > { %v3070_v58 = vadd.f32 %v3069_v54, %v7252_v34  ;;  %v3110_v59 = vpop.f32.mrb[20].mxu1  ;;  %v3071_v60 = vpop.f32.mrb[21].mxu0 }
 0x55b   : > { %v3111_v61 = vadd.f32 %v3110_v59, %v7254_v12  ;;  %v3072_v62 = vadd.f32 %v3071_v60, %v7256_v35  ;;  %v3112_v63 = vpop.f32.mrb[21].mxu1  ;;  %v3073_v0 = vpop.f32.mrb[22].mxu0 }
 0x55c   : > { %v3163_v1 = vadd.f32 %v3138_v55, %v3070_v58  ;;  %v3113_v2 = vadd.f32 %v3112_v63, %v7258_v36  ;;  %v3114_v3 = vpop.f32.mrb[22].mxu1  ;;  %v3074_v4 = vpop.f32.mrb[23].mxu0 }
 0x55d   : > { %v3165_v6 = vadd.f32 %v3146_v56, %v3111_v61  ;;  %v3164_v7 = vadd.f32 %v3142_v57, %v3072_v62  ;;  %v3115_v9 = vpop.f32.mrb[23].mxu1 }
 0x55e   : > { %v3193_v34 = vrot.slane %v3163_v1, 4  ;;  %v3166_v10 = vadd.f32 %v3150_v5, %v3113_v2 }
 0x55f   : > { %v3205_v11 = vrot.slane %v3165_v6, 4  ;;  %v3199_v13 = vrot.slane %v3164_v7, 4 }
 0x560   : > { %v3194_v14 = vadd.f32 %v3193_v34, %v3163_v1  ;;  %v3211_v17 = vrot.slane %v3166_v10, 4 }
 0x561   : > { %v3206_v18 = vadd.f32 %v3205_v11, %v3165_v6  ;;  %v3200_v12 = vadd.f32 %v3199_v13, %v3164_v7 }
 0x562   : > { %v3195_v19 = vrot.slane %v3194_v14, 2  ;;  %v3212_v35 = vadd.f32 %v3211_v17, %v3166_v10 }
 0x563   : > { %v3207_v20 = vrot.slane %v3206_v18, 2  ;;  %v3201_v21 = vrot.slane %v3200_v12, 2 }
 0x564   : > { %v3196_v22 = vadd.f32 %v3195_v19, %v3194_v14  ;;  %v3213_v23 = vrot.slane %v3212_v35, 2 }
 0x565   : > { %v3208_v36 = vadd.f32 %v3207_v20, %v3206_v18  ;;  %v3202_v24 = vadd.f32 %v3201_v21, %v3200_v12  ;;  %v3342_v21 = vrot.slane %v7282_v15, %v7303_v37 }
 0x566   : > { %v3197_v25 = vrot.slane %v3196_v22, 1  ;;  %v3214_v27 = vadd.f32 %v3213_v23, %v3212_v35  ;;  %v3350_v23 = vrot.slane %v7282_v15, %v7306_v41 }
 0x567   : > { %v3209_v28 = vrot.slane %v3208_v36, 1  ;;  %v3203_v29 = vrot.slane %v3202_v24, 1 }
 0x568   : > { %v3198_v31 = vadd.f32 %v3197_v25, %v3196_v22  ;;  %v3215_v38 = vrot.slane %v3214_v27, 1  ;;  %v3391_v25 = vrot.slane %v7284_v16, %v7303_v37  ;;  %v3403_v37 = vrot.slane %v7284_v16, %v7312_v53 }
 0x569   : > { %v3210_v32 = vadd.f32 %v3209_v28, %v3208_v36  ;;  %v3204_v30 = vadd.f32 %v3203_v29, %v3202_v24 }
 0x56a   : > { %v3222_v43 = vmul.f32 0.125, %v3198_v31  ;;  %v3216_v44 = vadd.f32 %v3215_v38, %v3214_v27  ;;  %v3346_v27 = vrot.slane %v7282_v15, %v7309_v39  ;;  %v3399_v31 = vrot.slane %v7284_v16, %v7306_v41 }
 0x56b   : > { %v3224_v8 = vmul.f32 0.125, %v3210_v32  ;;  %v3223_v45 = vmul.f32 0.125, %v3204_v30  ;;  %v3354_v38 = vrot.slane %v7282_v15, %v7312_v53 }
 0x56c   : > { %v3230_v46 = vsub.f32 %v3163_v1, %v3222_v43  ;;  %v3225_v33 = vmul.f32 0.125, %v3216_v44  ;;  %v3395_v44 = vrot.slane %v7284_v16, %v7309_v39 }
 0x56d   : > { %v3232_v47 = vsub.f32 %v3165_v6, %v3224_v8  ;;  %v3231_v48 = vsub.f32 %v3164_v7, %v3223_v45 }
 0x56e   : > { %v3238_v40 = vmul.f32 %v3230_v46, %v3230_v46  ;;  %v3233_v49 = vsub.f32 %v3166_v10, %v3225_v33 }
 0x56f   : > { %v3240_v50 = vmul.f32 %v3232_v47, %v3232_v47  ;;  %v3239_v51 = vmul.f32 %v3231_v48, %v3231_v48 }
 0x570   : > { %v3266_v52 = vrot.slane %v3238_v40, 4  ;;  %v3241_v26 = vmul.f32 %v3233_v49, %v3233_v49 }
 0x571   : > { %v3278_v42 = vrot.slane %v3240_v50, 4  ;;  %v3272_v55 = vrot.slane %v3239_v51, 4 }
 0x572   : > { %v3267_v54 = vadd.f32 %v3266_v52, %v3238_v40  ;;  %v3284_v56 = vrot.slane %v3241_v26, 4 }
 0x573   : > { %v3279_v57 = vadd.f32 %v3278_v42, %v3240_v50  ;;  %v3273_v58 = vadd.f32 %v3272_v55, %v3239_v51 }
 0x574   : > { %v3268_v59 = vrot.slane %v3267_v54, 2  ;;  %v3285_v60 = vadd.f32 %v3284_v56, %v3241_v26 }
 0x575   : > { %v3280_v5 = vrot.slane %v3279_v57, 2  ;;  %v3274_v61 = vrot.slane %v3273_v58, 2 }
 0x576   : > { %v3269_v62 = vadd.f32 %v3268_v59, %v3267_v54  ;;  %v3286_v63 = vrot.slane %v3285_v60, 2 }
 0x577   : > { %v3281_v0 = vadd.f32 %v3280_v5, %v3279_v57  ;;  %v3275_v1 = vadd.f32 %v3274_v61, %v3273_v58 }
 0x578   : > { %v3270_v2 = vrot.slane %v3269_v62, 1  ;;  %v3287_v3 = vadd.f32 %v3286_v63, %v3285_v60 }
 0x579   : > { %v3282_v4 = vrot.slane %v3281_v0, 1  ;;  %v3276_v6 = vrot.slane %v3275_v1, 1 }
 0x57a   : > { %v3271_v7 = vadd.f32 %v3270_v2, %v3269_v62  ;;  %v3288_v9 = vrot.slane %v3287_v3, 1 }
 0x57b   : > { %v3283_v34 = vadd.f32 %v3282_v4, %v3281_v0  ;;  %v3277_v10 = vadd.f32 %v3276_v6, %v3275_v1 }
 0x57c   : > { %v3294_v11 = vmul.f32 0.125, %v3271_v7  ;;  %v3289_v13 = vadd.f32 %v3288_v9, %v3287_v3 }
 0x57d   : > { %v3296_v14 = vmul.f32 0.125, %v3283_v34  ;;  %v3295_v17 = vmul.f32 0.125, %v3277_v10 }
 0x57e   : > { %v3302_v18 = vadd.f32 1e-05, %v3294_v11  ;;  %v3297_v12 = vmul.f32 0.125, %v3289_v13 }
 0x57f   : > { %v3304_v19 = vadd.f32 1e-05, %v3296_v14  ;;  %v3303_v35 = vadd.f32 1e-05, %v3295_v17 }
 0x580   : > { %5889 = vrsqrt.f32 %v3302_v18  ;;  %v3305_v20 = vadd.f32 1e-05, %v3297_v12 }
 0x581   : > { %5891 = vrsqrt.f32 %v3304_v19 }
 0x582   : > { %5893 = vrsqrt.f32 %v3303_v35 }
 0x583   : > { %5895 = vrsqrt.f32 %v3305_v20 }
 0x58a   : > { %v5890_v22 = vpop.eup %5889 }
 0x58b   : > { %v5892_v36 = vpop.eup %5891  ;;  %v3318_v24 = vmul.f32 %v5890_v22, %v3230_v46 }
 0x58c   : > { %v5894_v28 = vpop.eup %5893  ;;  %v3320_v29 = vmul.f32 %v5892_v36, %v3232_v47 }
 0x58d   : > { %v5896_v32 = vpop.eup %5895  ;;  %v3367_v30 = vmul.f32 %v3342_v21, %v3318_v24  ;;  %v3319_v43 = vmul.f32 %v5894_v28, %v3231_v48 }
 0x58e   : > { %v3369_v8 = vmul.f32 %v3350_v23, %v3320_v29  ;;  %v3321_v45 = vmul.f32 %v5896_v32, %v3233_v49 }
 0x58f   : > { %v3416_v46 = vadd.f32 %v3391_v25, %v3367_v30  ;;  %v3368_v33 = vmul.f32 %v3346_v27, %v3319_v43 }
 0x590   : > { %v3418_v47 = vadd.f32 %v3399_v31, %v3369_v8  ;;  %v3370_v40 = vmul.f32 %v3354_v38, %v3321_v45 }
 0x591   : > { %v3424_v50 = vmax.f32 %v3416_v46, 0.0  ;;  %v3417_v41 = vadd.f32 %v3395_v44, %v3368_v33 }
 0x592   : > { %v3426_v51 = vmax.f32 %v3418_v47, 0.0  ;;  %v3419_v52 = vadd.f32 %v3403_v37, %v3370_v40 }
 0x593   : > { %v3425_v15 = vmax.f32 %v3417_v41, 0.0 }
 0x594   : > { %v3427_v26 = vmax.f32 %v3419_v52, 0.0 }
 0x595   : > { %v5645_v42 = vpack.c.bf16 %v3425_v15, %v3424_v50 }
 0x596   : > { %v5646_v48 = vpack.c.bf16 %v3427_v26, %v3426_v51 }
 0x597   : > { %3462 = vst [vmem:[#allocation2 + $0x10] sm:$0xff] %v5645_v42 }
 0x598   : > { %3463 = vst [vmem:[#allocation2 + $0x18] sm:$0xff] %v5646_v48 }
 0x599 PF: > { %v5897_v16 = vld [vmem:[%s7144_s26 + $0x104] ss:$8 sps:$4 sm:$0xff]   ;;  %v5899_v39 = vld [vmem:[%s7144_s26 + $0x100] ss:$8 sps:$4 sm:$0xff]   ;;  %v5900_v53 = vld [vmem:[%s7144_s26 + $0x114] ss:$8 sps:$4 sm:$0xff]  }
 0x59a   : > { %4333 = vmatprep.subr.bf16.mxu0 %v5897_v16  ;;  %v5902_v49 = vld [vmem:[%s7144_s26 + $0x110] ss:$8 sps:$4 sm:$0xff]   ;;  %v5903_v55 = vld [vmem:[%s7144_s26 + $0x124] ss:$8 sps:$4 sm:$0xff]   ;;  %v5905_v54 = vld [vmem:[%s7144_s26 + $0x120] ss:$8 sps:$4 sm:$0xff]  }
 0x59b   : > { %4334 = vmatpush1.bf16.msra.mxu0 %v5899_v39  ;;  %v5906_v56 = vld [vmem:[%s7144_s26 + $0x134] ss:$8 sps:$4 sm:$0xff]   ;;  %v5908_v57 = vld [vmem:[%s7144_s26 + $0x130] ss:$8 sps:$4 sm:$0xff]   ;;  %v5909_v58 = vld [vmem:[%s7144_s26 + $0x144] ss:$8 sps:$4 sm:$0xff]  }
 0x59c   : > { %4335 = vmatprep.subr.bf16.mxu0 %v5900_v53  ;;  %v5911_v59 = vld [vmem:[%s7144_s26 + $0x140] ss:$8 sps:$4 sm:$0xff]   ;;  %v5912_v60 = vld [vmem:[%s7144_s26 + $0x154] ss:$8 sps:$4 sm:$0xff]   ;;  %v5914_v5 = vld [vmem:[%s7144_s26 + $0x150] ss:$8 sps:$4 sm:$0xff]  }
 0x59d   : > { %v5915_v61 = vld [vmem:[%s7144_s26 + $0x164] ss:$8 sps:$4 sm:$0xff]   ;;  %v5917_v0 = vld [vmem:[%s7144_s26 + $0x160] ss:$8 sps:$4 sm:$0xff]   ;;  %v5918_v1 = vld [vmem:[%s7144_s26 + $0x174] ss:$8 sps:$4 sm:$0xff]  }
 0x59e   : > { %v7355_v62 = vld [vmem:[#allocation2 + $0x8] sm:$0xff]  ;;  %v5920_v2 = vld [vmem:[%s7144_s26 + $0x170] ss:$8 sps:$4 sm:$0xff]   ;;  %v5924_v6 = vld [vmem:[%s7144_s26 + $0x194] ss:$8 sps:$4 sm:$0xff]   ;;  %vm4697_vm8 = vcmask 261120  }
 0x59f   : > { %4336 = vmatpush1.bf16.msra.mxu0 %v5902_v49  ;;  %v5469_v63 = vcombine.high %v7355_v62, %v7355_v62  ;;  %v5921_v3 = vld [vmem:[%s7144_s26 + $0x184] ss:$8 sps:$4 sm:$0xff]   ;;  %v5923_v4 = vld [vmem:[%s7144_s26 + $0x180] ss:$8 sps:$4 sm:$0xff]   ;;  %v5926_v7 = vld [vmem:[%s7144_s26 + $0x190] ss:$8 sps:$4 sm:$0xff]   ;;  %v5468_v44 = vcombine.low %v7355_v62, %v7355_v62 }
 0x5a0   : > { %4337 = vmatprep.subr.bf16.mxu0 %v5903_v55  ;;  %v5927_v9 = vld [vmem:[%s7144_s26 + $0x1a4] ss:$8 sps:$4 sm:$0xff]   ;;  %v5929_v34 = vld [vmem:[%s7144_s26 + $0x1a0] ss:$8 sps:$4 sm:$0xff]   ;;  %v5930_v10 = vld [vmem:[%s7144_s26 + $0x1b4] ss:$8 sps:$4 sm:$0xff]  }
 0x5a1   : > { %4365 = vmatprep.mubr.bf16.mxu0 %v5469_v63  ;;  %v5992_v11 = vld [vmem:[%s7144_s26 + $0x4] ss:$8 sps:$4 sm:$0xff]   ;;  %v5994_v13 = vld [vmem:[%s7144_s26] ss:$8 sps:$4 sm:$0xff]   ;;  %v5932_v14 = vld [vmem:[%s7144_s26 + $0x1b0] ss:$8 sps:$4 sm:$0xff]  }
 0x5a2   : > { %v5933_v17 = vld [vmem:[%s7144_s26 + $0x1c4] ss:$8 sps:$4 sm:$0xff]   ;;  %4292 = vmatprep.subr.bf16.mxu1 %v5992_v11  ;;  %v5998_v18 = vld [vmem:[%s7144_s26 + $0x14] ss:$8 sps:$4 sm:$0xff]   ;;  %v6000_v12 = vld [vmem:[%s7144_s26 + $0x10] ss:$8 sps:$4 sm:$0xff]  }
 0x5a3   : > { %4338 = vmatpush1.bf16.msra.mxu0 %v5905_v54  ;;  %4293 = vmatpush1.bf16.msra.mxu1 %v5994_v13  ;;  %v5935_v19 = vld [vmem:[%s7144_s26 + $0x1c0] ss:$8 sps:$4 sm:$0xff]   ;;  %v5936_v35 = vld [vmem:[%s7144_s26 + $0x1d4] ss:$8 sps:$4 sm:$0xff]   ;;  %v6006_v20 = vld [vmem:[%s7144_s26 + $0x24] ss:$8 sps:$4 sm:$0xff]  }
 0x5a4   : > { %4339 = vmatprep.subr.bf16.mxu0 %v5906_v56  ;;  %4294 = vmatprep.subr.bf16.mxu1 %v5998_v18  ;;  %v6008_v21 = vld [vmem:[%s7144_s26 + $0x20] ss:$8 sps:$4 sm:$0xff]   ;;  %v6012_v22 = vld [vmem:[%s7144_s26 + $0x34] ss:$8 sps:$4 sm:$0xff]   ;;  %v5938_v23 = vld [vmem:[%s7144_s26 + $0x1d0] ss:$8 sps:$4 sm:$0xff]  }
 0x5a5   : > { %v5939_v36 = vld [vmem:[%s7144_s26 + $0x1e4] ss:$8 sps:$4 sm:$0xff]   ;;  %v6014_v24 = vld [vmem:[%s7144_s26 + $0x30] ss:$8 sps:$4 sm:$0xff]   ;;  %v5941_v27 = vld [vmem:[%s7144_s26 + $0x1e0] ss:$8 sps:$4 sm:$0xff]  }
 0x5a6   : > { %v6018_v25 = vld [vmem:[%s7144_s26 + $0x44] ss:$8 sps:$4 sm:$0xff]   ;;  %v5942_v28 = vld [vmem:[%s7144_s26 + $0x1f4] ss:$8 sps:$4 sm:$0xff]   ;;  %v6020_v29 = vld [vmem:[%s7144_s26 + $0x40] ss:$8 sps:$4 sm:$0xff]  }
 0x5a7   : > { %4340 = vmatpush1.bf16.msra.mxu0 %v5908_v57  ;;  %4295 = vmatpush1.bf16.msra.mxu1 %v6000_v12  ;;  %v6024_v31 = vld [vmem:[%s7144_s26 + $0x54] ss:$8 sps:$4 sm:$0xff]   ;;  %v5944_v38 = vld [vmem:[%s7144_s26 + $0x1f0] ss:$8 sps:$4 sm:$0xff]   ;;  %v5949_v32 = vld [vmem:[%s7144_s26 + $0x204] ss:$8 sps:$4 sm:$0xff]  }
 0x5a8   : > { %4341 = vmatprep.subr.bf16.mxu0 %v5909_v58  ;;  %4296 = vmatprep.subr.bf16.mxu1 %v6006_v20  ;;  %v7390_v30 = vld [vmem:[#allocation2 + $0x10] sm:$0xff]  ;;  %v6026_v43 = vld [vmem:[%s7144_s26 + $0x50] ss:$8 sps:$4 sm:$0xff]   ;;  %v5952_v46 = vld [vmem:[%s7144_s26 + $0x214] ss:$8 sps:$4 sm:$0xff]   ;;  %s7693_s14 = sld [smem:[#allocation36_spill]] }
 0x5a9   : > { %v6030_v8 = vld [vmem:[%s7144_s26 + $0x64] ss:$8 sps:$4 sm:$0xff]   ;;  %v5947_v45 = vld [vmem:[%s7144_s26 + $0x200] ss:$8 sps:$4 sm:$0xff]   ;;  %v5471_v37 = vcombine.high %v7390_v30, %v7390_v30  ;;  %v6036_v47 = vld [vmem:[%s7144_s26 + $0x74] ss:$8 sps:$4 sm:$0xff]  }
 0x5aa   : > { %v6032_v33 = vld [vmem:[%s7144_s26 + $0x60] ss:$8 sps:$4 sm:$0xff]   ;;  %v5950_v40 = vld [vmem:[%s7144_s26 + $0x210] ss:$8 sps:$4 sm:$0xff]   ;;  %v5955_v50 = vld [vmem:[%s7144_s26 + $0x224] ss:$8 sps:$4 sm:$0xff]  }
 0x5ab   : > { %4342 = vmatpush1.bf16.msra.mxu0 %v5911_v59  ;;  %4297 = vmatpush1.bf16.msra.mxu1 %v6008_v21  ;;  %v6038_v41 = vld [vmem:[%s7144_s26 + $0x70] ss:$8 sps:$4 sm:$0xff]   ;;  %v6042_v51 = vld [vmem:[%s7144_s26 + $0x84] ss:$8 sps:$4 sm:$0xff]   ;;  %v5953_v52 = vld [vmem:[%s7144_s26 + $0x220] ss:$8 sps:$4 sm:$0xff]  }
 0x5ac   : > { %4343 = vmatprep.subr.bf16.mxu0 %v5912_v60  ;;  %4298 = vmatprep.subr.bf16.mxu1 %v6012_v22  ;;  %v5958_v15 = vld [vmem:[%s7144_s26 + $0x234] ss:$8 sps:$4 sm:$0xff]   ;;  %v6044_v26 = vld [vmem:[%s7144_s26 + $0x80] ss:$8 sps:$4 sm:$0xff]   ;;  %v5956_v48 = vld [vmem:[%s7144_s26 + $0x230] ss:$8 sps:$4 sm:$0xff]  }
 0x5ad   : > { %v6048_v42 = vld [vmem:[%s7144_s26 + $0x94] ss:$8 sps:$4 sm:$0xff]   ;;  %v5961_v16 = vld [vmem:[%s7144_s26 + $0x244] ss:$8 sps:$4 sm:$0xff]   ;;  %v6050_v39 = vld [vmem:[%s7144_s26 + $0x90] ss:$8 sps:$4 sm:$0xff]  }
 0x5ae   : > { %v6054_v53 = vld [vmem:[%s7144_s26 + $0xa4] ss:$8 sps:$4 sm:$0xff]   ;;  %v5959_v49 = vld [vmem:[%s7144_s26 + $0x240] ss:$8 sps:$4 sm:$0xff]   ;;  %v5964_v55 = vld [vmem:[%s7144_s26 + $0x254] ss:$8 sps:$4 sm:$0xff]  }
 0x5af   : > { %4344 = vmatpush1.bf16.msra.mxu0 %v5914_v5  ;;  %4299 = vmatpush1.bf16.msra.mxu1 %v6014_v24  ;;  %v6056_v54 = vld [vmem:[%s7144_s26 + $0xa0] ss:$8 sps:$4 sm:$0xff]   ;;  %v6060_v56 = vld [vmem:[%s7144_s26 + $0xb4] ss:$8 sps:$4 sm:$0xff]   ;;  %v5962_v57 = vld [vmem:[%s7144_s26 + $0x250] ss:$8 sps:$4 sm:$0xff]  }
 0x5b0   : > { %4345 = vmatprep.subr.bf16.mxu0 %v5915_v61  ;;  %4300 = vmatprep.subr.bf16.mxu1 %v6018_v25  ;;  %v5967_v58 = vld [vmem:[%s7144_s26 + $0x264] ss:$8 sps:$4 sm:$0xff]   ;;  %v3480_v59 = vld [vmem:[#allocation2] sm:$0xff]  ;;  %v5965_v61 = vld [vmem:[%s7144_s26 + $0x260] ss:$8 sps:$4 sm:$0xff]   ;;  %p5634_p2 = scmp.ne.s32.totalorder %s7693_s14, 3 }
 0x5b1   : > { %v6062_v60 = vld [vmem:[%s7144_s26 + $0xb0] ss:$8 sps:$4 sm:$0xff]   ;;  %v5467_v5 = vcombine.high %v3480_v59, %v3480_v59  ;;  %v5970_v62 = vld [vmem:[%s7144_s26 + $0x274] ss:$8 sps:$4 sm:$0xff]   ;;  %v6066_v63 = vld [vmem:[%s7144_s26 + $0xc4] ss:$8 sps:$4 sm:$0xff]   ;;  %v5466_v12 = vcombine.low %v3480_v59, %v3480_v59 }
 0x5b2   : > { %v5974_v11 = vld [vmem:[%s7144_s26 + $0x290] ss:$8 sps:$4 sm:$0xff]   ;;  %v5979_v13 = vld [vmem:[%s7144_s26 + $0x2a4] ss:$8 sps:$4 sm:$0xff]   ;;  %v5982_v18 = vld [vmem:[%s7144_s26 + $0x2b4] ss:$8 sps:$4 sm:$0xff]  }
 0x5b3   : > { %4346 = vmatpush1.bf16.msra.mxu0 %v5917_v0  ;;  %4301 = vmatpush1.bf16.msra.mxu1 %v6020_v29  ;;  %v6068_v0 = vld [vmem:[%s7144_s26 + $0xc0] ss:$8 sps:$4 sm:$0xff]   ;;  %v5988_v21 = vld [vmem:[%s7144_s26 + $0x2d4] ss:$8 sps:$4 sm:$0xff]   ;;  %v5986_v22 = vld [vmem:[%s7144_s26 + $0x2d0] ss:$8 sps:$4 sm:$0xff]   ;;  %v5470_v29 = vcombine.low %v7390_v30, %v7390_v30 }
 0x5b4   : > { %4347 = vmatprep.subr.bf16.mxu0 %v5918_v1  ;;  %4302 = vmatprep.subr.bf16.mxu1 %v6024_v31  ;;  %v6072_v1 = vld [vmem:[%s7144_s26 + $0xd4] ss:$8 sps:$4 sm:$0xff]   ;;  %v5983_v20 = vld [vmem:[%s7144_s26 + $0x2c0] ss:$8 sps:$4 sm:$0xff]   ;;  %v5995_v25 = vld [vmem:[%s7144_s26 + $0x2f0] ss:$8 sps:$4 sm:$0xff]  }
 0x5b5   : > { %4324 = vmatprep.mubr.bf16.mxu1 %v5467_v5  ;;  %v5997_v24 = vld [vmem:[%s7144_s26 + $0x2f4] ss:$8 sps:$4 sm:$0xff]   ;;  %v6003_v31 = vld [vmem:[%s7144_s26 + $0x300] ss:$8 sps:$4 sm:$0xff]  }
 0x5b6   : > { %v6015_v30 = vld [vmem:[%s7144_s26 + $0x320] ss:$8 sps:$4 sm:$0xff]   ;;  %v6094_v59 = vld [vmem:[%s7144_s26 + $0x3f4] ss:$8 sps:$4 sm:$0xff]  }
 0x5b7   : > { %4348 = vmatpush1.bf16.msra.mxu0 %v5920_v2  ;;  %4303 = vmatpush1.bf16.msra.mxu1 %v6026_v43  ;;  %v5968_v2 = vld [vmem:[%s7144_s26 + $0x270] ss:$8 sps:$4 sm:$0xff]  }
 0x5b8   : > { %4349 = vmatprep.subr.bf16.mxu0 %v5921_v3  ;;  %4304 = vmatprep.subr.bf16.mxu1 %v6030_v8  ;;  %v5973_v3 = vld [vmem:[%s7144_s26 + $0x284] ss:$8 sps:$4 sm:$0xff]   ;;  %v6009_v43 = vld [vmem:[%s7144_s26 + $0x310] ss:$8 sps:$4 sm:$0xff]   ;;  %v6023_v8 = vld [vmem:[%s7144_s26 + $0x334] ss:$8 sps:$4 sm:$0xff]  }
 0x5bb   : > { %4350 = vmatpush1.bf16.msra.mxu0 %v5923_v4  ;;  %4305 = vmatpush1.bf16.msra.mxu1 %v6032_v33  ;;  %v6074_v4 = vld [vmem:[%s7144_s26 + $0xd0] ss:$8 sps:$4 sm:$0xff]   ;;  %v6035_v33 = vld [vmem:[%s7144_s26 + $0x354] ss:$8 sps:$4 sm:$0xff]  }
 0x5bc   : > { %4351 = vmatprep.subr.bf16.mxu0 %v5924_v6  ;;  %4306 = vmatprep.subr.bf16.mxu1 %v6036_v47  ;;  %v6078_v6 = vld [vmem:[%s7144_s26 + $0xe4] ss:$8 sps:$4 sm:$0xff]   ;;  %v6033_v47 = vld [vmem:[%s7144_s26 + $0x350] ss:$8 sps:$4 sm:$0xff]  }
 0x5bf   : > { %4352 = vmatpush1.bf16.msra.mxu0 %v5926_v7  ;;  %4307 = vmatpush1.bf16.msra.mxu1 %v6038_v41  ;;  %v5971_v7 = vld [vmem:[%s7144_s26 + $0x280] ss:$8 sps:$4 sm:$0xff]   ;;  %v6047_v41 = vld [vmem:[%s7144_s26 + $0x374] ss:$8 sps:$4 sm:$0xff]  }
 0x5c0   : > { %4353 = vmatprep.subr.bf16.mxu0 %v5927_v9  ;;  %4308 = vmatprep.subr.bf16.mxu1 %v6042_v51  ;;  %v5976_v9 = vld [vmem:[%s7144_s26 + $0x294] ss:$8 sps:$4 sm:$0xff]   ;;  %v6045_v51 = vld [vmem:[%s7144_s26 + $0x370] ss:$8 sps:$4 sm:$0xff]  }
 0x5c3   : > { %4354 = vmatpush1.bf16.msra.mxu0 %v5929_v34  ;;  %4309 = vmatpush1.bf16.msra.mxu1 %v6044_v26  ;;  %v6080_v34 = vld [vmem:[%s7144_s26 + $0xe0] ss:$8 sps:$4 sm:$0xff]   ;;  %v6059_v26 = vld [vmem:[%s7144_s26 + $0x394] ss:$8 sps:$4 sm:$0xff]  }
 0x5c4   : > { %4355 = vmatprep.subr.bf16.mxu0 %v5930_v10  ;;  %4310 = vmatprep.subr.bf16.mxu1 %v6048_v42  ;;  %v6084_v10 = vld [vmem:[%s7144_s26 + $0xf4] ss:$8 sps:$4 sm:$0xff]   ;;  %v6057_v42 = vld [vmem:[%s7144_s26 + $0x390] ss:$8 sps:$4 sm:$0xff]  }
 0x5c7   : > { %4356 = vmatpush1.bf16.msra.mxu0 %v5932_v14  ;;  %4311 = vmatpush1.bf16.msra.mxu1 %v6050_v39  ;;  %v6086_v14 = vld [vmem:[%s7144_s26 + $0xf0] ss:$8 sps:$4 sm:$0xff]   ;;  %v6071_v39 = vld [vmem:[%s7144_s26 + $0x3b4] ss:$8 sps:$4 sm:$0xff]  }
 0x5c8   : > { %4357 = vmatprep.subr.bf16.mxu0 %v5933_v17  ;;  %4312 = vmatprep.subr.bf16.mxu1 %v6054_v53  ;;  %v5977_v17 = vld [vmem:[%s7144_s26 + $0x2a0] ss:$8 sps:$4 sm:$0xff]   ;;  %v6069_v53 = vld [vmem:[%s7144_s26 + $0x3b0] ss:$8 sps:$4 sm:$0xff]  }
 0x5cb   : > { %4358 = vmatpush1.bf16.msra.mxu0 %v5935_v19  ;;  %4313 = vmatpush1.bf16.msra.mxu1 %v6056_v54  ;;  %v5980_v19 = vld [vmem:[%s7144_s26 + $0x2b0] ss:$8 sps:$4 sm:$0xff]   ;;  %v6083_v54 = vld [vmem:[%s7144_s26 + $0x3d4] ss:$8 sps:$4 sm:$0xff]  }
 0x5cc   : > { %4359 = vmatprep.subr.bf16.mxu0 %v5936_v35  ;;  %4314 = vmatprep.subr.bf16.mxu1 %v6060_v56  ;;  %v5985_v35 = vld [vmem:[%s7144_s26 + $0x2c4] ss:$8 sps:$4 sm:$0xff]   ;;  %v6081_v56 = vld [vmem:[%s7144_s26 + $0x3d0] ss:$8 sps:$4 sm:$0xff]  }
 0x5cf   : > { %4360 = vmatpush1.bf16.msra.mxu0 %v5938_v23  ;;  %4315 = vmatpush1.bf16.msra.mxu1 %v6062_v60  ;;  %v5991_v23 = vld [vmem:[%s7144_s26 + $0x2e4] ss:$8 sps:$4 sm:$0xff]   ;;  %v6092_v60 = vld [vmem:[%s7144_s26 + $0x3f0] ss:$8 sps:$4 sm:$0xff]  }
 0x5d0   : > { %4361 = vmatprep.subr.bf16.mxu0 %v5939_v36  ;;  %4316 = vmatprep.subr.bf16.mxu1 %v6066_v63  ;;  %v5989_v36 = vld [vmem:[%s7144_s26 + $0x2e0] ss:$8 sps:$4 sm:$0xff]  }
 0x5d1   : > { %v6099_v63 = vld [vmem:[%s7167_s27 + $0x48] sm:$0xff]  }
 0x5d3   : > { %4362 = vmatpush1.bf16.msra.mxu0 %v5941_v27  ;;  %4317 = vmatpush1.bf16.msra.mxu1 %v6068_v0  ;;  %v6005_v27 = vld [vmem:[%s7144_s26 + $0x304] ss:$8 sps:$4 sm:$0xff]  }
 0x5d4   : > { %4363 = vmatprep.subr.bf16.mxu0 %v5942_v28  ;;  %4318 = vmatprep.subr.bf16.mxu1 %v6072_v1  ;;  %v7449_v28 = vld [vmem:[#allocation2 + $0x18] sm:$0xff]  ;;  %v6100_v0 = vld [vmem:[%s7167_s27 + $0x8] sm:$0xff]   ;;  %v6101_v1 = vld [vmem:[%s7167_s27 + $0x50] sm:$0xff]  }
 0x5d5   : > { %v5472_v5 = vcombine.low %v7449_v28, %v7449_v28 }
 0x5d7   : > { %4364 = vmatpush1.bf16.msra.mxu0 %v5944_v38  ;;  %4319 = vmatpush1.bf16.msra.mxu1 %v6074_v4  ;;  %v5473_v38 = vcombine.high %v7449_v28, %v7449_v28  ;;  %v6104_v4 = vld [vmem:[%s7167_s27 + $0x18] sm:$0xff]  }
 0x5d8   : > { %4374 = vmatprep.subr.bf16.mxu0 %v5949_v32  ;;  %4320 = vmatprep.subr.bf16.mxu1 %v6078_v6  ;;  %v6011_v32 = vld [vmem:[%s7144_s26 + $0x314] ss:$8 sps:$4 sm:$0xff]  }
 0x5d9   : > { %v6105_v6 = vld [vmem:[%s7167_s27 + $0x60] sm:$0xff]  }
 0x5da   : > { %4366 = vmatmul.mubr.bf16.vlgmr.msra.gmra.mrb[0].mxu0 %v5468_v44  ;;  %v6017_v44 = vld [vmem:[%s7144_s26 + $0x324] ss:$8 sps:$4 sm:$0xff]  }
 0x5db   : > { %4375 = vmatpush1.bf16.msra.mxu0 %v5947_v45  ;;  %4406 = vmatprep.mubr.bf16.mxu0 %v5471_v37  ;;  %v6021_v45 = vld [vmem:[%s7144_s26 + $0x330] ss:$8 sps:$4 sm:$0xff]   ;;  %v6029_v37 = vld [vmem:[%s7144_s26 + $0x344] ss:$8 sps:$4 sm:$0xff]  }
 0x5dc   : > { %4376 = vmatprep.subr.bf16.mxu0 %v5952_v46  ;;  %4321 = vmatpush1.bf16.msra.mxu1 %v6080_v34  ;;  %v6027_v46 = vld [vmem:[%s7144_s26 + $0x340] ss:$8 sps:$4 sm:$0xff]  }
 0x5dd   : > { %4322 = vmatprep.subr.bf16.mxu1 %v6084_v10 }
 0x5df   : > { %4377 = vmatpush1.bf16.msra.mxu0 %v5950_v40  ;;  %v6041_v40 = vld [vmem:[%s7144_s26 + $0x364] ss:$8 sps:$4 sm:$0xff]  }
 0x5e0   : > { %4378 = vmatprep.subr.bf16.mxu0 %v5955_v50  ;;  %4323 = vmatpush1.bf16.msra.mxu1 %v6086_v14  ;;  %v6039_v50 = vld [vmem:[%s7144_s26 + $0x360] ss:$8 sps:$4 sm:$0xff]  }
 0x5e1   : > { %v6108_v14 = vld [vmem:[%s7167_s27 + $0x28] sm:$0xff]  }
 0x5e3   : > { %4379 = vmatpush1.bf16.msra.mxu0 %v5953_v52  ;;  %4325 = vmatmul.mubr.bf16.vlgmr.msra.gmra.mrb[0].mxu1 %v5466_v12  ;;  %v6053_v52 = vld [vmem:[%s7144_s26 + $0x384] ss:$8 sps:$4 sm:$0xff]   ;;  %v6111_v12 = vld [vmem:[%s7167_s27 + $0x78] sm:$0xff]  }
 0x5e4   : > { %4380 = vmatprep.subr.bf16.mxu0 %v5958_v15  ;;  %v6051_v15 = vld [vmem:[%s7144_s26 + $0x380] ss:$8 sps:$4 sm:$0xff]  }
 0x5e7   : > { %4381 = vmatpush1.bf16.msra.mxu0 %v5956_v48  ;;  %v6065_v48 = vld [vmem:[%s7144_s26 + $0x3a4] ss:$8 sps:$4 sm:$0xff]  }
 0x5e8   : > { %4382 = vmatprep.subr.bf16.mxu0 %v5961_v16  ;;  %v6063_v16 = vld [vmem:[%s7144_s26 + $0x3a0] ss:$8 sps:$4 sm:$0xff]  }
 0x5eb   : > { %4383 = vmatpush1.bf16.msra.mxu0 %v5959_v49  ;;  %v6077_v49 = vld [vmem:[%s7144_s26 + $0x3c4] ss:$8 sps:$4 sm:$0xff]  }
 0x5ec   : > { %4384 = vmatprep.subr.bf16.mxu0 %v5964_v55  ;;  %v6075_v55 = vld [vmem:[%s7144_s26 + $0x3c0] ss:$8 sps:$4 sm:$0xff]  }
 0x5ef   : > { %4385 = vmatpush1.bf16.msra.mxu0 %v5962_v57  ;;  %v6089_v57 = vld [vmem:[%s7144_s26 + $0x3e4] ss:$8 sps:$4 sm:$0xff]  }
 0x5f0   : > { %4386 = vmatprep.subr.bf16.mxu0 %v5967_v58  ;;  %v6087_v58 = vld [vmem:[%s7144_s26 + $0x3e0] ss:$8 sps:$4 sm:$0xff]  }
 0x5f3   : > { %4387 = vmatpush1.bf16.msra.mxu0 %v5965_v61  ;;  %v6097_v61 = vld [vmem:[%s7167_s27 + $0x40] sm:$0xff]  }
 0x5f4   : > { %4388 = vmatprep.subr.bf16.mxu0 %v5970_v62  ;;  %v6098_v62 = vld [vmem:[%s7167_s27] sm:$0xff]   ;;  %5647 = vmatprep.subr.bf16.mxu1 %v6097_v61 }
 0x5f5   : > { %5648 = vmatpush3.bf16.msra.mxu1 %v6098_v62 }
 0x5f6   : > { %5649 = vmatprep.subr.bf16.mxu1 %v6099_v63 }
 0x5f7   : > { %4389 = vmatpush1.bf16.msra.mxu0 %v5968_v2  ;;  %v6102_v2 = vld [vmem:[%s7167_s27 + $0x10] sm:$0xff]  }
 0x5f8   : > { %4390 = vmatprep.subr.bf16.mxu0 %v5973_v3  ;;  %v6103_v3 = vld [vmem:[%s7167_s27 + $0x58] sm:$0xff]  }
 0x5f9   : > { %5650 = vmatpush3.bf16.msra.mxu1 %v6100_v0 }
 0x5fa   : > { %5651 = vmatprep.subr.bf16.mxu1 %v6101_v1 }
 0x5fb   : > { %4391 = vmatpush1.bf16.msra.mxu0 %v5971_v7 }
 0x5fc   : > { %4392 = vmatprep.subr.bf16.mxu0 %v5976_v9  ;;  %v6106_v9 = vld [vmem:[%s7167_s27 + $0x20] sm:$0xff]  }
 0x5fd   : > { %5652 = vmatpush3.bf16.msra.mxu1 %v6102_v2 }
 0x5fe   : > { %5653 = vmatprep.subr.bf16.mxu1 %v6103_v3  ;;  %v4456_v3 = vld [vmem:[%s703_s18] sm:$0x3] }
 0x5ff   : > { %4393 = vmatpush1.bf16.msra.mxu0 %v5974_v11 }
 0x600   : > { %4394 = vmatprep.subr.bf16.mxu0 %v5979_v13  ;;  %v6107_v13 = vld [vmem:[%s7167_s27 + $0x68] sm:$0xff]  }
 0x601   : > { %5654 = vmatpush3.bf16.msra.mxu1 %v6104_v4  ;;  %v4457_v4 = vld [vmem:[%s712_s8] sm:$0x3] }
 0x602   : > { %5655 = vmatprep.subr.bf16.mxu1 %v6105_v6 }
 0x603   : > { %4395 = vmatpush1.bf16.msra.mxu0 %v5977_v17  ;;  %v6109_v17 = vld [vmem:[%s7167_s27 + $0x70] sm:$0xff]  }
 0x604   : > { %4396 = vmatprep.subr.bf16.mxu0 %v5982_v18  ;;  %v6110_v18 = vld [vmem:[%s7167_s27 + $0x30] sm:$0xff]  }
 0x605   : > { %5656 = vmatpush3.bf16.msra.mxu1 %v6106_v9 }
 0x606   : > { %5657 = vmatprep.subr.bf16.mxu1 %v6107_v13 }
 0x607   : > { %4397 = vmatpush1.bf16.msra.mxu0 %v5980_v19  ;;  %v6112_v19 = vld [vmem:[%s7167_s27 + $0x38] sm:$0xff]  }
 0x608   : > { %4398 = vmatprep.subr.bf16.mxu0 %v5985_v35  ;;  %v6113_v35 = vld [vmem:[%s7172_s30 + $0x40] sm:$0xff]  }
 0x609   : > { %5658 = vmatpush3.bf16.msra.mxu1 %v6108_v14 }
 0x60a   : > { %5659 = vmatprep.subr.bf16.mxu1 %v6109_v17 }
 0x60b   : > { %4399 = vmatpush1.bf16.msra.mxu0 %v5983_v20  ;;  %v3614_v20 = vlaneseq }
 0x60c   : > { %4400 = vmatprep.subr.bf16.mxu0 %v5988_v21 }
 0x60d   : > { %5660 = vmatpush3.bf16.msra.mxu1 %v6110_v18  ;;  %v3615_v21 = vshrl.u32 %v3614_v20, 7 }
 0x60e   : > { %5661 = vmatprep.subr.bf16.mxu1 %v6111_v12 }
 0x60f   : > { %4401 = vmatpush1.bf16.msra.mxu0 %v5986_v22  ;;  %v3616_v22 = vsub.s32 0, %v3615_v21 }
 0x610   : > { %4402 = vmatprep.subr.bf16.mxu0 %v5991_v23  ;;  %v3612_v23 = vld [vmem:[%s694_s19] sm:$0x3] }
 0x611   : > { %5662 = vmatpush3.bf16.msra.mxu1 %v6112_v19  ;;  %v4501_v6 = vrot.slane %v4456_v3, %v3616_v22 }
 0x612   : > { %5669 = vmatprep.subr.bf16.mxu1 %v6113_v35 }
 0x613   : > { %4403 = vmatpush1.bf16.msra.mxu0 %v5989_v36  ;;  %v3620_v36 = vsub.s32 1, %v3615_v21 }
 0x614   : > { %4404 = vmatprep.subr.bf16.mxu0 %v5997_v24  ;;  %v3617_v24 = vrot.slane %v3612_v23, %v3616_v22 }
 0x615   : > { %v4505_v9 = vrot.slane %v4456_v3, %v3620_v36  ;;  %v4518_v14 = vrot.slane %v4457_v4, %v3620_v36 }
 0x617   : > { %4405 = vmatpush1.bf16.msra.mxu0 %v5995_v25  ;;  %v3621_v25 = vrot.slane %v3612_v23, %v3620_v36  ;;  %v6114_v23 = vld [vmem:[%s7172_s30] sm:$0xff]   ;;  %v6117_v36 = vld [vmem:[%s7172_s30 + $0x50] sm:$0xff]  }
 0x618   : > { %4415 = vmatprep.subr.bf16.mxu0 %v6005_v27 }
 0x61a   : > { %4407 = vmatmul.mubr.bf16.vlgmr.msra.gmra.mrb[0].mxu0 %v5470_v29 }
 0x61b   : > { %4416 = vmatpush1.bf16.msra.mxu0 %v6003_v31  ;;  %4447 = vmatprep.mubr.bf16.mxu0 %v5473_v38 }
 0x61c   : > { %4417 = vmatprep.subr.bf16.mxu0 %v6011_v32 }
 0x61f   : > { %4418 = vmatpush1.bf16.msra.mxu0 %v6009_v43 }
 0x620   : > { %4419 = vmatprep.subr.bf16.mxu0 %v6017_v44 }
 0x623   : > { %4420 = vmatpush1.bf16.msra.mxu0 %v6015_v30 }
 0x624   : > { %4421 = vmatprep.subr.bf16.mxu0 %v6023_v8 }
 0x627   : > { %4422 = vmatpush1.bf16.msra.mxu0 %v6021_v45 }
 0x628   : > { %4423 = vmatprep.subr.bf16.mxu0 %v6029_v37 }
 0x62b   : > { %4424 = vmatpush1.bf16.msra.mxu0 %v6027_v46 }
 0x62c   : > { %4425 = vmatprep.subr.bf16.mxu0 %v6035_v33 }
 0x62f   : > { %4426 = vmatpush1.bf16.msra.mxu0 %v6033_v47 }
 0x630   : > { %4427 = vmatprep.subr.bf16.mxu0 %v6041_v40 }
 0x633   : > { %4428 = vmatpush1.bf16.msra.mxu0 %v6039_v50 }
 0x634   : > { %4429 = vmatprep.subr.bf16.mxu0 %v6047_v41 }
 0x637   : > { %4430 = vmatpush1.bf16.msra.mxu0 %v6045_v51 }
 0x638   : > { %4431 = vmatprep.subr.bf16.mxu0 %v6053_v52 }
 0x63b   : > { %4432 = vmatpush1.bf16.msra.mxu0 %v6051_v15 }
 0x63c   : > { %4433 = vmatprep.subr.bf16.mxu0 %v6059_v26 }
 0x63f   : > { %4434 = vmatpush1.bf16.msra.mxu0 %v6057_v42 }
 0x640   : > { %4435 = vmatprep.subr.bf16.mxu0 %v6065_v48 }
 0x643   : > { %4436 = vmatpush1.bf16.msra.mxu0 %v6063_v16 }
 0x644   : > { %4437 = vmatprep.subr.bf16.mxu0 %v6071_v39 }
 0x647   : > { %4438 = vmatpush1.bf16.msra.mxu0 %v6069_v53 }
 0x648   : > { %4439 = vmatprep.subr.bf16.mxu0 %v6077_v49 }
 0x64b   : > { %4440 = vmatpush1.bf16.msra.mxu0 %v6075_v55 }
 0x64c   : > { %4441 = vmatprep.subr.bf16.mxu0 %v6083_v54 }
 0x64f   : > { %4442 = vmatpush1.bf16.msra.mxu0 %v6081_v56 }
 0x650   : > { %4443 = vmatprep.subr.bf16.mxu0 %v6089_v57 }
 0x653   : > { %4444 = vmatpush1.bf16.msra.mxu0 %v6087_v58 }
 0x654   : > { %4445 = vmatprep.subr.bf16.mxu0 %v6094_v59 }
 0x657   : > { %4446 = vmatpush1.bf16.msra.mxu0 %v6092_v60 }
 0x65a   : > { %4448 = vmatmul.mubr.bf16.vlgmr.msra.gmra.mrb[0].mxu0 %v5472_v5 }
 0x6b6   : > { %v4326_v7 = vpop.f32.mrb[0].mxu1 }
 0x6b7   : > { %v4328_v34 = vpop.f32.mrb[1].mxu1  ;;  %v4327_v27 = vadd.f32 %v4326_v7, %v3617_v24 }
 0x6b8   : > { %v4330_v10 = vpop.f32.mrb[2].mxu1  ;;  %v4329_v28 = vadd.f32 %v4328_v34, %v3621_v25  ;;  %v6115_v25 = vld [vmem:[%s7172_s30 + $0x48] sm:$0xff]  }
 0x6b9   : > { %v4331_v11 = vpop.f32.mrb[3].mxu1 }
 0x6ba   : > { %v4514_v11 = vrot.slane %v4457_v4, %v3616_v22  ;;  %v6116_v22 = vld [vmem:[%s7172_s30 + $0x8] sm:$0xff]  }
 0x72d   : > { %v4449_v29 = vpop.f32.mrb[0].mxu0 }
 0x72e   : > { %v5692_v31 = vadd.f32 %v4449_v29, %v4327_v27  ;;  %v4451_v38 = vpop.f32.mrb[1].mxu0  ;;  %v6118_v27 = vld [vmem:[%s7172_s30 + $0x10] sm:$0xff]   ;;  %v6120_v29 = vld [vmem:[%s7172_s30 + $0x18] sm:$0xff]  }
 0x72f   : > { %v5694_v32 = vadd.f32 %v4451_v38, %v4329_v28  ;;  %v4453_v43 = vpop.f32.mrb[2].mxu0  ;;  %v6119_v28 = vld [vmem:[%s7172_s30 + $0x58] sm:$0xff]   ;;  %v6122_v38 = vld [vmem:[%s7172_s30 + $0x20] sm:$0xff]  }
 0x730   : > { %v4458_v44 = vrot.slane %v5692_v31, 4  ;;  %v4454_v30 = vpop.f32.mrb[3].mxu0  ;;  %v6124_v43 = vld [vmem:[%s7172_s30 + $0x28] sm:$0xff]  }
 0x731   : > { %v4464_v8 = vrot.slane %v5694_v32, 4  ;;  %v6126_v30 = vld [vmem:[%s7172_s30 + $0x30] sm:$0xff]  }
 0x732   : > { %v4459_v45 = vadd.f32 %v5692_v31, %v4458_v44  ;;  %v6125_v44 = vld [vmem:[%s7172_s30 + $0x70] sm:$0xff]  }
 0x733   : > { %v4465_v37 = vadd.f32 %v5694_v32, %v4464_v8  ;;  %v6127_v8 = vld [vmem:[%s7172_s30 + $0x78] sm:$0xff]  }
 0x734   : > { %v4460_v46 = vrot.slane %v4459_v45, 2 }
 0x735   : > { %v4466_v33 = vrot.slane %v4465_v37, 2 }
 0x736   : > { %v4461_v47 = vadd.f32 %v4460_v46, %v4459_v45  ;;  %v6128_v45 = vld [vmem:[%s7172_s30 + $0x38] sm:$0xff]   ;;  %v4527_v46 = vld [vmem:[#allocation3] sm:$0xff] }
 0x737   : > { %v4467_v40 = vadd.f32 %v4466_v33, %v4465_v37 }
 0x738   : > { %v4462_v50 = vrot.slane %v4461_v47, 1 }
 0x739   : > { %v4468_v41 = vrot.slane %v4467_v40, 1 }
 0x73a   : > { %v4463_v51 = vadd.f32 %v4462_v50, %v4461_v47 }
 0x73b   : > { %v4469_v52 = vadd.f32 %v4468_v41, %v4467_v40 }
 0x73c   : > { %v4471_v15 = vmul.f32 0.125, %v4463_v51 }
 0x73d   : > { %v4472_v26 = vmul.f32 0.125, %v4469_v52  ;;  %v4699_v52 = vld [vmem:[#allocation4] sm:$0xff] }
 0x73e   : > { %v4473_v42 = vsub.f32 %v5692_v31, %v4471_v15  ;;  %v6121_v31 = vld [vmem:[%s7172_s30 + $0x60] sm:$0xff]  }
 0x73f   : > { %v4474_v48 = vsub.f32 %v5694_v32, %v4472_v26  ;;  %v6123_v32 = vld [vmem:[%s7172_s30 + $0x68] sm:$0xff]  }
 0x740   : > { %v4475_v16 = vmul.f32 %v4473_v42, %v4473_v42 }
 0x741   : > { %v4476_v39 = vmul.f32 %v4474_v48, %v4474_v48 }
 0x742   : > { %v4477_v53 = vrot.slane %v4475_v16, 4 }
 0x743   : > { %v4483_v49 = vrot.slane %v4476_v39, 4 }
 0x744   : > { %v4478_v55 = vadd.f32 %v4477_v53, %v4475_v16 }
 0x745   : > { %v4484_v54 = vadd.f32 %v4483_v49, %v4476_v39 }
 0x746   : > { %v4479_v56 = vrot.slane %v4478_v55, 2 }
 0x747   : > { %v4485_v57 = vrot.slane %v4484_v54, 2 }
 0x748   : > { %v4480_v58 = vadd.f32 %v4479_v56, %v4478_v55 }
 0x749   : > { %v4486_v59 = vadd.f32 %v4485_v57, %v4484_v54 }
 0x74a   : > { %v4481_v60 = vrot.slane %v4480_v58, 1 }
 0x74b   : > { %v4487_v5 = vrot.slane %v4486_v59, 1 }
 0x74c   : > { %v4482_v61 = vadd.f32 %v4481_v60, %v4480_v58 }
 0x74d   : > { %v4488_v62 = vadd.f32 %v4487_v5, %v4486_v59 }
 0x74e   : > { %v4489_v63 = vmul.f32 0.125, %v4482_v61 }
 0x74f   : > { %v4490_v0 = vmul.f32 0.125, %v4488_v62  ;;  %v4887_v62 = vld [vmem:[#allocation5] sm:$0xff] (!%p5634_p2) }
 0x750   : > { %v4491_v1 = vadd.f32 1e-05, %v4489_v63 }
 0x751   : > { %v4492_v2 = vadd.f32 1e-05, %v4490_v0 }
 0x752   : > { %6129 = vrsqrt.f32 %v4491_v1 }
 0x753   : > { %6131 = vrsqrt.f32 %v4492_v2 }
 0x75c   : > { %v6130_v7 = vpop.eup %6129 }
 0x75d   : > { %v6132_v34 = vpop.eup %6131  ;;  %v4495_v10 = vmul.f32 %v6130_v7, %v4473_v42 }
 0x75e   : > { %v4496_v13 = vmul.f32 %v6132_v34, %v4474_v48 }
 0x75f   : > { %v4508_v17 = vmul.f32 %v4501_v6, %v4495_v10 }
 0x760   : > { %v4509_v18 = vmul.f32 %v4505_v9, %v4496_v13 }
 0x761   : > { %v4521_v12 = vadd.f32 %v4514_v11, %v4508_v17 }
 0x762   : > { %v4522_v19 = vadd.f32 %v4518_v14, %v4509_v18 }
 0x763   : > { %v4523_v35 = vmax.f32 %v4521_v12, 0.0 }
 0x764   : > { %v4524_v20 = vmax.f32 %v4522_v19, 0.0 }
 0x765   : > { %v4525_v24 = vpack.c.bf16 %v4523_v35, %v4523_v35 }
 0x766   : > { %v4526_v21 = vpack.c.bf16 %v4524_v20, %v4524_v20 }
 0x768   : > { %4688 = vmatprep.mubr.bf16.mxu1 %v4526_v21 }
 0x769   : > { %4689 = vmatmul.mubr.bf16.vlgmr.msra.gmra.mrb[4].mxu1 %v4525_v24 }
 0x76a   : > { %5670 = vmatpush3.bf16.msra.mxu1 %v6114_v23  ;;  %4860 = vmatprep.mubr.bf16.mxu1 %v4526_v21 }
 0x76b   : > { %5671 = vmatprep.subr.bf16.mxu1 %v6115_v25 }
 0x76e   : > { %5672 = vmatpush3.bf16.msra.mxu1 %v6116_v22 }
 0x76f   : > { %5673 = vmatprep.subr.bf16.mxu1 %v6117_v36 }
 0x772   : > { %5674 = vmatpush3.bf16.msra.mxu1 %v6118_v27 }
 0x773   : > { %5675 = vmatprep.subr.bf16.mxu1 %v6119_v28 }
 0x776   : > { %5676 = vmatpush3.bf16.msra.mxu1 %v6120_v29 }
 0x777   : > { %5677 = vmatprep.subr.bf16.mxu1 %v6121_v31 }
 0x77a   : > { %5678 = vmatpush3.bf16.msra.mxu1 %v6122_v38 }
 0x77b   : > { %5679 = vmatprep.subr.bf16.mxu1 %v6123_v32 }
 0x77e   : > { %5680 = vmatpush3.bf16.msra.mxu1 %v6124_v43 }
 0x77f   : > { %5681 = vmatprep.subr.bf16.mxu1 %v6125_v44 }
 0x782   : > { %5682 = vmatpush3.bf16.msra.mxu1 %v6126_v30 }
 0x783   : > { %5683 = vmatprep.subr.bf16.mxu1 %v6127_v8 }
 0x786   : > { %5684 = vmatpush3.bf16.msra.mxu1 %v6128_v45 }
 0x789   : > { %4861 = vmatmul.mubr.bf16.vlgmr.msra.gmra.mrb[8].mxu1 %v4525_v24 }
 0x83c   : > { %v5663_v37 = vpop.f32.mrb[4].mxu1 }
 0x83d   : > { %v5664_v33 = vpop.f32.mrb[5].mxu1 }
 0x83e   : > { %v5665_v47 = vadd.f32 %v5664_v33, %v5663_v37  ;;  %v5666_v40 = vpop.f32.mrb[6].mxu1 }
 0x83f   : > { %v5667_v50 = vpop.f32.mrb[7].mxu1 }
 0x840   : > { %v4696_v41 = vadd.f32 %v5665_v47, %v4527_v46 }
 0x842   : > { %4698 = vst.msk [vmem:[#allocation3] sm:$0xff] %vm4697_vm8, %v4696_v41 }
 0x849   : > { %v4874_v39 = vld [vmem:[#allocation3] sm:$0xff] (!%p5634_p2) }
 0x84a   : > { %v4875_v49 = vsub.f32 (!%p5634_p2), 0.0, %v4874_v39 }
 0x84c   : > { %v4876_v54 = vmul.f32 (!%p5634_p2), 1.442695, %v4875_v49 }
 0x84e   : > { %6133 = vpow2.f32 (!%p5634_p2), %v4876_v54 }
 0x858   : > { %v6134_v57 = vpop.eup (!%p5634_p2), %6133 }
 0x859   : > { %v4878_v59 = vadd.f32 (!%p5634_p2), 1.0, %v6134_v57 }
 0x85c   : > { %v5685_v51 = vpop.f32.mrb[8].mxu1  ;;  %4873 = sbr.rel (%p5634_p2) target bundleno = 2187 (0x88b), region = 148 }
 0x85d   : > { %v5686_v15 = vpop.f32.mrb[9].mxu1 }
 0x85e   : > { %v5687_v26 = vadd.f32 %v5686_v15, %v5685_v51  ;;  %v5688_v42 = vpop.f32.mrb[10].mxu1 }
 0x85f   : > { %v5689_v48 = vpop.f32.mrb[11].mxu1 }
 0x860   : > { %v4868_v16 = vadd.f32 %v5687_v26, %v4699_v52 }
 0x862   : > { %4869 = vst.msk [vmem:[#allocation4] sm:$0xff] %vm4697_vm8, %v4868_v16 }
 0x869   : > { %v4880_v53 = vld [vmem:[#allocation4] sm:$0xff] }
 0x86a   : > { %v4881_v55 = vsub.f32 0.0, %v4880_v53 }
 0x86c   : > { %v4882_v56 = vmul.f32 1.442695, %v4881_v55 }
 0x86e   : > { %6135 = vpow2.f32 %v4882_v56 }
 0x86f   : > { %6137 = vrcp.f32 %v4878_v59 }
 0x878   : > { %v6136_v58 = vpop.eup %6135 }
 0x879   : > { %v4884_v60 = vadd.f32 1.0, %v6136_v58  ;;  %v6138_v5 = vpop.eup %6137 }
 0x87b   : > { %6139 = vrcp.f32 %v4884_v60 }
 0x885   : > { %v6140_v61 = vpop.eup %6139 }
 0x886   : > { %v4886_v63 = vadd.f32 %v6140_v61, %v6138_v5 }
 0x888   : > { %v4888_v0 = vmul.f32 %v4887_v62, %v4886_v63 }
 0x88a   : > { %4889 = vst.msk [vmem:[#allocation25] sm:$0xff] %vm4697_vm8, %v4888_v0 }
 0x88b PF: > { %s7694_s11 = sld [smem:[#allocation36_spill]]  ;;  %s6657_s24 = smov [#allocation25]  }
 0x88c   : > { %s4897_s0 = sshll.u32 %s6657_s24, 4  ;;  %s4898_s0 = int_to_ptr.vmem [resolvable:$true] %s4897_s0 }
 0x88d   : > { %s6541_s26 = scalar_lea.vmem %s4898_s0, 128  ;;  %p6548_p0 = scmp.lt.s32.totalorder %s4898_s0, %s4898_s0 }
 0x88e   : > { %p6542_p7 = scmp.ne.s32.totalorder %s4898_s0, %s6541_s26  ;;  %p6549_p8 = scmp.lt.s32.totalorder %s6541_s26, %s6541_s26 }
 0x890   : > { %p6550_p12 = por %p6549_p8, %p6548_p0 }
 0x891   : > { %p5820_p11 = scmp.eq.s32.totalorder %s7694_s11, 3 }
 0x893   : > { %p6543_p13 = pnand %p6542_p7, %p5820_p11 }
 0x895   : > { %p6544_p10 = pneg %p6543_p13 }
 0x897   : > { %p6551_p3 = pnand %p6550_p12, %p6544_p10 }
 0x899   : > { %6554 = shalt.err (!%p6551_p3)
}
 0x89a   : > { %s7695_s18 = sld [smem:[#allocation50_spill]] }
 0x8a0   : > { %s6555_s8 = scalar_lea.hbm %s7695_s18, 128 }
 0x8a1   : > { %p6556_p6 = scmp.ne.s32.totalorder %s7695_s18, %s6555_s8  ;;  %p6561_p9 = scmp.lt.u32.totalorder %s6555_s8, %s7695_s18 }
 0x8a3   : > { %p6557_p5 = pnand %p6556_p6, %p5820_p11 }
 0x8a5   : > { %p6558_p1 = pneg %p6557_p5 }
 0x8a7   : > { %p6563_p4 = pnand %p6561_p9, %p6558_p1 }
 0x8a9   : > { %6566 = shalt.err (!%p6563_p4)
}
 0x8aa   : > { %5752 = dma.vmem_to_hbm [thread:$0]  (%p5820_p11), %s4898_s0, 128, %s7695_s18, [#allocation7]  }
 0x8ab   : > { %6616 = dma.done.wait (%p5820_p11), [#allocation7], 128  }
 0x8ac   : > { %6618 = vsyncadd (%p5820_p11), [#allocation7], 4294967168 }
 0x8ad PF: > { %s7696_s24 = sld [smem:[#allocation38_spill]]  ;;  %s7697_s21 = sld [smem:[#allocation35_spill]] }
 0x8ae   : > { %s7698_s16 = sld [smem:[#allocation39_spill]]  ;;  %s7699_s22 = smov %s6629_s23 }
 0x8b3   : > { %p29_p2 = scmp.ge.s32.totalorder %s7696_s24, 6  }
 0x8b4   : > { %s7700_s23 = smov %s7698_s16 }
 0x8b5   :  { %31 = sbr.rel (!%p29_p2) target bundleno = 18 (0x12), region = 207 }
 0x8bc   :  { %4910 = vsyncpa [#allocation6], 1 }
 0x8bd   :  { %4912 = vsyncpa [#allocation6 + $0x1], 1 }
 0x8be   :  { %4913 = vsyncpa [#allocation9], 1 }
 0x8bf   :  { %4914 = vsyncpa [#allocation12], 1 }
 0x8c0   :  { %4915 = vsyncpa [#allocation15], 1 }
 0x8c1   :  { %4916 = vsyncpa [#allocation18], 1 }
 0x8c2   :  { %4917 = vsyncpa [#allocation7], 1 }
 0x8c3   :  { %4919 = vsyncpa [#allocation7 + $0x1], 1 }

</bundles_post_ra>
